<compile_context>
chip_gen: v7x
topology: tpu7x:2x2x1
jax: 0.10.0
libtpu: 0.0.40
codegen_flags: <defaults>
</compile_context>

<pallas_src>
import functools

import jax
import jax.numpy as jnp
from jax.experimental import pallas as pl
from jax.experimental.pallas import tpu as pltpu

_IGNORE_INDEX = -100
_NEG_INF = -1e30  # finite "-inf": avoids inf-inf NaNs on padded vocab lanes


def _round_up(x, m):
    return ((x + m - 1) // m) * m


def _seq_ce_kernel(meta_ref,             # SMEM (1,) int32: last needed row block
                   logits_ref,           # VMEM (TR, TV)  native dtype
                   tgt_ref,              # VMEM (TR, 1)   int32
                   w_ref,                # VMEM (TR, 1)   f32  (mask * 1/S)
                   loss_ref,             # VMEM (TR, 1)   f32  out
                   m_scr, l_scr, t_scr,  # VMEM (TR, 1)   f32  scratch
                   *, vocab, tr, tv, n_v):
    r_idx = pl.program_id(0)
    v_idx = pl.program_id(1)
    do_work = r_idx <= meta_ref[0]        # row tile holds any valid position?

    # ---- init online-softmax state on the first vocab tile -----------------
    @pl.when(do_work & (v_idx == 0))
    def _init():
        m_scr[...] = jnp.full((tr, 1), _NEG_INF, jnp.float32)
        l_scr[...] = jnp.zeros((tr, 1), jnp.float32)
        t_scr[...] = jnp.zeros((tr, 1), jnp.float32)

    # ---- online logsumexp + target-logit accumulation over vocab tiles -----
    def _update(mask_tail):
        logits = logits_ref[...]                                   # (TR, TV)
        iota = jax.lax.broadcasted_iota(jnp.int32, (tr, tv), 1)    # local ids
        if mask_tail:
            # only the last vocab tile carries padded lanes
            limit = vocab - v_idx * tv
            logits = jnp.where(iota < limit, logits,
                               jnp.asarray(_NEG_INF, dtype=logits.dtype))
        # running max on the native dtype (bf16 VALU on v6e/v7x); f32 accum
        tile_max = jnp.max(logits, axis=-1, keepdims=True).astype(jnp.float32)
        m_prev = m_scr[...]
        m_new = jnp.maximum(m_prev, tile_max)
        alpha = jnp.exp(m_prev - m_new)
        p = jnp.exp(logits.astype(jnp.float32) - m_new)            # (TR, TV)
        l_scr[...] = l_scr[...] * alpha + jnp.sum(p, axis=-1, keepdims=True)
        m_scr[...] = m_new
        # target-class logit: relative-id compare against the local iota
        # (no (TR,TV) iota add, no f32 one-hot). targets == -100 never match.
        tgt_rel = tgt_ref[...] - v_idx * tv                        # (TR, 1)
        hit = iota == tgt_rel
        t_hit = jnp.sum(jnp.where(hit, logits, jnp.zeros_like(logits)),
                        axis=-1, keepdims=True).astype(jnp.float32)
        t_scr[...] = t_scr[...] + t_hit

    if vocab % tv != 0:
        @pl.when(do_work & (v_idx == n_v - 1))
        def _update_masked():
            _update(mask_tail=True)

        @pl.when(do_work & (v_idx != n_v - 1))
        def _update_plain():
            _update(mask_tail=False)
    else:
        @pl.when(do_work)
        def _update_all():
            _update(mask_tail=False)

    # ---- finalize: per-row CE * (length & ignore mask * 1/S) ---------------
    @pl.when(do_work & (v_idx == n_v - 1))
    def _finalize():
        lse = m_scr[...] + jnp.log(l_scr[...])
        loss_ref[...] = (lse - t_scr[...]) * w_ref[...]

    # ---- fully masked row tile: contribution is exactly zero ---------------
    @pl.when(jnp.logical_not(do_work) & (v_idx == n_v - 1))
    def _skipped():
        loss_ref[...] = jnp.zeros((tr, 1), jnp.float32)


def sequence_length_cross_entropy_loss(inputs, targets, valid_lengths,
                                       *, tr=256, tv=2048):
    """JAX/Pallas equivalent of SequenceLengthCrossEntropyLoss.forward.

    inputs        : (SEQ, BATCH, VOCAB) float (f32 or bf16)
    targets       : (BATCH, SEQ)        int   (-100 == ignore_index)
    valid_lengths : (BATCH,)            int
    returns       : (BATCH,)            float32 masked mean loss
    """
    S, B, V = inputs.shape
    total_rows = S * B
    itemsize = jnp.dtype(inputs.dtype).itemsize
    row_align = 16 if itemsize == 2 else 8

    tr = min(tr, _round_up(total_rows, row_align))
    tv = min(tv, _round_up(V, 128))
    # keep >= 2 row tiles when possible so both v7x TensorCores get seq work
    if pl.cdiv(total_rows, tr) < 2 and total_rows > row_align:
        tr = _round_up(pl.cdiv(total_rows, 2), row_align)
    n_r = pl.cdiv(total_rows, tr)
    n_v = pl.cdiv(V, tv)

    # (S, B, V) -> (S*B, V): contiguous, free reshape; rows dense on sublanes.
    logits_flat = inputs.reshape(total_rows, V)
    # row r = s*B + b  ->  target[b, s]  (tiny int tensor; transpose is free)
    targets_col = jnp.transpose(targets.astype(jnp.int32), (1, 0)).reshape(
        total_rows, 1)
    # per-row weight = (pos < valid_len[b]) * (target != ignore) * (1/S)
    rows = jnp.arange(total_rows, dtype=jnp.int32)
    pos = rows // B
    bat = rows % B
    lengths = valid_lengths.astype(jnp.int32)
    weight = (((pos < lengths[bat]) & (targets_col[:, 0] != _IGNORE_INDEX))
              .astype(jnp.float32) / jnp.float32(S)).reshape(total_rows, 1)

    # scalar prefetch: last row block that holds any valid position (hoisted
    # max(valid_lengths) so neither the kernel nor the index_map recomputes it)
    max_len = jnp.max(lengths)
    last_needed = jnp.maximum((max_len * B - 1) // tr, 0).astype(jnp.int32)
    meta = last_needed.reshape(1)

    def logits_index_map(r, v, meta_ref):
        ln = meta_ref[0]
        skip = r > ln
        # clamp skipped tiles to the block fetched on the previous grid step
        # (last_needed, n_v-1) so the pipeline dedups the DMA immediately.
        return (jnp.where(skip, ln, r), jnp.where(skip, n_v - 1, v))

    small_map = lambda r, v, meta_ref: (r, 0)

    kernel = functools.partial(_seq_ce_kernel, vocab=V, tr=tr, tv=tv, n_v=n_v)

    tile_bytes = tr * tv * itemsize
    vmem_limit = int(min(64 * 1024 * 1024,
                         max(32 * 1024 * 1024, 8 * tile_bytes)))
    cost = pl.CostEstimate(
        flops=6 * total_rows * V,
        transcendentals=total_rows * V,
        bytes_accessed=total_rows * V * itemsize + 3 * total_rows * 4)

    per_row = pl.pallas_call(
        kernel,
        out_shape=jax.ShapeDtypeStruct((total_rows, 1), jnp.float32),
        grid_spec=pltpu.PrefetchScalarGridSpec(
            num_scalar_prefetch=1,            # [last_needed] -> SMEM
            grid=(n_r, n_v),                  # vocab (reduction) axis last
            in_specs=[
                pl.BlockSpec((tr, tv), logits_index_map),
                pl.BlockSpec((tr, 1), small_map),
                pl.BlockSpec((tr, 1), small_map),
            ],
            out_specs=pl.BlockSpec((tr, 1), small_map),
            scratch_shapes=[pltpu.VMEM((tr, 1), jnp.float32)] * 3),
        compiler_params=pltpu.CompilerParams(
            dimension_semantics=("parallel", "arbitrary"),
            vmem_limit_bytes=vmem_limit),
        cost_estimate=cost,
    )(meta, logits_flat, targets_col, weight)

    # weight already carries the 1/S factor -> masked mean over the seq axis
    return jnp.sum(per_row.reshape(S, B), axis=0)


def _reference(inputs, targets, valid_lengths):
    """Pure-JAX reference mirroring the PyTorch module."""
    S, B, V = inputs.shape
    logits = jnp.transpose(inputs, (1, 0, 2)).astype(jnp.float32)   # (B, S, V)
    logp = jax.nn.log_softmax(logits, axis=-1)
    safe_t = jnp.where(targets == _IGNORE_INDEX, 0, targets)
    nll = -jnp.take_along_axis(logp, safe_t[..., None].astype(jnp.int32),
                               axis=-1)[..., 0]
    nll = jnp.where(targets == _IGNORE_INDEX, 0.0, nll)
    mask = (jnp.arange(S)[None, :] < valid_lengths[:, None]).astype(jnp.float32)
    return (nll * mask).mean(axis=1)


if __name__ == "__main__":
    key = jax.random.PRNGKey(0)
    SEQ, BATCH, VOCAB = 256, 4, 384     # VOCAB % TV != 0 -> exercises lane mask
    TR, TV = 256, 256                   # 4x2 grid -> exercises online accum

    k1, k2, k3 = jax.random.split(key, 3)
    inputs = jax.random.normal(k1, (SEQ, BATCH, VOCAB), dtype=jnp.float32)
    targets = jax.random.randint(k2, (BATCH, SEQ), 0, VOCAB, dtype=jnp.int32)
    # exercise ignore_index=-100 inside the valid region
    targets = targets.at[0, 3].set(-100)
    targets = targets.at[2, 0].set(-100)
    # max length < 100 -> trailing row tiles are fully masked (exercises skip)
    valid_lengths = jax.random.randint(k3, (BATCH,), 1, 100, dtype=jnp.int32)

    out = sequence_length_cross_entropy_loss(inputs, targets, valid_lengths,
                                             tr=TR, tv=TV)
    out = jax.block_until_ready(out)

    ref = _reference(inputs, targets, valid_lengths)
    assert out.shape == (BATCH,)
    assert jnp.allclose(out, ref, atol=1e-5, rtol=1e-4), (out, ref)
    print("KERNEL_OK")
</pallas_src>

<mosaic_0001>
module attributes {stable_mosaic.version = 11 : i64} {
  func.func @_seq_ce_kernel(%arg0: i32, %arg1: i32, %arg2: memref<1xi32, #tpu.memory_space<smem>>, %arg3: memref<256x256xf32, #tpu.memory_space<vmem>>, %arg4: memref<256x1xi32, #tpu.memory_space<vmem>>, %arg5: memref<256x1xf32, #tpu.memory_space<vmem>>, %arg6: memref<256x1xf32, #tpu.memory_space<vmem>>, %arg7: memref<256x1xf32, #tpu.memory_space<vmem>>, %arg8: memref<256x1xf32, #tpu.memory_space<vmem>>, %arg9: memref<256x1xf32, #tpu.memory_space<vmem>>) attributes {dimension_semantics = [#tpu.dimension_semantics<parallel>, #tpu.dimension_semantics<arbitrary>], iteration_bounds = array<i64: 4, 2>, scalar_prefetch = 1 : i64, scratch_operands = 3 : i64, tpu.core_type = #tpu.core_type<tc>, window_params = [{transform_indices = @transform_0, window_bounds = array<i64: 256, 256>}, {transform_indices = @transform_1, window_bounds = array<i64: 256, 1>}, {transform_indices = @transform_2, window_bounds = array<i64: 256, 1>}, {transform_indices = @transform_3, window_bounds = array<i64: 256, 1>}]} {
    %c0 = arith.constant 0 : index
    %0 = memref.load %arg2[%c0] : memref<1xi32, #tpu.memory_space<smem>>
    %1 = arith.cmpi sle, %arg0, %0 : i32
    %c0_i32 = arith.constant 0 : i32
    %2 = arith.cmpi eq, %arg1, %c0_i32 : i32
    %3 = arith.andi %1, %2 : i1
    %4 = arith.extui %3 : i1 to i32
    %c0_i32_0 = arith.constant 0 : i32
    %5 = arith.cmpi ne, %4, %c0_i32_0 : i32
    scf.if %5 {
      %cst = arith.constant -1.000000e+30 : f32
      %23 = vector.broadcast %cst : f32 to vector<256x1xf32>
      %c0_8 = arith.constant 0 : index
      %c0_9 = arith.constant 0 : index
      %24 = vector.load %arg7[%c0_8, %c0_9] : memref<256x1xf32, #tpu.memory_space<vmem>>, vector<256x1xf32>
      tpu.vector_store %arg7[%c0_8, %c0_9], %23 {strides = array<i32>} : memref<256x1xf32, #tpu.memory_space<vmem>>, vector<256x1xf32>,
      %cst_10 = arith.constant 0.000000e+00 : f32
      %25 = vector.broadcast %cst_10 : f32 to vector<256x1xf32>
      %c0_11 = arith.constant 0 : index
      %c0_12 = arith.constant 0 : index
      %26 = vector.load %arg8[%c0_11, %c0_12] : memref<256x1xf32, #tpu.memory_space<vmem>>, vector<256x1xf32>
      tpu.vector_store %arg8[%c0_11, %c0_12], %25 {strides = array<i32>} : memref<256x1xf32, #tpu.memory_space<vmem>>, vector<256x1xf32>,
      %cst_13 = arith.constant 0.000000e+00 : f32
      %27 = vector.broadcast %cst_13 : f32 to vector<256x1xf32>
      %c0_14 = arith.constant 0 : index
      %c0_15 = arith.constant 0 : index
      %28 = vector.load %arg9[%c0_14, %c0_15] : memref<256x1xf32, #tpu.memory_space<vmem>>, vector<256x1xf32>
      tpu.vector_store %arg9[%c0_14, %c0_15], %27 {strides = array<i32>} : memref<256x1xf32, #tpu.memory_space<vmem>>, vector<256x1xf32>,
    } else {
    }
    %c1_i32 = arith.constant 1 : i32
    %6 = arith.cmpi eq, %arg1, %c1_i32 : i32
    %7 = arith.andi %1, %6 : i1
    %8 = arith.extui %7 : i1 to i32
    %c0_i32_1 = arith.constant 0 : i32
    %9 = arith.cmpi ne, %8, %c0_i32_1 : i32
    scf.if %9 {
      %c0_8 = arith.constant 0 : index
      %c0_9 = arith.constant 0 : index
      %23 = vector.load %arg3[%c0_8, %c0_9] : memref<256x256xf32, #tpu.memory_space<vmem>>, vector<256x256xf32>
      %24 = tpu.iota {dimensions = array<i32: 1>} : vector<256x256xi32>
      %c256_i32 = arith.constant 256 : i32
      %25 = arith.muli %arg1, %c256_i32 : i32
      %c384_i32 = arith.constant 384 : i32
      %26 = arith.subi %c384_i32, %25 : i32
      %27 = vector.broadcast %26 : i32 to vector<256x256xi32>
      %28 = arith.cmpi slt, %24, %27 : vector<256x256xi32>
      %cst = arith.constant -1.000000e+30 : f32
      %29 = vector.broadcast %cst : f32 to vector<256x256xf32>
      %30 = arith.select %28, %23, %29 : vector<256x256xi1>, vector<256x256xf32>
      %cst_10 = arith.constant dense<0xFF800000> : vector<256xf32>
      %31 = vector.multi_reduction <maximumf>, %30, %cst_10 [1] : vector<256x256xf32> to vector<256xf32>
      %32 = vector.shape_cast %31 : vector<256xf32> to vector<256x1xf32>
      %c0_11 = arith.constant 0 : index
      %c0_12 = arith.constant 0 : index
      %33 = vector.load %arg7[%c0_11, %c0_12] : memref<256x1xf32, #tpu.memory_space<vmem>>, vector<256x1xf32>
      %34 = arith.maximumf %33, %32 : vector<256x1xf32>
      %35 = arith.subf %33, %34 : vector<256x1xf32>
      %36 = math.exp %35 : vector<256x1xf32>
      %37 = vector.broadcast %34 : vector<256x1xf32> to vector<256x256xf32>
      %38 = arith.subf %30, %37 : vector<256x256xf32>
      %39 = math.exp %38 : vector<256x256xf32>
      %c0_13 = arith.constant 0 : index
      %c0_14 = arith.constant 0 : index
      %40 = vector.load %arg8[%c0_13, %c0_14] : memref<256x1xf32, #tpu.memory_space<vmem>>, vector<256x1xf32>
      %41 = arith.mulf %40, %36 : vector<256x1xf32>
      %cst_15 = arith.constant dense<0.000000e+00> : vector<256xf32>
      %42 = vector.multi_reduction <add>, %39, %cst_15 [1] : vector<256x256xf32> to vector<256xf32>
      %43 = vector.shape_cast %42 : vector<256xf32> to vector<256x1xf32>
      %44 = arith.addf %41, %43 : vector<256x1xf32>
      %c0_16 = arith.constant 0 : index
      %c0_17 = arith.constant 0 : index
      %45 = vector.load %arg8[%c0_16, %c0_17] : memref<256x1xf32, #tpu.memory_space<vmem>>, vector<256x1xf32>
      tpu.vector_store %arg8[%c0_16, %c0_17], %44 {strides = array<i32>} : memref<256x1xf32, #tpu.memory_space<vmem>>, vector<256x1xf32>,
      %c0_18 = arith.constant 0 : index
      %c0_19 = arith.constant 0 : index
      %46 = vector.load %arg7[%c0_18, %c0_19] : memref<256x1xf32, #tpu.memory_space<vmem>>, vector<256x1xf32>
      tpu.vector_store %arg7[%c0_18, %c0_19], %34 {strides = array<i32>} : memref<256x1xf32, #tpu.memory_space<vmem>>, vector<256x1xf32>,
      %c0_20 = arith.constant 0 : index
      %c0_21 = arith.constant 0 : index
      %47 = vector.load %arg4[%c0_20, %c0_21] : memref<256x1xi32, #tpu.memory_space<vmem>>, vector<256x1xi32>
      %c256_i32_22 = arith.constant 256 : i32
      %48 = arith.muli %arg1, %c256_i32_22 : i32
      %49 = vector.broadcast %48 : i32 to vector<256x1xi32>
      %50 = arith.subi %47, %49 : vector<256x1xi32>
      %51 = vector.broadcast %50 : vector<256x1xi32> to vector<256x256xi32>
      %52 = arith.cmpi eq, %24, %51 : vector<256x256xi32>
      %cst_23 = arith.constant 0.000000e+00 : f32
      %53 = vector.broadcast %cst_23 : f32 to vector<256x256xf32>
      %54 = arith.select %52, %30, %53 : vector<256x256xi1>, vector<256x256xf32>
      %cst_24 = arith.constant dense<0.000000e+00> : vector<256xf32>
      %55 = vector.multi_reduction <add>, %54, %cst_24 [1] : vector<256x256xf32> to vector<256xf32>
      %56 = vector.shape_cast %55 : vector<256xf32> to vector<256x1xf32>
      %c0_25 = arith.constant 0 : index
      %c0_26 = arith.constant 0 : index
      %57 = vector.load %arg9[%c0_25, %c0_26] : memref<256x1xf32, #tpu.memory_space<vmem>>, vector<256x1xf32>
      %58 = arith.addf %57, %56 : vector<256x1xf32>
      %c0_27 = arith.constant 0 : index
      %c0_28 = arith.constant 0 : index
      %59 = vector.load %arg9[%c0_27, %c0_28] : memref<256x1xf32, #tpu.memory_space<vmem>>, vector<256x1xf32>
      tpu.vector_store %arg9[%c0_27, %c0_28], %58 {strides = array<i32>} : memref<256x1xf32, #tpu.memory_space<vmem>>, vector<256x1xf32>,
    } else {
    }
    %c1_i32_2 = arith.constant 1 : i32
    %10 = arith.cmpi ne, %arg1, %c1_i32_2 : i32
    %11 = arith.andi %1, %10 : i1
    %12 = arith.extui %11 : i1 to i32
    %c0_i32_3 = arith.constant 0 : i32
    %13 = arith.cmpi ne, %12, %c0_i32_3 : i32
    scf.if %13 {
      %c0_8 = arith.constant 0 : index
      %c0_9 = arith.constant 0 : index
      %23 = vector.load %arg3[%c0_8, %c0_9] : memref<256x256xf32, #tpu.memory_space<vmem>>, vector<256x256xf32>
      %24 = tpu.iota {dimensions = array<i32: 1>} : vector<256x256xi32>
      %cst = arith.constant dense<0xFF800000> : vector<256xf32>
      %25 = vector.multi_reduction <maximumf>, %23, %cst [1] : vector<256x256xf32> to vector<256xf32>
      %26 = vector.shape_cast %25 : vector<256xf32> to vector<256x1xf32>
      %c0_10 = arith.constant 0 : index
      %c0_11 = arith.constant 0 : index
      %27 = vector.load %arg7[%c0_10, %c0_11] : memref<256x1xf32, #tpu.memory_space<vmem>>, vector<256x1xf32>
      %28 = arith.maximumf %27, %26 : vector<256x1xf32>
      %29 = arith.subf %27, %28 : vector<256x1xf32>
      %30 = math.exp %29 : vector<256x1xf32>
      %31 = vector.broadcast %28 : vector<256x1xf32> to vector<256x256xf32>
      %32 = arith.subf %23, %31 : vector<256x256xf32>
      %33 = math.exp %32 : vector<256x256xf32>
      %c0_12 = arith.constant 0 : index
      %c0_13 = arith.constant 0 : index
      %34 = vector.load %arg8[%c0_12, %c0_13] : memref<256x1xf32, #tpu.memory_space<vmem>>, vector<256x1xf32>
      %35 = arith.mulf %34, %30 : vector<256x1xf32>
      %cst_14 = arith.constant dense<0.000000e+00> : vector<256xf32>
      %36 = vector.multi_reduction <add>, %33, %cst_14 [1] : vector<256x256xf32> to vector<256xf32>
      %37 = vector.shape_cast %36 : vector<256xf32> to vector<256x1xf32>
      %38 = arith.addf %35, %37 : vector<256x1xf32>
      %c0_15 = arith.constant 0 : index
      %c0_16 = arith.constant 0 : index
      %39 = vector.load %arg8[%c0_15, %c0_16] : memref<256x1xf32, #tpu.memory_space<vmem>>, vector<256x1xf32>
      tpu.vector_store %arg8[%c0_15, %c0_16], %38 {strides = array<i32>} : memref<256x1xf32, #tpu.memory_space<vmem>>, vector<256x1xf32>,
      %c0_17 = arith.constant 0 : index
      %c0_18 = arith.constant 0 : index
      %40 = vector.load %arg7[%c0_17, %c0_18] : memref<256x1xf32, #tpu.memory_space<vmem>>, vector<256x1xf32>
      tpu.vector_store %arg7[%c0_17, %c0_18], %28 {strides = array<i32>} : memref<256x1xf32, #tpu.memory_space<vmem>>, vector<256x1xf32>,
      %c0_19 = arith.constant 0 : index
      %c0_20 = arith.constant 0 : index
      %41 = vector.load %arg4[%c0_19, %c0_20] : memref<256x1xi32, #tpu.memory_space<vmem>>, vector<256x1xi32>
      %c256_i32 = arith.constant 256 : i32
      %42 = arith.muli %arg1, %c256_i32 : i32
      %43 = vector.broadcast %42 : i32 to vector<256x1xi32>
      %44 = arith.subi %41, %43 : vector<256x1xi32>
      %45 = vector.broadcast %44 : vector<256x1xi32> to vector<256x256xi32>
      %46 = arith.cmpi eq, %24, %45 : vector<256x256xi32>
      %cst_21 = arith.constant 0.000000e+00 : f32
      %47 = vector.broadcast %cst_21 : f32 to vector<256x256xf32>
      %48 = arith.select %46, %23, %47 : vector<256x256xi1>, vector<256x256xf32>
      %cst_22 = arith.constant dense<0.000000e+00> : vector<256xf32>
      %49 = vector.multi_reduction <add>, %48, %cst_22 [1] : vector<256x256xf32> to vector<256xf32>
      %50 = vector.shape_cast %49 : vector<256xf32> to vector<256x1xf32>
      %c0_23 = arith.constant 0 : index
      %c0_24 = arith.constant 0 : index
      %51 = vector.load %arg9[%c0_23, %c0_24] : memref<256x1xf32, #tpu.memory_space<vmem>>, vector<256x1xf32>
      %52 = arith.addf %51, %50 : vector<256x1xf32>
      %c0_25 = arith.constant 0 : index
      %c0_26 = arith.constant 0 : index
      %53 = vector.load %arg9[%c0_25, %c0_26] : memref<256x1xf32, #tpu.memory_space<vmem>>, vector<256x1xf32>
      tpu.vector_store %arg9[%c0_25, %c0_26], %52 {strides = array<i32>} : memref<256x1xf32, #tpu.memory_space<vmem>>, vector<256x1xf32>,
    } else {
    }
    %c1_i32_4 = arith.constant 1 : i32
    %14 = arith.cmpi eq, %arg1, %c1_i32_4 : i32
    %15 = arith.andi %1, %14 : i1
    %16 = arith.extui %15 : i1 to i32
    %c0_i32_5 = arith.constant 0 : i32
    %17 = arith.cmpi ne, %16, %c0_i32_5 : i32
    scf.if %17 {
      %c0_8 = arith.constant 0 : index
      %c0_9 = arith.constant 0 : index
      %23 = vector.load %arg7[%c0_8, %c0_9] : memref<256x1xf32, #tpu.memory_space<vmem>>, vector<256x1xf32>
      %c0_10 = arith.constant 0 : index
      %c0_11 = arith.constant 0 : index
      %24 = vector.load %arg8[%c0_10, %c0_11] : memref<256x1xf32, #tpu.memory_space<vmem>>, vector<256x1xf32>
      %25 = math.log %24 : vector<256x1xf32>
      %26 = arith.addf %23, %25 : vector<256x1xf32>
      %c0_12 = arith.constant 0 : index
      %c0_13 = arith.constant 0 : index
      %27 = vector.load %arg9[%c0_12, %c0_13] : memref<256x1xf32, #tpu.memory_space<vmem>>, vector<256x1xf32>
      %28 = arith.subf %26, %27 : vector<256x1xf32>
      %c0_14 = arith.constant 0 : index
      %c0_15 = arith.constant 0 : index
      %29 = vector.load %arg5[%c0_14, %c0_15] : memref<256x1xf32, #tpu.memory_space<vmem>>, vector<256x1xf32>
      %30 = arith.mulf %28, %29 : vector<256x1xf32>
      %c0_16 = arith.constant 0 : index
      %c0_17 = arith.constant 0 : index
      %31 = vector.load %arg6[%c0_16, %c0_17] : memref<256x1xf32, #tpu.memory_space<vmem>>, vector<256x1xf32>
      tpu.vector_store %arg6[%c0_16, %c0_17], %30 {strides = array<i32>} : memref<256x1xf32, #tpu.memory_space<vmem>>, vector<256x1xf32>,
    } else {
    }
    %true = arith.constant true
    %18 = arith.xori %1, %true : i1
    %c1_i32_6 = arith.constant 1 : i32
    %19 = arith.cmpi eq, %arg1, %c1_i32_6 : i32
    %20 = arith.andi %18, %19 : i1
    %21 = arith.extui %20 : i1 to i32
    %c0_i32_7 = arith.constant 0 : i32
    %22 = arith.cmpi ne, %21, %c0_i32_7 : i32
    scf.if %22 {
      %cst = arith.constant 0.000000e+00 : f32
      %23 = vector.broadcast %cst : f32 to vector<256x1xf32>
      %c0_8 = arith.constant 0 : index
      %c0_9 = arith.constant 0 : index
      %24 = vector.load %arg6[%c0_8, %c0_9] : memref<256x1xf32, #tpu.memory_space<vmem>>, vector<256x1xf32>
      tpu.vector_store %arg6[%c0_8, %c0_9], %23 {strides = array<i32>} : memref<256x1xf32, #tpu.memory_space<vmem>>, vector<256x1xf32>,
    } else {
    }
    return
  }
  func.func @transform_0(%arg0: i32, %arg1: i32, %arg2: memref<1xi32, #tpu.memory_space<smem>>) -> (i32, i32) {
    %c0 = arith.constant 0 : index
    %0 = memref.load %arg2[%c0] : memref<1xi32, #tpu.memory_space<smem>>
    %1 = arith.cmpi sgt, %arg0, %0 : i32
    %2 = arith.select %1, %0, %arg0 : i32
    %c1_i32 = arith.constant 1 : i32
    %3 = arith.select %1, %c1_i32, %arg1 : i32
    %c0_i32 = arith.constant 0 : i32
    return %2, %3 : i32, i32
  }
  func.func @transform_1(%arg0: i32, %arg1: i32, %arg2: memref<1xi32, #tpu.memory_space<smem>>) -> (i32, i32) {
    %c0_i32 = arith.constant 0 : i32
    %c0_i32_0 = arith.constant 0 : i32
    return %arg0, %c0_i32 : i32, i32
  }
  func.func @transform_2(%arg0: i32, %arg1: i32, %arg2: memref<1xi32, #tpu.memory_space<smem>>) -> (i32, i32) {
    %c0_i32 = arith.constant 0 : i32
    %c0_i32_0 = arith.constant 0 : i32
    return %arg0, %c0_i32 : i32, i32
  }
  func.func @transform_3(%arg0: i32, %arg1: i32, %arg2: memref<1xi32, #tpu.memory_space<smem>>) -> (i32, i32) {
    %c0_i32 = arith.constant 0 : i32
    %c0_i32_0 = arith.constant 0 : i32
    return %arg0, %c0_i32 : i32, i32
  }
}

</mosaic_0001>

<bundles_post_ra>
// kernel: tpu_custom_call.1
= control target key start
LH: loop header
LB: loop body
LE: loop exit
PB: predicated region body
PF: predicated region fallthrough
CT: control target
= control target key end

     0   :  { %s7484_s0 = inlined_call_operand.<no memory space> [shape: s32[1], index: 0, kind: input, shape index: {}]   ;;  %s7485_s1 = inlined_call_operand.hbm [shape: f32[1024,384], index: 1, kind: input, shape index: {}]   ;;  %s7486_s2 = inlined_call_operand.vmem [shape: s32[1024,1], index: 2, kind: input, shape index: {}]   ;;  %s7487_s3 = inlined_call_operand.vmem [shape: f32[1024,1], index: 3, kind: input, shape index: {}]   ;;  %s7488_s4 = inlined_call_operand.vmem [shape: f32[1024,1], index: 4, kind: output, shape index: {}]  }
   0x1   :  { %9 = sst [smem:[#allocation6]] %s7484_s0 }
   0x2   :  { %10 = vsyncpa [#allocation8], 0 }
   0x3   :  { %12 = vsyncpa [#allocation8 + $0x1], 0  ;;  %s4522_s17 = smov 0   ;;  %s4524_s18 = smov 0  }
   0x4   :  { %s4526_s19 = smov 0   ;;  %s4528_s20 = smov 0  }
   0x5   :  { %s4530_s21 = smov 0   ;;  %s4532_s22 = smov 0  }
   0x6   :  { %s4534_s23 = smov 0   ;;  %s4536_s24 = smov 0  }
   0x7 LB: > { %s27_s0 = sadd.s32 1, %s4476_s22  ;;  %s30_s25 = sadd.s32 1, %s4480_s23  ;;  %s4484_s24 = sphi %s4536_s24, %s18_s24   ;;  %s4480_s23 = sphi %s4534_s23, %s8119_s23   ;;  %s4476_s22 = sphi %s4532_s22, %s8118_s22   ;;  %s4472_s21 = sphi %s4530_s21, %s8117_s21   ;;  %s4468_s20 = sphi %s4528_s20, %s8116_s20   ;;  %s4464_s19 = sphi %s4526_s19, %s8115_s19   ;;  %s4460_s18 = sphi %s4524_s18, %s8114_s18   ;;  %s4456_s17 = sphi %s4522_s17, %s8113_s17  }
   0x8   : > { %p28_p0 = scmp.ge.s32.totalorder %s27_s0, 2  ;;  %s3761_s26 = sadd.s32 4294967295, %s4484_s24  }
   0x9   : > { %s34_s27 = sld [smem:[#allocation6]]  ;;  %p54_p1 = scmp.ne.s32.totalorder %s4464_s19, %s4460_s18 }
   0xa   : > { %s8121_s0 = smov (%p28_p0, %s27_s0), 0  ;;  %s8123_s25 = smov (!%p28_p0, %s30_s25), %s4480_s23 }
   0xb   : > { %p55_p2 = scmp.eq.s32.totalorder %s4484_s24, 0  ;;  %p32_p3 = scmp.ge.s32.totalorder %s8123_s25, 4 }
   0xc   : > { %p60_p4 = scmp.ne.s32.totalorder %s4460_s18, %s4456_s17  ;;  %p61_p6 = scmp.eq.s32.totalorder %s3761_s26, 0 }
   0xd   : > { %p4570_p5 = por %p55_p2, %p54_p1  ;;  %s8125_s25 = smov (%p32_p3, %s8123_s25), 0 }
   0xe   : > { %p4577_p8 = por %p61_p6, %p60_p4  ;;  %s47_s10 = sadd.s32 1, %s4464_s19 }
   0xf   : > { %p35_p7 = scmp.gt.s32.totalorder %s4480_s23, %s34_s27  ;;  %p39_p9 = scmp.gt.s32.totalorder %s8125_s25, %s34_s27 }
  0x10   : > { %p3764_p11 = scmp.ge.s32.totalorder %s4484_s24, 8 }
  0x11   : > { %s36_s30 = scalar_select %p35_p7, %s34_s27, %s4480_s23 }
  0x12   : > { %s37_s5 = scalar_select %p35_p7, 1, %s4476_s22 }
  0x13   : > { %s8127_s27 = smov (!%p39_p9, %s34_s27), %s8125_s25 }
  0x14   : > { %s41_s6 = scalar_select %p39_p9, 1, %s8121_s0 }
  0x15   : > { %s42_s7 = ssub.s32 %s36_s30, %s8127_s27  ;;  %158 = sbr.rel (%p3764_p11) target bundleno = 74 (0x4a), region = 16 }
  0x16   : > { %s43_s8 = ssub.s32 %s37_s5, %s41_s6 }
  0x17   : > { %s44_s9 = sor.u32 %s43_s8, %s42_s7 }
  0x18   : > { %p45_p10 = scmp.eq.s32.totalorder %s44_s9, 0 }
  0x1a   : > { %s4588_s11 = scalar_select %p45_p10, %s4464_s19, %s47_s10  }
  0x1c   : > { %161 = sbr.rel (!%p4570_p5) target bundleno = 74 (0x4a), region = 20  ;;  %s162_s12 = sand.u32 (%p4570_p5), 1, %s4464_s19  }
  0x1d   : > { %s167_s13 = sld [smem:[#allocation6]] (%p4570_p5)  ;;  %s3765_s14 = sshll.u32 (%p4570_p5), %s162_s12, 9 }
  0x1e   : > { %s4603_s28 = scalar_lea.sflag (%p4570_p5), [#allocation8], %s162_s12  ;;  %s166_s30 = scalar_lea.vmem (%p4570_p5), [#allocation7], %s3765_s14 }
  0x23   : > { %p168_p12 = scmp.gt.s32.totalorder %s4480_s23, %s167_s13 }
  0x25   : > { %s8129_s13 = smov (!%p168_p12, %s167_s13), %s4480_s23 }
  0x26   : > { %s170_s15 = scalar_select %p168_p12, 1, %s4476_s22 }
  0x28   : > { %s3767_s16 = sshll.u32 %s170_s15, 1 }
  0x29   : > { %s173_s17 = ssub.s32 3, %s3767_s16 }
  0x2a   : > { %p174_p13 = scmp.lt.s32.totalorder %s173_s17, 2 }
  0x2c   : > { %s8131_s17 = smov (!%p174_p13, %s173_s17), 2 }
  0x2d   : > { %s4600_s26 = sshll.u32 %s8131_s17, 12 }
  0x2e   : > { %s178_s27 = ssub.s32 8192, %s4600_s26 }
  0x2f   : > { %179 = vsyncadd %s4603_s28, %s178_s27  ;;  %p3769_p0 = scmp.ne.s32.totalorder %s4600_s26, 0  ;;  %s3789_s5 = smul.u32 96, %s8129_s13 }
  0x30   : > { %s3772_s6 = sshll.u32 %s8131_s17, 3  ;;  %s187_s7 = sshll.u32 %s166_s30, 4  ;;  %s4608_s7 = int_to_ptr.vmem [resolvable:$true] %s187_s7 }
  0x31   : > { %s182_s8 = sadd.s32 %s3789_s5, %s3767_s16  ;;  %s4394_s16 = scalar_lea.hbm %s7485_s1, 49152 }
  0x32   : > { %s3771_s9 = sshll.u32 %s182_s8, 7 }
  0x33   : > { %s4613_s12 = scalar_lea.hbm %s7485_s1, %s3771_s9 }
  0x34   : > { %s4390_s14 = scalar_lea.hbm %s4613_s12, %s4600_s26  ;;  %p4395_p4 = scmp.lt.u32.totalorder %s4613_s12, %s7485_s1 }
  0x35   : > { %p4391_p1 = scmp.ne.s32.totalorder %s4613_s12, %s4390_s14  ;;  %p4396_p5 = scmp.lt.u32.totalorder %s4394_s16, %s4390_s14 }
  0x36   : > { %p4398_p7 = scmp.lt.u32.totalorder %s4390_s14, %s4613_s12 }
  0x37   : > { %p4392_p2 = pnand %p4391_p1, %p3769_p0  ;;  %p4397_p6 = por %p4396_p5, %p4395_p4 }
  0x39   : > { %p4393_p3 = pneg %p4392_p2  ;;  %p4399_p9 = por %p4398_p7, %p4397_p6 }
  0x3b   : > { %p4400_p10 = pnand %p4399_p9, %p4393_p3 }
  0x3d   : > { %4403 = shalt.err (!%p4400_p10)
}
  0x3e   : > { %s4404_s8 = scalar_lea.vmem %s4608_s7, %s4600_s26  ;;  %s4486_s9 = smov [#allocation7]  }
  0x3f   : > { %p4405_p11 = scmp.ne.s32.totalorder %s4608_s7, %s4404_s8  ;;  %s4408_s10 = sshll.u32 %s4486_s9, 4  ;;  %s4409_s10 = int_to_ptr.vmem [resolvable:$false] %s4408_s10 }
  0x40   : > { %s4410_s15 = scalar_lea.vmem %s4409_s10, 16384  ;;  %p4411_p1 = scmp.lt.s32.totalorder %s4608_s7, %s4409_s10 }
  0x41   : > { %p4406_p12 = pnand %p4405_p11, %p3769_p0  ;;  %p4412_p2 = scmp.lt.s32.totalorder %s4410_s15, %s4404_s8 }
  0x43   : > { %p4407_p13 = pneg %p4406_p12  ;;  %p4413_p4 = por %p4412_p2, %p4411_p1 }
  0x45   : > { %p4414_p5 = pnand %p4413_p4, %p4407_p13 }
  0x47   : > { %4417 = shalt.err (!%p4414_p5)
}
  0x48   : > { %s4487_s14 = smov 384   ;;  %s4488_s13 = smov 256  }
  0x49   : > { %193 = dma.hbm_to_vmem [thread:$0]  (%p3769_p0), %s4613_s12, %s4600_s26, %s4608_s7, %s4603_s28, %s4487_s14, %s4488_s13, %s3772_s6  }
  0x4a PF: > { %p3775_p3 = scmp.ge.s32.totalorder %s4484_s24, 1  ;;  %p213_p6 = scmp.lt.s32.totalorder %s4484_s24, 9 }
  0x4c   : > { %p214_p7 = pnand %p3775_p3, %p213_p6 }
  0x4d   : > { %s219_s27 = sand.u32 (!%p214_p7), 1, %s4460_s18  }
  0x4e   : > { %217 = sbr.rel (%p214_p7) target bundleno = 1647 (0x66f), region = 32  ;;  %s3776_s16 = sshll.u32 (!%p214_p7), %s219_s27, 9 }
  0x4f   : > { %s220_s30 = scalar_lea.sflag (!%p214_p7), [#allocation8], %s219_s27  ;;  %s4645_s5 = scalar_lea.vmem (!%p214_p7), [#allocation7], %s3776_s16 }
  0x55   : > { %4451 = dma.done.wait (%p4577_p8), %s220_s30, 8192  }
  0x56   : > { %4453 = vsyncadd (%p4577_p8), %s220_s30, 4294959104  ;;  %s3777_s17 = sshll.u32 %s4472_s21, 5  ;;  %s4652_s26 = sld [smem:[#allocation6]] }
  0x57   : > { %p267_p0 = scmp.lt.s32.totalorder %s3777_s17, 127  ;;  %p286_p9 = scmp.eq.s32.totalorder %s4468_s20, 0 }
  0x59   : > { %s8133_s17 = smov (!%p267_p0, %s3777_s17), 127 }
  0x5a   : > { %s3778_s28 = sshll.u32 %s8133_s17, 3 }
  0x5b   : > { %s4658_s12 = scalar_lea.vmem %s7486_s2, %s3778_s28  ;;  %s4663_s9 = scalar_lea.vmem %s7487_s3, %s3778_s28 }
  0x5c   : > { %p285_p8 = scmp.le.s32.totalorder %s4472_s21, %s4652_s26  ;;  %s4670_s14 = scalar_lea.vmem %s7488_s4, %s3778_s28 }
  0x5e   : > { %p287_p10 = pnand %p286_p9, %p285_p8 }
  0x5f   : > { %vm291_vm0 = vcmask (!%p287_p10), 7168   ;;  %v4489_v0 = vmov (!%p287_p10), -1e+30   ;;  %v4490_v1 = vmov (!%p287_p10), 0.0  }
  0x60   : > { %290 = sbr.rel (%p287_p10) target bundleno = 144 (0x90), region = 40  ;;  %292 = vst.msk [vmem:[#allocation2] sm:$0xff] (!%p287_p10), %vm291_vm0, %v4489_v0  ;;  %293 = vst.msk [vmem:[#allocation2 + $0x8] sm:$0xff] (!%p287_p10), %vm291_vm0, %v4489_v0 }
  0x61   : > { %294 = vst.msk [vmem:[#allocation2 + $0x10] sm:$0xff] (!%p287_p10), %vm291_vm0, %v4489_v0  ;;  %295 = vst.msk [vmem:[#allocation2 + $0x18] sm:$0xff] (!%p287_p10), %vm291_vm0, %v4489_v0 }
  0x62   : > { %296 = vst.msk [vmem:[#allocation2 + $0x20] sm:$0xff] (!%p287_p10), %vm291_vm0, %v4489_v0  ;;  %297 = vst.msk [vmem:[#allocation2 + $0x28] sm:$0xff] (!%p287_p10), %vm291_vm0, %v4489_v0 }
  0x63   : > { %298 = vst.msk [vmem:[#allocation2 + $0x30] sm:$0xff] (!%p287_p10), %vm291_vm0, %v4489_v0  ;;  %299 = vst.msk [vmem:[#allocation2 + $0x38] sm:$0xff] (!%p287_p10), %vm291_vm0, %v4489_v0 }
  0x64   : > { %300 = vst.msk [vmem:[#allocation2 + $0x40] sm:$0xff] (!%p287_p10), %vm291_vm0, %v4489_v0  ;;  %301 = vst.msk [vmem:[#allocation2 + $0x48] sm:$0xff] (!%p287_p10), %vm291_vm0, %v4489_v0 }
  0x65   : > { %302 = vst.msk [vmem:[#allocation2 + $0x50] sm:$0xff] (!%p287_p10), %vm291_vm0, %v4489_v0  ;;  %303 = vst.msk [vmem:[#allocation2 + $0x58] sm:$0xff] (!%p287_p10), %vm291_vm0, %v4489_v0 }
  0x66   : > { %304 = vst.msk [vmem:[#allocation2 + $0x60] sm:$0xff] (!%p287_p10), %vm291_vm0, %v4489_v0  ;;  %305 = vst.msk [vmem:[#allocation2 + $0x68] sm:$0xff] (!%p287_p10), %vm291_vm0, %v4489_v0 }
  0x67   : > { %306 = vst.msk [vmem:[#allocation2 + $0x70] sm:$0xff] %vm291_vm0, %v4489_v0  ;;  %307 = vst.msk [vmem:[#allocation2 + $0x78] sm:$0xff] %vm291_vm0, %v4489_v0 }
  0x68   : > { %308 = vst.msk [vmem:[#allocation2 + $0x80] sm:$0xff] %vm291_vm0, %v4489_v0  ;;  %309 = vst.msk [vmem:[#allocation2 + $0x88] sm:$0xff] %vm291_vm0, %v4489_v0 }
  0x69   : > { %310 = vst.msk [vmem:[#allocation2 + $0x90] sm:$0xff] %vm291_vm0, %v4489_v0  ;;  %311 = vst.msk [vmem:[#allocation2 + $0x98] sm:$0xff] %vm291_vm0, %v4489_v0 }
  0x6a   : > { %312 = vst.msk [vmem:[#allocation2 + $0xa0] sm:$0xff] %vm291_vm0, %v4489_v0  ;;  %313 = vst.msk [vmem:[#allocation2 + $0xa8] sm:$0xff] %vm291_vm0, %v4489_v0 }
  0x6b   : > { %314 = vst.msk [vmem:[#allocation2 + $0xb0] sm:$0xff] %vm291_vm0, %v4489_v0  ;;  %315 = vst.msk [vmem:[#allocation2 + $0xb8] sm:$0xff] %vm291_vm0, %v4489_v0 }
  0x6c   : > { %316 = vst.msk [vmem:[#allocation2 + $0xc0] sm:$0xff] %vm291_vm0, %v4489_v0  ;;  %317 = vst.msk [vmem:[#allocation2 + $0xc8] sm:$0xff] %vm291_vm0, %v4489_v0 }
  0x6d   : > { %318 = vst.msk [vmem:[#allocation2 + $0xd0] sm:$0xff] %vm291_vm0, %v4489_v0  ;;  %319 = vst.msk [vmem:[#allocation2 + $0xd8] sm:$0xff] %vm291_vm0, %v4489_v0 }
  0x6e   : > { %320 = vst.msk [vmem:[#allocation2 + $0xe0] sm:$0xff] %vm291_vm0, %v4489_v0  ;;  %321 = vst.msk [vmem:[#allocation2 + $0xe8] sm:$0xff] %vm291_vm0, %v4489_v0 }
  0x6f   : > { %322 = vst.msk [vmem:[#allocation2 + $0xf0] sm:$0xff] %vm291_vm0, %v4489_v0  ;;  %323 = vst.msk [vmem:[#allocation2 + $0xf8] sm:$0xff] %vm291_vm0, %v4489_v0 }
  0x70   : > { %324 = vst.msk [vmem:[#allocation3] sm:$0xff] %vm291_vm0, %v4490_v1  ;;  %325 = vst.msk [vmem:[#allocation3 + $0x8] sm:$0xff] %vm291_vm0, %v4490_v1 }
  0x71   : > { %326 = vst.msk [vmem:[#allocation3 + $0x10] sm:$0xff] %vm291_vm0, %v4490_v1  ;;  %327 = vst.msk [vmem:[#allocation3 + $0x18] sm:$0xff] %vm291_vm0, %v4490_v1 }
  0x72   : > { %328 = vst.msk [vmem:[#allocation3 + $0x20] sm:$0xff] %vm291_vm0, %v4490_v1  ;;  %329 = vst.msk [vmem:[#allocation3 + $0x28] sm:$0xff] %vm291_vm0, %v4490_v1 }
  0x73   : > { %330 = vst.msk [vmem:[#allocation3 + $0x30] sm:$0xff] %vm291_vm0, %v4490_v1  ;;  %331 = vst.msk [vmem:[#allocation3 + $0x38] sm:$0xff] %vm291_vm0, %v4490_v1 }
  0x74   : > { %332 = vst.msk [vmem:[#allocation3 + $0x40] sm:$0xff] %vm291_vm0, %v4490_v1  ;;  %333 = vst.msk [vmem:[#allocation3 + $0x48] sm:$0xff] %vm291_vm0, %v4490_v1 }
  0x75   : > { %334 = vst.msk [vmem:[#allocation3 + $0x50] sm:$0xff] %vm291_vm0, %v4490_v1  ;;  %335 = vst.msk [vmem:[#allocation3 + $0x58] sm:$0xff] %vm291_vm0, %v4490_v1 }
  0x76   : > { %336 = vst.msk [vmem:[#allocation3 + $0x60] sm:$0xff] %vm291_vm0, %v4490_v1  ;;  %337 = vst.msk [vmem:[#allocation3 + $0x68] sm:$0xff] %vm291_vm0, %v4490_v1 }
  0x77   : > { %338 = vst.msk [vmem:[#allocation3 + $0x70] sm:$0xff] %vm291_vm0, %v4490_v1  ;;  %339 = vst.msk [vmem:[#allocation3 + $0x78] sm:$0xff] %vm291_vm0, %v4490_v1 }
  0x78   : > { %340 = vst.msk [vmem:[#allocation3 + $0x80] sm:$0xff] %vm291_vm0, %v4490_v1  ;;  %341 = vst.msk [vmem:[#allocation3 + $0x88] sm:$0xff] %vm291_vm0, %v4490_v1 }
  0x79   : > { %342 = vst.msk [vmem:[#allocation3 + $0x90] sm:$0xff] %vm291_vm0, %v4490_v1  ;;  %343 = vst.msk [vmem:[#allocation3 + $0x98] sm:$0xff] %vm291_vm0, %v4490_v1 }
  0x7a   : > { %344 = vst.msk [vmem:[#allocation3 + $0xa0] sm:$0xff] %vm291_vm0, %v4490_v1  ;;  %345 = vst.msk [vmem:[#allocation3 + $0xa8] sm:$0xff] %vm291_vm0, %v4490_v1 }
  0x7b   : > { %346 = vst.msk [vmem:[#allocation3 + $0xb0] sm:$0xff] %vm291_vm0, %v4490_v1  ;;  %347 = vst.msk [vmem:[#allocation3 + $0xb8] sm:$0xff] %vm291_vm0, %v4490_v1 }
  0x7c   : > { %348 = vst.msk [vmem:[#allocation3 + $0xc0] sm:$0xff] %vm291_vm0, %v4490_v1  ;;  %349 = vst.msk [vmem:[#allocation3 + $0xc8] sm:$0xff] %vm291_vm0, %v4490_v1 }
  0x7d   : > { %350 = vst.msk [vmem:[#allocation3 + $0xd0] sm:$0xff] %vm291_vm0, %v4490_v1  ;;  %351 = vst.msk [vmem:[#allocation3 + $0xd8] sm:$0xff] %vm291_vm0, %v4490_v1 }
  0x7e   : > { %352 = vst.msk [vmem:[#allocation3 + $0xe0] sm:$0xff] %vm291_vm0, %v4490_v1  ;;  %353 = vst.msk [vmem:[#allocation3 + $0xe8] sm:$0xff] %vm291_vm0, %v4490_v1 }
  0x7f   : > { %354 = vst.msk [vmem:[#allocation3 + $0xf0] sm:$0xff] %vm291_vm0, %v4490_v1  ;;  %355 = vst.msk [vmem:[#allocation3 + $0xf8] sm:$0xff] %vm291_vm0, %v4490_v1 }
  0x80   : > { %356 = vst.msk [vmem:[#allocation4] sm:$0xff] %vm291_vm0, %v4490_v1  ;;  %357 = vst.msk [vmem:[#allocation4 + $0x8] sm:$0xff] %vm291_vm0, %v4490_v1 }
  0x81   : > { %358 = vst.msk [vmem:[#allocation4 + $0x10] sm:$0xff] %vm291_vm0, %v4490_v1  ;;  %359 = vst.msk [vmem:[#allocation4 + $0x18] sm:$0xff] %vm291_vm0, %v4490_v1 }
  0x82   : > { %360 = vst.msk [vmem:[#allocation4 + $0x20] sm:$0xff] %vm291_vm0, %v4490_v1  ;;  %361 = vst.msk [vmem:[#allocation4 + $0x28] sm:$0xff] %vm291_vm0, %v4490_v1 }
  0x83   : > { %362 = vst.msk [vmem:[#allocation4 + $0x30] sm:$0xff] %vm291_vm0, %v4490_v1  ;;  %363 = vst.msk [vmem:[#allocation4 + $0x38] sm:$0xff] %vm291_vm0, %v4490_v1 }
  0x84   : > { %364 = vst.msk [vmem:[#allocation4 + $0x40] sm:$0xff] %vm291_vm0, %v4490_v1  ;;  %365 = vst.msk [vmem:[#allocation4 + $0x48] sm:$0xff] %vm291_vm0, %v4490_v1 }
  0x85   : > { %366 = vst.msk [vmem:[#allocation4 + $0x50] sm:$0xff] %vm291_vm0, %v4490_v1  ;;  %367 = vst.msk [vmem:[#allocation4 + $0x58] sm:$0xff] %vm291_vm0, %v4490_v1 }
  0x86   : > { %368 = vst.msk [vmem:[#allocation4 + $0x60] sm:$0xff] %vm291_vm0, %v4490_v1  ;;  %369 = vst.msk [vmem:[#allocation4 + $0x68] sm:$0xff] %vm291_vm0, %v4490_v1 }
  0x87   : > { %370 = vst.msk [vmem:[#allocation4 + $0x70] sm:$0xff] %vm291_vm0, %v4490_v1  ;;  %371 = vst.msk [vmem:[#allocation4 + $0x78] sm:$0xff] %vm291_vm0, %v4490_v1 }
  0x88   : > { %372 = vst.msk [vmem:[#allocation4 + $0x80] sm:$0xff] %vm291_vm0, %v4490_v1  ;;  %373 = vst.msk [vmem:[#allocation4 + $0x88] sm:$0xff] %vm291_vm0, %v4490_v1 }
  0x89   : > { %374 = vst.msk [vmem:[#allocation4 + $0x90] sm:$0xff] %vm291_vm0, %v4490_v1  ;;  %375 = vst.msk [vmem:[#allocation4 + $0x98] sm:$0xff] %vm291_vm0, %v4490_v1 }
  0x8a   : > { %376 = vst.msk [vmem:[#allocation4 + $0xa0] sm:$0xff] %vm291_vm0, %v4490_v1  ;;  %377 = vst.msk [vmem:[#allocation4 + $0xa8] sm:$0xff] %vm291_vm0, %v4490_v1 }
  0x8b   : > { %378 = vst.msk [vmem:[#allocation4 + $0xb0] sm:$0xff] %vm291_vm0, %v4490_v1  ;;  %379 = vst.msk [vmem:[#allocation4 + $0xb8] sm:$0xff] %vm291_vm0, %v4490_v1 }
  0x8c   : > { %380 = vst.msk [vmem:[#allocation4 + $0xc0] sm:$0xff] %vm291_vm0, %v4490_v1  ;;  %381 = vst.msk [vmem:[#allocation4 + $0xc8] sm:$0xff] %vm291_vm0, %v4490_v1 }
  0x8d   : > { %382 = vst.msk [vmem:[#allocation4 + $0xd0] sm:$0xff] %vm291_vm0, %v4490_v1  ;;  %383 = vst.msk [vmem:[#allocation4 + $0xd8] sm:$0xff] %vm291_vm0, %v4490_v1 }
  0x8e   : > { %384 = vst.msk [vmem:[#allocation4 + $0xe0] sm:$0xff] %vm291_vm0, %v4490_v1  ;;  %385 = vst.msk [vmem:[#allocation4 + $0xe8] sm:$0xff] %vm291_vm0, %v4490_v1 }
  0x8f   : > { %386 = vst.msk [vmem:[#allocation4 + $0xf0] sm:$0xff] %vm291_vm0, %v4490_v1  ;;  %387 = vst.msk [vmem:[#allocation4 + $0xf8] sm:$0xff] %vm291_vm0, %v4490_v1 }
  0x90 PF: > { %p388_p11 = scmp.eq.s32.totalorder %s4468_s20, 1 }
  0x92   : > { %p4841_p12 = pnand %p388_p11, %p285_p8 }
  0x94   : > { %392 = sbr.rel (%p4841_p12) target bundleno = 855 (0x357), region = 44 }
  0x9b   : > { %v457_v2 = vlaneseq  ;;  %s3783_s27 = sshll.u32 %s4468_s20, 8  ;;  %v397_v3 = vld [vmem:[%s4645_s5 + $0x20] sm:$0xff]  ;;  %v399_v7 = vld [vmem:[%s4645_s5 + $0x30] sm:$0xff]  ;;  %v398_v9 = vld [vmem:[%s4645_s5 + $0x28] sm:$0xff]  ;;  %vm1329_vm3 = vcmask 7168  }
  0x9c   : > { %s461_s16 = ssub.s32 384, %s3783_s27  ;;  %v393_v6 = vld [vmem:[%s4645_s5] sm:$0xff]  ;;  %v395_v8 = vld [vmem:[%s4645_s5 + $0x10] sm:$0xff]  ;;  %v394_v12 = vld [vmem:[%s4645_s5 + $0x8] sm:$0xff] }
  0x9d   : > { %v4851_v4 = vand.u32 127, %v457_v2  ;;  %v462_v5 = vstv %s461_s16  ;;  %v400_v13 = vld [vmem:[%s4645_s5 + $0x38] sm:$0xff]  ;;  %v403_v20 = vld [vmem:[%s4645_s5 + $0x50] sm:$0xff]  ;;  %v401_v28 = vld [vmem:[%s4645_s5 + $0x40] sm:$0xff] }
  0x9e   : > { %v396_v16 = vld [vmem:[%s4645_s5 + $0x18] sm:$0xff]  ;;  %v402_v29 = vld [vmem:[%s4645_s5 + $0x48] sm:$0xff]  ;;  %v407_v33 = vld [vmem:[%s4645_s5 + $0x70] sm:$0xff] }
  0x9f   : > { %7683 = vst [vmem:[#allocation10_spill] sm:$0xff] %v4851_v4  ;;  %v4858_v10 = vadd.s32 128, %v4851_v4  ;;  %vm4861_vm1 = vcmp.lt.s32.totalorder %v4851_v4, %v462_v5  ;;  %v404_v27 = vld [vmem:[%s4645_s5 + $0x58] sm:$0xff]  ;;  %v405_v38 = vld [vmem:[%s4645_s5 + $0x60] sm:$0xff]  ;;  %v406_v39 = vld [vmem:[%s4645_s5 + $0x68] sm:$0xff] }
  0xa0   : > { %v4869_v14 = vsel %vm4861_vm1, %v397_v3, -1e+30  ;;  %v4873_v15 = vsel %vm4861_vm1, %v393_v6, -1e+30  ;;  %v4883_v18 = vsel %vm4861_vm1, %v399_v7, -1e+30 }
  0xa1   : > { %7684 = vst [vmem:[#allocation11_spill] sm:$0xff] %v4858_v10  ;;  %7687 = vst [vmem:[#allocation12_spill] sm:$0xff] %v4869_v14  ;;  %vm4877_vm2 = vcmp.lt.s32.totalorder %v4858_v10, %v462_v5  ;;  %v4887_v19 = vsel %vm4861_vm1, %v395_v8, -1e+30  ;;  %v4919_v32 = vsel %vm4861_vm1, %v403_v20, -1e+30 }
  0xa2   : > { %7690 = vst [vmem:[#allocation13_spill] sm:$0xff] %v4887_v19  ;;  %v4892_v21 = vsel %vm4877_vm2, %v398_v9, -1e+30  ;;  %v4896_v22 = vsel %vm4877_vm2, %v394_v12, -1e+30  ;;  %7693 = vst [vmem:[#allocation16_spill] sm:$0xff] %v4919_v32 }
  0xa3   : > { %7691 = vst [vmem:[#allocation14_spill] sm:$0xff] %v4892_v21  ;;  %v4900_v23 = vsel %vm4877_vm2, %v400_v13, -1e+30  ;;  %v535_v24 = vmax.f32 %v4869_v14, %v4892_v21  ;;  %v529_v25 = vmax.f32 %v4873_v15, %v4896_v22  ;;  %v4908_v26 = vsel %vm4877_vm2, %v396_v16, -1e+30  ;;  %v408_v37 = vld [vmem:[%s4645_s5 + $0x78] sm:$0xff] }
  0xa4   : > { %7692 = vst [vmem:[#allocation15_spill] sm:$0xff] %v4908_v26  ;;  %v538_v30 = vmax.f32 %v4883_v18, %v4900_v23  ;;  %v532_v31 = vmax.f32 %v4887_v19, %v4908_v26  ;;  %v4924_v34 = vsel %vm4877_vm2, %v404_v27, -1e+30  ;;  %v4928_v35 = vsel %vm4861_vm1, %v401_v28, -1e+30  ;;  %v411_v42 = vld [vmem:[%s4645_s5 + $0x90] sm:$0xff] }
  0xa5   : > { %536 = vmax.xlane.f32.xlu1 %v535_v24  ;;  %530 = vmax.xlane.f32.xlu0 %v529_v25  ;;  %7694 = vst [vmem:[#allocation17_spill] sm:$0xff] %v4928_v35  ;;  %v4932_v36 = vsel %vm4877_vm2, %v402_v29, -1e+30  ;;  %v544_v40 = vmax.f32 %v4919_v32, %v4924_v34  ;;  %v4941_v41 = vsel %vm4861_vm1, %v407_v33, -1e+30  ;;  %v412_v47 = vld [vmem:[%s4645_s5 + $0x98] sm:$0xff] }
  0xa6   : > { %7695 = vst [vmem:[#allocation18_spill] sm:$0xff] %v4932_v36  ;;  %v541_v43 = vmax.f32 %v4928_v35, %v4932_v36  ;;  %v4948_v44 = vsel %vm4877_vm2, %v408_v37, -1e+30  ;;  %v4952_v45 = vsel %vm4861_vm1, %v405_v38, -1e+30  ;;  %v409_v48 = vld [vmem:[%s4645_s5 + $0x80] sm:$0xff] }
  0xa7   : > { %v4956_v46 = vsel %vm4877_vm2, %v406_v39, -1e+30  ;;  %v410_v49 = vld [vmem:[%s4645_s5 + $0x88] sm:$0xff]  ;;  %v550_v50 = vmax.f32 %v4941_v41, %v4948_v44  ;;  %v4965_v51 = vsel %vm4861_vm1, %v411_v42, -1e+30  ;;  %v415_v52 = vld [vmem:[%s4645_s5 + $0xb0] sm:$0xff] }
  0xa8   : > { %7696 = vst [vmem:[#allocation19_spill] sm:$0xff] %v4965_v51  ;;  %v547_v53 = vmax.f32 %v4952_v45, %v4956_v46  ;;  %v4972_v54 = vsel %vm4877_vm2, %v412_v47, -1e+30  ;;  %v4976_v55 = vsel %vm4861_vm1, %v409_v48, -1e+30  ;;  %v416_v57 = vld [vmem:[%s4645_s5 + $0xb8] sm:$0xff] }
  0xa9   : > { %539 = vmax.xlane.f32.xlu1 %v538_v30  ;;  %533 = vmax.xlane.f32.xlu0 %v532_v31  ;;  %7697 = vst [vmem:[#allocation20_spill] sm:$0xff] %v4972_v54  ;;  %v4980_v56 = vsel %vm4877_vm2, %v410_v49, -1e+30  ;;  %v413_v58 = vld [vmem:[%s4645_s5 + $0xa0] sm:$0xff]  ;;  %v414_v59 = vld [vmem:[%s4645_s5 + $0xa8] sm:$0xff]  ;;  %v556_v60 = vmax.f32 %v4965_v51, %v4972_v54  ;;  %v419_v62 = vld [vmem:[%s4645_s5 + $0xd0] sm:$0xff] }
  0xaa   : > { %v4989_v61 = vsel %vm4861_vm1, %v415_v52, -1e+30  ;;  %v420_v63 = vld [vmem:[%s4645_s5 + $0xd8] sm:$0xff]  ;;  %v553_v0 = vmax.f32 %v4976_v55, %v4980_v56  ;;  %v4997_v1 = vsel %vm4877_vm2, %v416_v57, -1e+30  ;;  %v417_v5 = vld [vmem:[%s4645_s5 + $0xc0] sm:$0xff] }
  0xab   : > { %v5001_v2 = vsel %vm4861_vm1, %v413_v58, -1e+30  ;;  %v5005_v3 = vsel %vm4877_vm2, %v414_v59, -1e+30  ;;  %v418_v6 = vld [vmem:[%s4645_s5 + $0xc8] sm:$0xff]  ;;  %v562_v7 = vmax.f32 %v4989_v61, %v4997_v1  ;;  %v423_v13 = vld [vmem:[%s4645_s5 + $0xf0] sm:$0xff] }
  0xac   : > { %v5013_v8 = vsel %vm4861_vm1, %v419_v62, -1e+30  ;;  %v5017_v9 = vsel %vm4877_vm2, %v420_v63, -1e+30  ;;  %v559_v12 = vmax.f32 %v5001_v2, %v5005_v3  ;;  %v424_v16 = vld [vmem:[%s4645_s5 + $0xf8] sm:$0xff]  ;;  %v421_v25 = vld [vmem:[%s4645_s5 + $0xe0] sm:$0xff] }
  0xad   : > { %545 = vmax.xlane.f32.xlu1 %v544_v40  ;;  %542 = vmax.xlane.f32.xlu0 %v541_v43  ;;  %v5025_v20 = vsel %vm4861_vm1, %v417_v5, -1e+30  ;;  %v5029_v24 = vsel %vm4877_vm2, %v418_v6, -1e+30  ;;  %v422_v27 = vld [vmem:[%s4645_s5 + $0xe8] sm:$0xff]  ;;  %v568_v28 = vmax.f32 %v5013_v8, %v5017_v9  ;;  %v427_v33 = vld [vmem:[%s4645_s5 + $0x110] sm:$0xff] }
  0xae   : > { %v5037_v29 = vsel %vm4861_vm1, %v423_v13, -1e+30  ;;  %v5041_v30 = vsel %vm4877_vm2, %v424_v16, -1e+30  ;;  %v565_v31 = vmax.f32 %v5025_v20, %v5029_v24  ;;  %v428_v37 = vld [vmem:[%s4645_s5 + $0x118] sm:$0xff]  ;;  %v425_v40 = vld [vmem:[%s4645_s5 + $0x100] sm:$0xff] }
  0xaf   : > { %v5049_v38 = vsel %vm4861_vm1, %v421_v25, -1e+30  ;;  %v5053_v39 = vsel %vm4877_vm2, %v422_v27, -1e+30  ;;  %v426_v42 = vld [vmem:[%s4645_s5 + $0x108] sm:$0xff]  ;;  %v574_v43 = vmax.f32 %v5037_v29, %v5041_v30  ;;  %v431_v49 = vld [vmem:[%s4645_s5 + $0x130] sm:$0xff] }
  0xb0   : > { %v5061_v47 = vsel %vm4861_vm1, %v427_v33, -1e+30  ;;  %v5065_v48 = vsel %vm4877_vm2, %v428_v37, -1e+30  ;;  %v432_v52 = vld [vmem:[%s4645_s5 + $0x138] sm:$0xff]  ;;  %v429_v58 = vld [vmem:[%s4645_s5 + $0x120] sm:$0xff] }
  0xb1   : > { %551 = vmax.xlane.f32.xlu1 %v550_v50  ;;  %548 = vmax.xlane.f32.xlu0 %v547_v53  ;;  %7698 = vst [vmem:[#allocation21_spill] sm:$0xff] %v5061_v47  ;;  %v571_v50 = vmax.f32 %v5049_v38, %v5053_v39  ;;  %v5073_v53 = vsel %vm4861_vm1, %v425_v40, -1e+30  ;;  %v5077_v57 = vsel %vm4877_vm2, %v426_v42, -1e+30  ;;  %v430_v59 = vld [vmem:[%s4645_s5 + $0x128] sm:$0xff]  ;;  %v580_v62 = vmax.f32 %v5061_v47, %v5065_v48 }
  0xb2   : > { %7699 = vst [vmem:[#allocation22_spill] sm:$0xff] %v5073_v53  ;;  %7700 = vst [vmem:[#allocation23_spill] sm:$0xff] %v5077_v57  ;;  %v5085_v63 = vsel %vm4861_vm1, %v431_v49, -1e+30  ;;  %v577_v5 = vmax.f32 %v5073_v53, %v5077_v57  ;;  %v435_v6 = vld [vmem:[%s4645_s5 + $0x150] sm:$0xff]  ;;  %v433_v16 = vld [vmem:[%s4645_s5 + $0x140] sm:$0xff] }
  0xb3   : > { %7701 = vst [vmem:[#allocation24_spill] sm:$0xff] %v5085_v63  ;;  %v5101_v13 = vsel %vm4877_vm2, %v430_v59, -1e+30  ;;  %v434_v25 = vld [vmem:[%s4645_s5 + $0x148] sm:$0xff]  ;;  %v439_v37 = vld [vmem:[%s4645_s5 + $0x170] sm:$0xff]  ;;  %v440_v40 = vld [vmem:[%s4645_s5 + $0x178] sm:$0xff] }
  0xb4   : > { %7704 = vst [vmem:[#allocation27_spill] sm:$0xff] %v5101_v13  ;;  %v5121_v42 = vsel %vm4861_vm1, %v433_v16, -1e+30  ;;  %v437_v49 = vld [vmem:[%s4645_s5 + $0x160] sm:$0xff]  ;;  %v5137_v59 = vsel %vm4877_vm2, %v440_v40, -1e+30 }
  0xb5   : > { %557 = vmax.xlane.f32.xlu1 %v556_v60  ;;  %554 = vmax.xlane.f32.xlu0 %v553_v0  ;;  %v4491_v60 = vmov 0   ;;  %v5089_v0 = vsel %vm4877_vm2, %v432_v52, -1e+30  ;;  %7707 = vst [vmem:[#allocation30_spill] sm:$0xff] %v5121_v42  ;;  %7710 = vst [vmem:[#allocation33_spill] sm:$0xff] %v5137_v59  ;;  %v441_v16 = vld [vmem:[%s4645_s5 + $0x180] sm:$0xff] }
  0xb6   : > { %3862 = vset.pattern.permute.xlu0 %v4491_v60  ;;  %3863 = vset.pattern.permute.xlu1 %v4491_v60  ;;  %7702 = vst [vmem:[#allocation25_spill] sm:$0xff] %v5089_v0  ;;  %v586_v27 = vmax.f32 %v5085_v63, %v5089_v0  ;;  %v445_v10 = vld [vmem:[%s4645_s5 + $0x1a0] sm:$0xff] }
  0xb9   : > { %563 = vmax.xlane.f32.xlu1 %v562_v7  ;;  %560 = vmax.xlane.f32.xlu0 %v559_v12  ;;  %v436_v7 = vld [vmem:[%s4645_s5 + $0x158] sm:$0xff]  ;;  %v5097_v12 = vsel %vm4861_vm1, %v429_v58, -1e+30  ;;  %v5133_v58 = vsel %vm4861_vm1, %v439_v37, -1e+30 }
  0xba   : > { %7703 = vst [vmem:[#allocation26_spill] sm:$0xff] %v5097_v12  ;;  %v583_v33 = vmax.f32 %v5097_v12, %v5101_v13  ;;  %7709 = vst [vmem:[#allocation32_spill] sm:$0xff] %v5133_v58 }
  0xbd   : > { %569 = vmax.xlane.f32.xlu1 %v568_v28  ;;  %566 = vmax.xlane.f32.xlu0 %v565_v31  ;;  %v5109_v28 = vsel %vm4861_vm1, %v435_v6, -1e+30  ;;  %v5113_v31 = vsel %vm4877_vm2, %v436_v7, -1e+30  ;;  %v5145_v6 = vsel %vm4861_vm1, %v437_v49, -1e+30 }
  0xbe   : > { %7705 = vst [vmem:[#allocation28_spill] sm:$0xff] %v5109_v28  ;;  %7706 = vst [vmem:[#allocation29_spill] sm:$0xff] %v5113_v31  ;;  %v592_v52 = vmax.f32 %v5109_v28, %v5113_v31  ;;  %v447_v49 = vld [vmem:[%s4645_s5 + $0x1b0] sm:$0xff] }
  0xbf   : > { %7711 = vst [vmem:[#allocation34_spill] sm:$0xff] %v5145_v6  ;;  %v5181_v4 = vsel %vm4861_vm1, %v447_v49, -1e+30 }
  0xc0   : > { %7717 = vst [vmem:[#allocation40_spill] sm:$0xff] %v5181_v4 }
  0xc1   : > { %575 = vmax.xlane.f32.xlu1 %v574_v43  ;;  %572 = vmax.xlane.f32.xlu0 %v571_v50  ;;  %v5125_v43 = vsel %vm4877_vm2, %v434_v25, -1e+30  ;;  %v438_v50 = vld [vmem:[%s4645_s5 + $0x168] sm:$0xff] }
  0xc2   : > { %7708 = vst [vmem:[#allocation31_spill] sm:$0xff] %v5125_v43  ;;  %v589_v60 = vmax.f32 %v5121_v42, %v5125_v43  ;;  %v5149_v7 = vsel %vm4877_vm2, %v438_v50, -1e+30  ;;  %v442_v25 = vld [vmem:[%s4645_s5 + $0x188] sm:$0xff]  ;;  %v448_v50 = vld [vmem:[%s4645_s5 + $0x1b8] sm:$0xff] }
  0xc3   : > { %7712 = vst [vmem:[#allocation35_spill] sm:$0xff] %v5149_v7  ;;  %v595_v40 = vmax.f32 %v5145_v6, %v5149_v7  ;;  %v5185_v7 = vsel %vm4877_vm2, %v448_v50, -1e+30  ;;  %v5193_v6 = vsel %vm4861_vm1, %v445_v10, -1e+30  ;;  %v450_v50 = vld [vmem:[%s4645_s5 + $0x1c8] sm:$0xff] }
  0xc4   : > { %7718 = vst [vmem:[#allocation41_spill] sm:$0xff] %v5185_v7  ;;  %7719 = vst [vmem:[#allocation42_spill] sm:$0xff] %v5193_v6 }
  0xc5   : > { %581 = vmax.xlane.f32.xlu1 %v580_v62  ;;  %578 = vmax.xlane.f32.xlu0 %v577_v5  ;;  %v443_v62 = vld [vmem:[%s4645_s5 + $0x190] sm:$0xff]  ;;  %v444_v5 = vld [vmem:[%s4645_s5 + $0x198] sm:$0xff] }
  0xc6   : > { %v5161_v37 = vsel %vm4877_vm2, %v444_v5, -1e+30  ;;  %v446_v5 = vld [vmem:[%s4645_s5 + $0x1a8] sm:$0xff] }
  0xc7   : > { %7714 = vst [vmem:[#allocation37_spill] sm:$0xff] %v5161_v37  ;;  %v5197_v49 = vsel %vm4877_vm2, %v446_v5, -1e+30  ;;  %v455_v5 = vld [vmem:[%s4645_s5 + $0x1f0] sm:$0xff] }
  0xc8   : > { %7720 = vst [vmem:[#allocation43_spill] sm:$0xff] %v5197_v49  ;;  %v607_v10 = vmax.f32 %v5193_v6, %v5197_v49  ;;  %v5357_v6 = vld [vmem:[#allocation2 + $0x60] sm:$0xff] }
  0xc9   : > { %587 = vmax.xlane.f32.xlu1 %v586_v27  ;;  %584 = vmax.xlane.f32.xlu0 %v583_v33  ;;  %v598_v27 = vmax.f32 %v5133_v58, %v5137_v59  ;;  %v5157_v33 = vsel %vm4861_vm1, %v443_v62, -1e+30  ;;  %v5173_v62 = vsel %vm4877_vm2, %v442_v25, -1e+30  ;;  %v451_v25 = vld [vmem:[%s4645_s5 + $0x1d0] sm:$0xff]  ;;  %7754 = vst [vmem:[#allocation77_spill] sm:$0xff] %v5357_v6 }
  0xca   : > { %7713 = vst [vmem:[#allocation36_spill] sm:$0xff] %v5157_v33  ;;  %7716 = vst [vmem:[#allocation39_spill] sm:$0xff] %v5173_v62 }
  0xcd   : > { %593 = vmax.xlane.f32.xlu1 %v592_v52  ;;  %590 = vmax.xlane.f32.xlu0 %v589_v60  ;;  %v5169_v52 = vsel %vm4861_vm1, %v441_v16, -1e+30  ;;  %v604_v60 = vmax.f32 %v5157_v33, %v5161_v37  ;;  %v449_v37 = vld [vmem:[%s4645_s5 + $0x1c0] sm:$0xff] }
  0xce   : > { %7715 = vst [vmem:[#allocation38_spill] sm:$0xff] %v5169_v52  ;;  %v601_v16 = vmax.f32 %v5169_v52, %v5173_v62  ;;  %v5205_v62 = vsel %vm4861_vm1, %v451_v25, -1e+30  ;;  %v5216_v43 = vsel %vm4861_vm1, %v449_v37, -1e+30  ;;  %v453_v25 = vld [vmem:[%s4645_s5 + $0x1e0] sm:$0xff] }
  0xcf   : > { %7721 = vst [vmem:[#allocation44_spill] sm:$0xff] %v5205_v62  ;;  %7723 = vst [vmem:[#allocation46_spill] sm:$0xff] %v5216_v43 }
  0xd1   : > { %599 = vmax.xlane.f32.xlu1 %v598_v27  ;;  %596 = vmax.xlane.f32.xlu0 %v595_v40  ;;  %v452_v27 = vld [vmem:[%s4645_s5 + $0x1d8] sm:$0xff]  ;;  %v610_v40 = vmax.f32 %v5181_v4, %v5185_v7  ;;  %v454_v4 = vld [vmem:[%s4645_s5 + $0x1e8] sm:$0xff] }
  0xd2   : > { %v5209_v52 = vsel %vm4877_vm2, %v452_v27, -1e+30  ;;  %v456_v7 = vld [vmem:[%s4645_s5 + $0x1f8] sm:$0xff] }
  0xd3   : > { %7722 = vst [vmem:[#allocation45_spill] sm:$0xff] %v5209_v52  ;;  %v616_v27 = vmax.f32 %v5205_v62, %v5209_v52  ;;  %v5235_v49 = vsel %vm4877_vm2, %v456_v7, -1e+30  ;;  %v5249_v7 = vld [vmem:[#allocation2 + $0x10] sm:$0xff] }
  0xd4   : > { %7726 = vst [vmem:[#allocation49_spill] sm:$0xff] %v5235_v49  ;;  %7729 = vst [vmem:[#allocation52_spill] sm:$0xff] %v5249_v7 }
  0xd5   : > { %605 = vmax.xlane.f32.xlu1 %v604_v60  ;;  %602 = vmax.xlane.f32.xlu0 %v601_v16  ;;  %v5220_v60 = vsel %vm4877_vm2, %v450_v50, -1e+30  ;;  %v5229_v16 = vsel %vm4861_vm1, %v455_v5, -1e+30  ;;  %v5239_v50 = vsel %vm4861_vm1, %v453_v25, -1e+30 }
  0xd6   : > { %7724 = vst [vmem:[#allocation47_spill] sm:$0xff] %v5220_v60  ;;  %7725 = vst [vmem:[#allocation48_spill] sm:$0xff] %v5229_v16  ;;  %v613_v37 = vmax.f32 %v5216_v43, %v5220_v60  ;;  %v622_v5 = vmax.f32 %v5229_v16, %v5235_v49  ;;  %v5251_v60 = vld [vmem:[#allocation2] sm:$0xff] }
  0xd7   : > { %7727 = vst [vmem:[#allocation50_spill] sm:$0xff] %v5239_v50  ;;  %7730 = vst [vmem:[#allocation53_spill] sm:$0xff] %v5251_v60 }
  0xd9   : > { %611 = vmax.xlane.f32.xlu1 %v610_v40  ;;  %608 = vmax.xlane.f32.xlu0 %v607_v10  ;;  %v5243_v40 = vsel %vm4877_vm2, %v454_v4, -1e+30 }
  0xda   : > { %7728 = vst [vmem:[#allocation51_spill] sm:$0xff] %v5243_v40  ;;  %v619_v10 = vmax.f32 %v5239_v50, %v5243_v40 }
  0xdd   : > { %617 = vmax.xlane.f32.xlu1 %v616_v27  ;;  %614 = vmax.xlane.f32.xlu0 %v613_v37  ;;  %v5259_v27 = vld [vmem:[#allocation2 + $0x18] sm:$0xff]  ;;  %v5261_v37 = vld [vmem:[#allocation2 + $0x8] sm:$0xff] }
  0xde   : > { %7733 = vst [vmem:[#allocation56_spill] sm:$0xff] %v5259_v27  ;;  %7734 = vst [vmem:[#allocation57_spill] sm:$0xff] %v5261_v37 }
  0xe1   : > { %623 = vmax.xlane.f32.xlu1 %v622_v5  ;;  %620 = vmax.xlane.f32.xlu0 %v619_v10  ;;  %v5278_v5 = vld [vmem:[#allocation2 + $0x28] sm:$0xff]  ;;  %v5297_v10 = vld [vmem:[#allocation2 + $0x38] sm:$0xff] }
  0xe2   : > { %7737 = vst [vmem:[#allocation60_spill] sm:$0xff] %v5278_v5  ;;  %7741 = vst [vmem:[#allocation64_spill] sm:$0xff] %v5297_v10 }
 0x132   : > { %v537_v11 = vpop.xlane.xlu1 %536  ;;  %v531_v25 = vpop.xlane.xlu0 %530 }
 0x133   : > { %v5254_v4 = vmax.f32 %v5249_v7, %v537_v11  ;;  %v5257_v17 = vmax.f32 %v5251_v60, %v531_v25  ;;  %v5280_v7 = vld [vmem:[#allocation2 + $0x20] sm:$0xff] }
 0x134   : > { %7738 = vst [vmem:[#allocation61_spill] sm:$0xff] %v5280_v7 }
 0x135   : > { %7731 = vst [vmem:[#allocation54_spill] sm:$0xff] %v5254_v4  ;;  %7732 = vst [vmem:[#allocation55_spill] sm:$0xff] %v5257_v17  ;;  %787 = vperm.xlu0 %3862, %v5257_v17  }
 0x136   : > { %1364 = vst.msk [vmem:[#allocation2 + $0x10] sm:$0xff] %vm1329_vm3, %v5254_v4  ;;  %1362 = vst.msk [vmem:[#allocation2] sm:$0xff] %vm1329_vm3, %v5257_v17  ;;  %v540_v11 = vpop.xlane.xlu1 %539  ;;  %v534_v25 = vpop.xlane.xlu0 %533  ;;  %v5316_v17 = vld [vmem:[#allocation2 + $0x48] sm:$0xff] }
 0x137   : > { %v5273_v40 = vmax.f32 %v5259_v27, %v540_v11  ;;  %v5276_v50 = vmax.f32 %v5261_v37, %v534_v25  ;;  %v5299_v27 = vld [vmem:[#allocation2 + $0x30] sm:$0xff]  ;;  %7745 = vst [vmem:[#allocation68_spill] sm:$0xff] %v5316_v17 }
 0x138   : > { %7742 = vst [vmem:[#allocation65_spill] sm:$0xff] %v5299_v27 }
 0x139   : > { %7735 = vst [vmem:[#allocation58_spill] sm:$0xff] %v5273_v40  ;;  %7736 = vst [vmem:[#allocation59_spill] sm:$0xff] %v5276_v50  ;;  %792 = vperm.xlu1 %3863, %v5276_v50  }
 0x13a   : > { %1365 = vst.msk [vmem:[#allocation2 + $0x18] sm:$0xff] %vm1329_vm3, %v5273_v40  ;;  %1363 = vst.msk [vmem:[#allocation2 + $0x8] sm:$0xff] %vm1329_vm3, %v5276_v50  ;;  %v546_v11 = vpop.xlane.xlu1 %545  ;;  %v543_v25 = vpop.xlane.xlu0 %542 }
 0x13b   : > { %v5292_v60 = vmax.f32 %v5278_v5, %v546_v11  ;;  %v5295_v43 = vmax.f32 %v5280_v7, %v543_v25  ;;  %v5318_v5 = vld [vmem:[#allocation2 + $0x40] sm:$0xff] }
 0x13c   : > { %7746 = vst [vmem:[#allocation69_spill] sm:$0xff] %v5318_v5 }
 0x13d   : > { %7739 = vst [vmem:[#allocation62_spill] sm:$0xff] %v5292_v60  ;;  %7740 = vst [vmem:[#allocation63_spill] sm:$0xff] %v5295_v43  ;;  %797 = vperm.xlu1 %3863, %v5254_v4   ;;  %v5335_v4 = vld [vmem:[#allocation2 + $0x58] sm:$0xff] }
 0x13e   : > { %1367 = vst.msk [vmem:[#allocation2 + $0x28] sm:$0xff] %vm1329_vm3, %v5292_v60  ;;  %1366 = vst.msk [vmem:[#allocation2 + $0x20] sm:$0xff] %vm1329_vm3, %v5295_v43  ;;  %v552_v11 = vpop.xlane.xlu1 %551  ;;  %v549_v25 = vpop.xlane.xlu0 %548 }
 0x13f   : > { %v5311_v37 = vmax.f32 %v5297_v10, %v552_v11  ;;  %v5314_v49 = vmax.f32 %v5299_v27, %v549_v25  ;;  %7749 = vst [vmem:[#allocation72_spill] sm:$0xff] %v5335_v4  ;;  %v5337_v10 = vld [vmem:[#allocation2 + $0x50] sm:$0xff] }
 0x140   : > { %7750 = vst [vmem:[#allocation73_spill] sm:$0xff] %v5337_v10 }
 0x141   : > { %7743 = vst [vmem:[#allocation66_spill] sm:$0xff] %v5311_v37  ;;  %7744 = vst [vmem:[#allocation67_spill] sm:$0xff] %v5314_v49  ;;  %802 = vperm.xlu1 %3863, %v5273_v40  }
 0x142   : > { %1369 = vst.msk [vmem:[#allocation2 + $0x38] sm:$0xff] %vm1329_vm3, %v5311_v37  ;;  %1368 = vst.msk [vmem:[#allocation2 + $0x30] sm:$0xff] %vm1329_vm3, %v5314_v49  ;;  %v558_v11 = vpop.xlane.xlu1 %557  ;;  %v555_v25 = vpop.xlane.xlu0 %554 }
 0x143   : > { %v5330_v7 = vmax.f32 %v5316_v17, %v558_v11  ;;  %v5333_v16 = vmax.f32 %v5318_v5, %v555_v25  ;;  %v5355_v17 = vld [vmem:[#allocation2 + $0x68] sm:$0xff] }
 0x144   : > { %7753 = vst [vmem:[#allocation76_spill] sm:$0xff] %v5355_v17 }
 0x145   : > { %7747 = vst [vmem:[#allocation70_spill] sm:$0xff] %v5330_v7  ;;  %7748 = vst [vmem:[#allocation71_spill] sm:$0xff] %v5333_v16  ;;  %832 = vperm.xlu0 %3862, %v5330_v7   ;;  %807 = vperm.xlu1 %3863, %v5295_v43   ;;  %v5377_v43 = vld [vmem:[#allocation2 + $0x70] sm:$0xff] }
 0x146   : > { %1371 = vst.msk [vmem:[#allocation2 + $0x48] sm:$0xff] %vm1329_vm3, %v5330_v7  ;;  %1370 = vst.msk [vmem:[#allocation2 + $0x40] sm:$0xff] %vm1329_vm3, %v5333_v16  ;;  %v564_v25 = vpop.xlane.xlu1 %563  ;;  %v561_v50 = vpop.xlane.xlu0 %560 }
 0x147   : > { %v5350_v27 = vmax.f32 %v5335_v4, %v564_v25  ;;  %v5353_v40 = vmax.f32 %v5337_v10, %v561_v50  ;;  %v5375_v4 = vld [vmem:[#allocation2 + $0x78] sm:$0xff]  ;;  %7758 = vst [vmem:[#allocation81_spill] sm:$0xff] %v5377_v43 }
 0x148   : > { %7757 = vst [vmem:[#allocation80_spill] sm:$0xff] %v5375_v4 }
 0x149   : > { %7751 = vst [vmem:[#allocation74_spill] sm:$0xff] %v5350_v27  ;;  %7752 = vst [vmem:[#allocation75_spill] sm:$0xff] %v5353_v40  ;;  %842 = vperm.xlu0 %3862, %v5350_v27   ;;  %812 = vperm.xlu1 %3863, %v5292_v60   ;;  %v5397_v60 = vld [vmem:[#allocation2 + $0x80] sm:$0xff] }
 0x14a   : > { %1373 = vst.msk [vmem:[#allocation2 + $0x58] sm:$0xff] %vm1329_vm3, %v5350_v27  ;;  %1372 = vst.msk [vmem:[#allocation2 + $0x50] sm:$0xff] %vm1329_vm3, %v5353_v40  ;;  %v570_v50 = vpop.xlane.xlu1 %569  ;;  %v567_v11 = vpop.xlane.xlu0 %566 }
 0x14b   : > { %v5370_v5 = vmax.f32 %v5355_v17, %v570_v50  ;;  %v5373_v7 = vmax.f32 %v5357_v6, %v567_v11  ;;  %v5395_v17 = vld [vmem:[#allocation2 + $0x88] sm:$0xff]  ;;  %7762 = vst [vmem:[#allocation85_spill] sm:$0xff] %v5397_v60 }
 0x14c   : > { %7761 = vst [vmem:[#allocation84_spill] sm:$0xff] %v5395_v17 }
 0x14d   : > { %7755 = vst [vmem:[#allocation78_spill] sm:$0xff] %v5370_v5  ;;  %7756 = vst [vmem:[#allocation79_spill] sm:$0xff] %v5373_v7  ;;  %852 = vperm.xlu0 %3862, %v5370_v5   ;;  %817 = vperm.xlu1 %3863, %v5314_v49   ;;  %v5417_v49 = vld [vmem:[#allocation2 + $0x90] sm:$0xff] }
 0x14e   : > { %1375 = vst.msk [vmem:[#allocation2 + $0x68] sm:$0xff] %vm1329_vm3, %v5370_v5  ;;  %1374 = vst.msk [vmem:[#allocation2 + $0x60] sm:$0xff] %vm1329_vm3, %v5373_v7  ;;  %v576_v11 = vpop.xlane.xlu1 %575  ;;  %v573_v25 = vpop.xlane.xlu0 %572 }
 0x14f   : > { %v5390_v10 = vmax.f32 %v5375_v4, %v576_v11  ;;  %v5393_v27 = vmax.f32 %v5377_v43, %v573_v25  ;;  %v5415_v4 = vld [vmem:[#allocation2 + $0x98] sm:$0xff]  ;;  %7766 = vst [vmem:[#allocation89_spill] sm:$0xff] %v5417_v49 }
 0x150   : > { %7765 = vst [vmem:[#allocation88_spill] sm:$0xff] %v5415_v4 }
 0x151   : > { %7759 = vst [vmem:[#allocation82_spill] sm:$0xff] %v5390_v10  ;;  %7760 = vst [vmem:[#allocation83_spill] sm:$0xff] %v5393_v27  ;;  %862 = vperm.xlu0 %3862, %v5390_v10   ;;  %822 = vperm.xlu1 %3863, %v5311_v37   ;;  %v5437_v37 = vld [vmem:[#allocation2 + $0xa0] sm:$0xff] }
 0x152   : > { %1377 = vst.msk [vmem:[#allocation2 + $0x78] sm:$0xff] %vm1329_vm3, %v5390_v10  ;;  %1376 = vst.msk [vmem:[#allocation2 + $0x70] sm:$0xff] %vm1329_vm3, %v5393_v27  ;;  %v582_v25 = vpop.xlane.xlu1 %581  ;;  %v579_v50 = vpop.xlane.xlu0 %578 }
 0x153   : > { %v5410_v6 = vmax.f32 %v5395_v17, %v582_v25  ;;  %v5413_v5 = vmax.f32 %v5397_v60, %v579_v50  ;;  %v5435_v17 = vld [vmem:[#allocation2 + $0xa8] sm:$0xff]  ;;  %7770 = vst [vmem:[#allocation93_spill] sm:$0xff] %v5437_v37 }
 0x154   : > { %7769 = vst [vmem:[#allocation92_spill] sm:$0xff] %v5435_v17 }
 0x155   : > { %7763 = vst [vmem:[#allocation86_spill] sm:$0xff] %v5410_v6  ;;  %7764 = vst [vmem:[#allocation87_spill] sm:$0xff] %v5413_v5  ;;  %872 = vperm.xlu0 %3862, %v5410_v6   ;;  %827 = vperm.xlu1 %3863, %v5333_v16   ;;  %v5457_v16 = vld [vmem:[#allocation2 + $0xb0] sm:$0xff] }
 0x156   : > { %1379 = vst.msk [vmem:[#allocation2 + $0x88] sm:$0xff] %vm1329_vm3, %v5410_v6  ;;  %1378 = vst.msk [vmem:[#allocation2 + $0x80] sm:$0xff] %vm1329_vm3, %v5413_v5  ;;  %v588_v50 = vpop.xlane.xlu1 %587  ;;  %v585_v11 = vpop.xlane.xlu0 %584 }
 0x157   : > { %v5430_v43 = vmax.f32 %v5415_v4, %v588_v50  ;;  %v5433_v10 = vmax.f32 %v5417_v49, %v585_v11  ;;  %v5455_v4 = vld [vmem:[#allocation2 + $0xb8] sm:$0xff]  ;;  %7774 = vst [vmem:[#allocation97_spill] sm:$0xff] %v5457_v16 }
 0x158   : > { %7773 = vst [vmem:[#allocation96_spill] sm:$0xff] %v5455_v4 }
 0x159   : > { %7767 = vst [vmem:[#allocation90_spill] sm:$0xff] %v5430_v43  ;;  %7768 = vst [vmem:[#allocation91_spill] sm:$0xff] %v5433_v10  ;;  %882 = vperm.xlu0 %3862, %v5430_v43   ;;  %837 = vperm.xlu1 %3863, %v5353_v40   ;;  %v5477_v40 = vld [vmem:[#allocation2 + $0xc0] sm:$0xff] }
 0x15a   : > { %1381 = vst.msk [vmem:[#allocation2 + $0x98] sm:$0xff] %vm1329_vm3, %v5430_v43  ;;  %1380 = vst.msk [vmem:[#allocation2 + $0x90] sm:$0xff] %vm1329_vm3, %v5433_v10  ;;  %v594_v11 = vpop.xlane.xlu1 %593  ;;  %v591_v25 = vpop.xlane.xlu0 %590 }
 0x15b   : > { %v5450_v60 = vmax.f32 %v5435_v17, %v594_v11  ;;  %v5453_v6 = vmax.f32 %v5437_v37, %v591_v25  ;;  %v5475_v17 = vld [vmem:[#allocation2 + $0xc8] sm:$0xff]  ;;  %7778 = vst [vmem:[#allocation101_spill] sm:$0xff] %v5477_v40 }
 0x15c   : > { %7777 = vst [vmem:[#allocation100_spill] sm:$0xff] %v5475_v17 }
 0x15d   : > { %7771 = vst [vmem:[#allocation94_spill] sm:$0xff] %v5450_v60  ;;  %7772 = vst [vmem:[#allocation95_spill] sm:$0xff] %v5453_v6  ;;  %892 = vperm.xlu0 %3862, %v5450_v60   ;;  %847 = vperm.xlu1 %3863, %v5373_v7   ;;  %v5497_v7 = vld [vmem:[#allocation2 + $0xd0] sm:$0xff] }
 0x15e   : > { %1383 = vst.msk [vmem:[#allocation2 + $0xa8] sm:$0xff] %vm1329_vm3, %v5450_v60  ;;  %1382 = vst.msk [vmem:[#allocation2 + $0xa0] sm:$0xff] %vm1329_vm3, %v5453_v6  ;;  %v600_v25 = vpop.xlane.xlu1 %599  ;;  %v597_v50 = vpop.xlane.xlu0 %596 }
 0x15f   : > { %v5470_v49 = vmax.f32 %v5455_v4, %v600_v25  ;;  %v5473_v43 = vmax.f32 %v5457_v16, %v597_v50  ;;  %v5495_v4 = vld [vmem:[#allocation2 + $0xd8] sm:$0xff]  ;;  %7782 = vst [vmem:[#allocation105_spill] sm:$0xff] %v5497_v7 }
 0x160   : > { %7781 = vst [vmem:[#allocation104_spill] sm:$0xff] %v5495_v4 }
 0x161   : > { %7775 = vst [vmem:[#allocation98_spill] sm:$0xff] %v5470_v49  ;;  %7776 = vst [vmem:[#allocation99_spill] sm:$0xff] %v5473_v43  ;;  %902 = vperm.xlu0 %3862, %v5470_v49   ;;  %857 = vperm.xlu1 %3863, %v5393_v27   ;;  %v5517_v27 = vld [vmem:[#allocation2 + $0xe0] sm:$0xff] }
 0x162   : > { %1385 = vst.msk [vmem:[#allocation2 + $0xb8] sm:$0xff] %vm1329_vm3, %v5470_v49  ;;  %1384 = vst.msk [vmem:[#allocation2 + $0xb0] sm:$0xff] %vm1329_vm3, %v5473_v43  ;;  %v606_v50 = vpop.xlane.xlu1 %605  ;;  %v603_v11 = vpop.xlane.xlu0 %602 }
 0x163   : > { %v5490_v37 = vmax.f32 %v5475_v17, %v606_v50  ;;  %v5493_v60 = vmax.f32 %v5477_v40, %v603_v11  ;;  %v5515_v17 = vld [vmem:[#allocation2 + $0xe8] sm:$0xff]  ;;  %7786 = vst [vmem:[#allocation109_spill] sm:$0xff] %v5517_v27 }
 0x164   : > { %7785 = vst [vmem:[#allocation108_spill] sm:$0xff] %v5515_v17 }
 0x165   : > { %7779 = vst [vmem:[#allocation102_spill] sm:$0xff] %v5490_v37  ;;  %7780 = vst [vmem:[#allocation103_spill] sm:$0xff] %v5493_v60  ;;  %912 = vperm.xlu0 %3862, %v5490_v37   ;;  %867 = vperm.xlu1 %3863, %v5413_v5  }
 0x166   : > { %1387 = vst.msk [vmem:[#allocation2 + $0xc8] sm:$0xff] %vm1329_vm3, %v5490_v37  ;;  %1386 = vst.msk [vmem:[#allocation2 + $0xc0] sm:$0xff] %vm1329_vm3, %v5493_v60  ;;  %v612_v11 = vpop.xlane.xlu1 %611  ;;  %v609_v25 = vpop.xlane.xlu0 %608 }
 0x167   : > { %v5510_v16 = vmax.f32 %v5495_v4, %v612_v11  ;;  %v5513_v49 = vmax.f32 %v5497_v7, %v609_v25  ;;  %v5535_v4 = vld [vmem:[#allocation2 + $0xf8] sm:$0xff]  ;;  %v1394_v11 = vld [vmem:[%s4658_s12] sm:$0xff]  ;;  %v5552_v7 = vstv %s3783_s27 }
 0x168   : > { %7789 = vst [vmem:[#allocation112_spill] sm:$0xff] %v5535_v4 }
 0x169   : > { %7783 = vst [vmem:[#allocation106_spill] sm:$0xff] %v5510_v16  ;;  %7784 = vst [vmem:[#allocation107_spill] sm:$0xff] %v5513_v49  ;;  %922 = vperm.xlu0 %3862, %v5510_v16   ;;  %877 = vperm.xlu1 %3863, %v5433_v10  }
 0x16a   : > { %1389 = vst.msk [vmem:[#allocation2 + $0xd8] sm:$0xff] %vm1329_vm3, %v5510_v16  ;;  %1388 = vst.msk [vmem:[#allocation2 + $0xd0] sm:$0xff] %vm1329_vm3, %v5513_v49  ;;  %v618_v25 = vpop.xlane.xlu1 %617  ;;  %v615_v50 = vpop.xlane.xlu0 %614  ;;  %v5537_v16 = vld [vmem:[#allocation2 + $0xf0] sm:$0xff] }
 0x16b   : > { %v5530_v40 = vmax.f32 %v5515_v17, %v618_v25  ;;  %v5533_v37 = vmax.f32 %v5517_v27, %v615_v50  ;;  %7790 = vst [vmem:[#allocation113_spill] sm:$0xff] %v5537_v16  ;;  %v1427_v27 = vsub.s32 %v1394_v11, %v5552_v7 }
 0x16d   : > { %7787 = vst [vmem:[#allocation110_spill] sm:$0xff] %v5530_v40  ;;  %7788 = vst [vmem:[#allocation111_spill] sm:$0xff] %v5533_v37  ;;  %932 = vperm.xlu0 %3862, %v5530_v40   ;;  %887 = vperm.xlu1 %3863, %v5453_v6  }
 0x16e   : > { %1391 = vst.msk [vmem:[#allocation2 + $0xe8] sm:$0xff] %vm1329_vm3, %v5530_v40  ;;  %1390 = vst.msk [vmem:[#allocation2 + $0xe0] sm:$0xff] %vm1329_vm3, %v5533_v37  ;;  %v624_v50 = vpop.xlane.xlu1 %623  ;;  %v621_v10 = vpop.xlane.xlu0 %620 }
 0x16f   : > { %v5555_v17 = vmax.f32 %v5535_v4, %v624_v50  ;;  %v5558_v40 = vmax.f32 %v5537_v16, %v621_v10  ;;  %v1397_v10 = vld [vmem:[%s4658_s12 + $0x18] sm:$0xff]  ;;  %v1403_v50 = vld [vmem:[%s4658_s12 + $0x48] sm:$0xff] }
 0x170   : > { %v1430_v25 = vsub.s32 %v1397_v10, %v5552_v7  ;;  %v1401_v4 = vld [vmem:[%s4658_s12 + $0x38] sm:$0xff]  ;;  %v1395_v16 = vld [vmem:[%s4658_s12 + $0x8] sm:$0xff] }
 0x171   : > { %7791 = vst [vmem:[#allocation114_spill] sm:$0xff] %v5555_v17  ;;  %7792 = vst [vmem:[#allocation115_spill] sm:$0xff] %v5558_v40  ;;  %942 = vperm.xlu0 %3862, %v5555_v17   ;;  %897 = vperm.xlu1 %3863, %v5473_v43   ;;  %v1428_v10 = vsub.s32 %v1395_v16, %v5552_v7  ;;  %v1409_v16 = vld [vmem:[%s4658_s12 + $0x78] sm:$0xff] }
 0x172   : > { %1393 = vst.msk [vmem:[#allocation2 + $0xf8] sm:$0xff] %vm1329_vm3, %v5555_v17  ;;  %1392 = vst.msk [vmem:[#allocation2 + $0xf0] sm:$0xff] %vm1329_vm3, %v5558_v40  ;;  %v1399_v17 = vld [vmem:[%s4658_s12 + $0x28] sm:$0xff] }
 0x173   : > { %v1432_v11 = vsub.s32 %v1399_v17, %v5552_v7  ;;  %v1405_v17 = vld [vmem:[%s4658_s12 + $0x58] sm:$0xff] }
 0x175   : > { %1460 = vperm.xlu0 %3862, %v1427_v27   ;;  %907 = vperm.xlu1 %3863, %v5493_v60   ;;  %v1434_v27 = vsub.s32 %v1401_v4, %v5552_v7  ;;  %v1400_v60 = vld [vmem:[%s4658_s12 + $0x30] sm:$0xff] }
 0x179   : > { %1469 = vperm.xlu0 %3862, %v1430_v25   ;;  %917 = vperm.xlu1 %3863, %v5513_v49   ;;  %v1436_v25 = vsub.s32 %v1403_v50, %v5552_v7  ;;  %v1396_v49 = vld [vmem:[%s4658_s12 + $0x10] sm:$0xff] }
 0x17a   : > { %v1429_v4 = vsub.s32 %v1396_v49, %v5552_v7  ;;  %v1411_v49 = vld [vmem:[%s4658_s12 + $0x88] sm:$0xff] }
 0x17d   : > { %1475 = vperm.xlu0 %3862, %v1432_v11   ;;  %927 = vperm.xlu1 %3863, %v5533_v37   ;;  %v1438_v11 = vsub.s32 %v1405_v17, %v5552_v7  ;;  %v1407_v37 = vld [vmem:[%s4658_s12 + $0x68] sm:$0xff]  ;;  %v1402_v17 = vld [vmem:[%s4658_s12 + $0x40] sm:$0xff] }
 0x181   : > { %1481 = vperm.xlu0 %3862, %v1434_v27   ;;  %937 = vperm.xlu1 %3863, %v5558_v40   ;;  %v1398_v27 = vld [vmem:[%s4658_s12 + $0x20] sm:$0xff]  ;;  %v1440_v40 = vsub.s32 %v1407_v37, %v5552_v7  ;;  %v1444_v37 = vsub.s32 %v1411_v49, %v5552_v7  ;;  %v1412_v49 = vld [vmem:[%s4658_s12 + $0x90] sm:$0xff] }
 0x182   : > { %v1431_v50 = vsub.s32 %v1398_v27, %v5552_v7  ;;  %v1406_v27 = vld [vmem:[%s4658_s12 + $0x60] sm:$0xff] }
 0x185   : > { %1487 = vperm.xlu0 %3862, %v1436_v25   ;;  %1463 = vperm.xlu1 %3863, %v1428_v10   ;;  %v1442_v25 = vsub.s32 %v1409_v16, %v5552_v7  ;;  %v1433_v10 = vsub.s32 %v1400_v60, %v5552_v7  ;;  %v1408_v60 = vld [vmem:[%s4658_s12 + $0x70] sm:$0xff] }
 0x186   : > { %v1441_v16 = vsub.s32 %v1408_v60, %v5552_v7 }
 0x189   : > { %1493 = vperm.xlu0 %3862, %v1438_v11   ;;  %1466 = vperm.xlu1 %3863, %v1429_v4   ;;  %v1435_v11 = vsub.s32 %v1402_v17, %v5552_v7  ;;  %v1404_v4 = vld [vmem:[%s4658_s12 + $0x50] sm:$0xff]  ;;  %v1445_v17 = vsub.s32 %v1412_v49, %v5552_v7 }
 0x18d   : > { %1499 = vperm.xlu0 %3862, %v1440_v40   ;;  %1472 = vperm.xlu1 %3863, %v1431_v50   ;;  %v1437_v40 = vsub.s32 %v1404_v4, %v5552_v7  ;;  %v1439_v50 = vsub.s32 %v1406_v27, %v5552_v7 }
 0x191   : > { %1505 = vperm.xlu0 %3862, %v1442_v25   ;;  %1478 = vperm.xlu1 %3863, %v1433_v10   ;;  %v1410_v25 = vld [vmem:[%s4658_s12 + $0x80] sm:$0xff] }
 0x192   : > { %v1443_v10 = vsub.s32 %v1410_v25, %v5552_v7 }
 0x195   : > { %1511 = vperm.xlu0 %3862, %v1444_v37   ;;  %1484 = vperm.xlu1 %3863, %v1435_v11  }
 0x199   : > { %1490 = vperm.xlu1 %3863, %v1437_v40  }
 0x19d   : > { %1496 = vperm.xlu1 %3863, %v1439_v50  }
 0x1a1   : > { %1502 = vperm.xlu1 %3863, %v1441_v16  }
 0x1a5   : > { %1508 = vperm.xlu1 %3863, %v1443_v10  }
 0x1a9   : > { %1514 = vperm.xlu1 %3863, %v1445_v17  }
 0x1b4   : > { %v788_v37 = vpop.permute.xlu0 %787 }
 0x1b5   : > { %v945_v11 = vsub.f32 %v4873_v15, %v788_v37  ;;  %v946_v4 = vsub.f32 %v4896_v22, %v788_v37 }
 0x1b7   : > { %v1009_v40 = vmul.f32 1.442695, %v945_v11  ;;  %v1011_v27 = vmul.f32 1.442695, %v946_v4 }
 0x1b8   : > { %v793_v43 = vpop.permute.xlu1 %792 }
 0x1b9   : > { %v947_v50 = vsub.f32 %v4887_v19, %v793_v43  ;;  %v948_v60 = vsub.f32 %v4908_v26, %v793_v43  ;;  %3864 = vpow2.f32 %v1009_v40 }
 0x1ba   : > { %3866 = vpow2.f32 %v1011_v27 }
 0x1bb   : > { %v1013_v16 = vmul.f32 1.442695, %v947_v50  ;;  %v1015_v25 = vmul.f32 1.442695, %v948_v60 }
 0x1bc   : > { %v798_v10 = vpop.permute.xlu1 %797 }
 0x1bd   : > { %3868 = vpow2.f32 %v1013_v16  ;;  %v949_v49 = vsub.f32 %v4869_v14, %v798_v10  ;;  %v950_v17 = vsub.f32 %v4892_v21, %v798_v10 }
 0x1be   : > { %3870 = vpow2.f32 %v1015_v25 }
 0x1bf   : > { %v1017_v6 = vmul.f32 1.442695, %v949_v49  ;;  %v1019_v37 = vmul.f32 1.442695, %v950_v17 }
 0x1c0   : > { %v803_v11 = vpop.permute.xlu1 %802 }
 0x1c1   : > { %3872 = vpow2.f32 %v1017_v6  ;;  %v951_v4 = vsub.f32 %v4883_v18, %v803_v11  ;;  %v952_v5 = vsub.f32 %v4900_v23, %v803_v11 }
 0x1c2   : > { %3874 = vpow2.f32 %v1019_v37 }
 0x1c3   : > { %v1021_v43 = vmul.f32 1.442695, %v951_v4  ;;  %v1023_v40 = vmul.f32 1.442695, %v952_v5  ;;  %v3865_v60 = vpop.eup %3864 }
 0x1c4   : > { %v808_v50 = vpop.permute.xlu1 %807  ;;  %v833_v27 = vpop.permute.xlu0 %832 }
 0x1c5   : > { %3876 = vpow2.f32 %v1021_v43  ;;  %v953_v16 = vsub.f32 %v4928_v35, %v808_v50  ;;  %v954_v10 = vsub.f32 %v4932_v36, %v808_v50  ;;  %v3867_v25 = vpop.eup %3866  ;;  %v963_v21 = vsub.f32 %v4965_v51, %v833_v27 }
 0x1c6   : > { %3878 = vpow2.f32 %v1023_v40  ;;  %v964_v37 = vsub.f32 %v4972_v54, %v833_v27  ;;  %v1201_v50 = vadd.f32 %v3867_v25, %v3865_v60 }
 0x1c7   : > { %v3869_v49 = vpop.eup %3868  ;;  %v1025_v17 = vmul.f32 1.442695, %v953_v16  ;;  %v1027_v6 = vmul.f32 1.442695, %v954_v10  ;;  %v1045_v40 = vmul.f32 1.442695, %v963_v21 }
 0x1c8   : > { %v3871_v14 = vpop.eup %3870  ;;  %v813_v11 = vpop.permute.xlu1 %812  ;;  %v1047_v19 = vmul.f32 1.442695, %v964_v37 }
 0x1c9   : > { %v843_v5 = vpop.permute.xlu0 %842  ;;  %3880 = vpow2.f32 %v1025_v17  ;;  %v955_v4 = vsub.f32 %v4919_v32, %v813_v11  ;;  %v956_v43 = vsub.f32 %v4924_v34, %v813_v11  ;;  %v1204_v35 = vadd.f32 %v3871_v14, %v3869_v49 }
 0x1ca   : > { %3882 = vpow2.f32 %v1027_v6  ;;  %v967_v10 = vsub.f32 %v4989_v61, %v843_v5  ;;  %v968_v27 = vsub.f32 %v4997_v1, %v843_v5 }
 0x1cb   : > { %v3873_v36 = vpop.eup %3872  ;;  %v1029_v26 = vmul.f32 1.442695, %v955_v4  ;;  %v1031_v16 = vmul.f32 1.442695, %v956_v43  ;;  %1205 = vadd.xlane.f32.xlu0 %v1204_v35 }
 0x1cc   : > { %v3875_v51 = vpop.eup %3874  ;;  %v818_v54 = vpop.permute.xlu1 %817  ;;  %v1053_v60 = vmul.f32 1.442695, %v967_v10  ;;  %v1055_v37 = vmul.f32 1.442695, %v968_v27 }
 0x1cd   : > { %v853_v17 = vpop.permute.xlu0 %852  ;;  %3884 = vpow2.f32 %v1029_v26  ;;  %v957_v32 = vsub.f32 %v4952_v45, %v818_v54  ;;  %v958_v6 = vsub.f32 %v4956_v46, %v818_v54  ;;  %1202 = vadd.xlane.f32.xlu1 %v1201_v50  ;;  %v1207_v14 = vadd.f32 %v3875_v51, %v3873_v36 }
 0x1ce   : > { %3886 = vpow2.f32 %v1031_v16  ;;  %v971_v35 = vsub.f32 %v5013_v8, %v853_v17 }
 0x1cf   : > { %v3877_v21 = vpop.eup %3876  ;;  %3888 = vpow2.f32 %v1045_v40  ;;  %v1033_v25 = vmul.f32 1.442695, %v957_v32  ;;  %v1035_v49 = vmul.f32 1.442695, %v958_v6  ;;  %1208 = vadd.xlane.f32.xlu0 %v1207_v14  ;;  %v972_v32 = vsub.f32 %v5017_v9, %v853_v17 }
 0x1d0   : > { %v3879_v11 = vpop.eup %3878  ;;  %3890 = vpow2.f32 %v1047_v19  ;;  %v823_v5 = vpop.permute.xlu1 %822  ;;  %v1061_v40 = vmul.f32 1.442695, %v971_v35 }
 0x1d1   : > { %v863_v26 = vpop.permute.xlu0 %862  ;;  %3892 = vpow2.f32 %v1033_v25  ;;  %v959_v4 = vsub.f32 %v4941_v41, %v823_v5  ;;  %v960_v54 = vsub.f32 %v4948_v44, %v823_v5  ;;  %v1210_v36 = vadd.f32 %v3879_v11, %v3877_v21 }
 0x1d2   : > { %3894 = vpow2.f32 %v1035_v49  ;;  %v975_v16 = vsub.f32 %v5037_v29, %v863_v26  ;;  %v1063_v25 = vmul.f32 1.442695, %v972_v32  ;;  %v976_v17 = vsub.f32 %v5041_v30, %v863_v26 }
 0x1d3   : > { %v3881_v51 = vpop.eup %3880  ;;  %3896 = vpow2.f32 %v1053_v60  ;;  %v1037_v43 = vmul.f32 1.442695, %v959_v4  ;;  %v1039_v50 = vmul.f32 1.442695, %v960_v54  ;;  %1211 = vadd.xlane.f32.xlu1 %v1210_v36 }
 0x1d4   : > { %v3883_v19 = vpop.eup %3882  ;;  %3898 = vpow2.f32 %v1055_v37  ;;  %v828_v10 = vpop.permute.xlu1 %827  ;;  %v1069_v35 = vmul.f32 1.442695, %v975_v16 }
 0x1d5   : > { %v873_v27 = vpop.permute.xlu0 %872  ;;  %3900 = vpow2.f32 %v1037_v43  ;;  %v961_v6 = vsub.f32 %v4976_v55, %v828_v10  ;;  %v962_v14 = vsub.f32 %v4980_v56, %v828_v10  ;;  %v1213_v21 = vadd.f32 %v3883_v19, %v3881_v51 }
 0x1d6   : > { %3902 = vpow2.f32 %v1039_v50  ;;  %v979_v5 = vsub.f32 %v5061_v47, %v873_v27  ;;  %v1071_v19 = vmul.f32 1.442695, %v976_v17 }
 0x1d7   : > { %v3885_v60 = vpop.eup %3884  ;;  %v1041_v49 = vmul.f32 1.442695, %v961_v6  ;;  %v1043_v11 = vmul.f32 1.442695, %v962_v14  ;;  %3904 = vpow2.f32 %v1061_v40  ;;  %1214 = vadd.xlane.f32.xlu0 %v1213_v21  ;;  %v980_v6 = vsub.f32 %v5065_v48, %v873_v27 }
 0x1d8   : > { %v3887_v37 = vpop.eup %3886  ;;  %v838_v4 = vpop.permute.xlu1 %837  ;;  %v1077_v14 = vmul.f32 1.442695, %v979_v5 }
 0x1d9   : > { %v883_v54 = vpop.permute.xlu0 %882  ;;  %v5638_v36 = vpop.eup %3888  ;;  %3906 = vpow2.f32 %v1041_v49  ;;  %v965_v43 = vsub.f32 %v5001_v2, %v838_v4  ;;  %v966_v51 = vsub.f32 %v5005_v3, %v838_v4  ;;  %v1216_v26 = vadd.f32 %v3887_v37, %v3885_v60 }
 0x1da   : > { %v3891_v32 = vpop.eup %3890  ;;  %3908 = vpow2.f32 %v1043_v11  ;;  %v983_v37 = vsub.f32 %v5085_v63, %v883_v54 }
 0x1db   : > { %v3893_v50 = vpop.eup %3892  ;;  %3910 = vpow2.f32 %v1063_v25  ;;  %v1049_v40 = vmul.f32 1.442695, %v965_v43  ;;  %v1051_v16 = vmul.f32 1.442695, %v966_v51  ;;  %1217 = vadd.xlane.f32.xlu1 %v1216_v26  ;;  %v1079_v43 = vmul.f32 1.442695, %v980_v6 }
 0x1dc   : > { %v3895_v10 = vpop.eup %3894  ;;  %3912 = vpow2.f32 %v1069_v35  ;;  %v848_v21 = vpop.permute.xlu1 %847  ;;  %v984_v51 = vsub.f32 %v5089_v0, %v883_v54 }
 0x1dd   : > { %v893_v49 = vpop.permute.xlu0 %892  ;;  %v5643_v47 = vpop.eup %3896  ;;  %3914 = vpow2.f32 %v1049_v40  ;;  %v969_v4 = vsub.f32 %v5025_v20, %v848_v21  ;;  %v970_v60 = vsub.f32 %v5029_v24, %v848_v21  ;;  %v1219_v25 = vadd.f32 %v3895_v10, %v3893_v50 }
 0x1de   : > { %v3899_v11 = vpop.eup %3898  ;;  %3916 = vpow2.f32 %v1051_v16  ;;  %v1087_v54 = vmul.f32 1.442695, %v984_v51 }
 0x1df   : > { %v3901_v17 = vpop.eup %3900  ;;  %3918 = vpow2.f32 %v1071_v19  ;;  %v1057_v35 = vmul.f32 1.442695, %v969_v4  ;;  %v1059_v27 = vmul.f32 1.442695, %v970_v60  ;;  %1220 = vadd.xlane.f32.xlu0 %v1219_v25  ;;  %v1085_v4 = vmul.f32 1.442695, %v983_v37 }
 0x1e0   : > { %v3903_v5 = vpop.eup %3902  ;;  %3920 = vpow2.f32 %v1077_v14  ;;  %v858_v26 = vpop.permute.xlu1 %857  ;;  %v987_v60 = vsub.f32 %v5109_v28, %v893_v49  ;;  %v988_v25 = vsub.f32 %v5113_v31, %v893_v49 }
 0x1e1   : > { %v5649_v40 = vpop.permute.xlu0 %902  ;;  %3922 = vpow2.f32 %v1057_v35  ;;  %v973_v21 = vsub.f32 %v5049_v38, %v858_v26  ;;  %v974_v50 = vsub.f32 %v5053_v39, %v858_v26  ;;  %v3905_v16 = vpop.eup %3904  ;;  %v1222_v19 = vadd.f32 %v3903_v5, %v3901_v17 }
 0x1e2   : > { %3924 = vpow2.f32 %v1059_v27  ;;  %v1093_v51 = vmul.f32 1.442695, %v987_v60  ;;  %v991_v31 = vsub.f32 %v5133_v58, %v5649_v40 }
 0x1e3   : > { %v3907_v10 = vpop.eup %3906  ;;  %v1065_v14 = vmul.f32 1.442695, %v973_v21  ;;  %v1067_v6 = vmul.f32 1.442695, %v974_v50  ;;  %3926 = vpow2.f32 %v1079_v43  ;;  %1223 = vadd.xlane.f32.xlu1 %v1222_v19  ;;  %v1228_v21 = vadd.f32 %v3891_v32, %v5638_v36 }
 0x1e4   : > { %v3909_v63 = vpop.eup %3908  ;;  %v868_v35 = vpop.permute.xlu1 %867 }
 0x1e5   : > { %v3911_v0 = vpop.eup %3910  ;;  %3928 = vpow2.f32 %v1065_v14  ;;  %v977_v26 = vsub.f32 %v5073_v53, %v868_v35  ;;  %v978_v27 = vsub.f32 %v5077_v57, %v868_v35  ;;  %v5659_v37 = vpop.permute.xlu0 %912  ;;  %v1225_v5 = vadd.f32 %v3909_v63, %v3907_v10 }
 0x1e6   : > { %v5657_v17 = vpop.eup %3912  ;;  %3930 = vpow2.f32 %v1067_v6  ;;  %v1095_v14 = vmul.f32 1.442695, %v988_v25 }
 0x1e7   : > { %v3915_v43 = vpop.eup %3914  ;;  %3932 = vpow2.f32 %v1085_v4  ;;  %v1073_v49 = vmul.f32 1.442695, %v977_v26  ;;  %v1075_v50 = vmul.f32 1.442695, %v978_v27  ;;  %1226 = vadd.xlane.f32.xlu0 %v1225_v5  ;;  %1229 = vadd.xlane.f32.xlu1 %v1228_v21  ;;  %v1234_v4 = vadd.f32 %v3899_v11, %v5643_v47  ;;  %v7793_v11 = vld [vmem:[#allocation31_spill] sm:$0xff] }
 0x1e8   : > { %v3917_v19 = vpop.eup %3916  ;;  %3934 = vpow2.f32 %v1087_v54  ;;  %v878_v35 = vpop.permute.xlu1 %877  ;;  %v992_v54 = vsub.f32 %v5137_v59, %v5649_v40  ;;  %v1101_v5 = vmul.f32 1.442695, %v991_v31  ;;  %v995_v21 = vsub.f32 %v5157_v33, %v5659_v37  ;;  %v7794_v31 = vld [vmem:[#allocation37_spill] sm:$0xff] }
 0x1e9   : > { %v3919_v6 = vpop.eup %3918  ;;  %3936 = vpow2.f32 %v1073_v49  ;;  %v981_v63 = vsub.f32 %v5097_v12, %v878_v35  ;;  %v982_v36 = vsub.f32 %v5101_v13, %v878_v35  ;;  %v1231_v10 = vadd.f32 %v3917_v19, %v3915_v43  ;;  %v923_v49 = vpop.permute.xlu0 %922 }
 0x1ea   : > { %v5666_v32 = vpop.eup %3920  ;;  %3938 = vpow2.f32 %v1075_v50  ;;  %v1240_v19 = vadd.f32 %v3911_v0, %v3905_v16  ;;  %v7797_v0 = vld [vmem:[#allocation35_spill] sm:$0xff] }
 0x1eb   : > { %v3923_v60 = vpop.eup %3922  ;;  %3940 = vpow2.f32 %v1093_v51  ;;  %v1081_v25 = vmul.f32 1.442695, %v981_v63  ;;  %v1083_v26 = vmul.f32 1.442695, %v982_v36  ;;  %1232 = vadd.xlane.f32.xlu0 %v1231_v10  ;;  %1235 = vadd.xlane.f32.xlu1 %v1234_v4  ;;  %v1103_v63 = vmul.f32 1.442695, %v992_v54 }
 0x1ec   : > { %v3925_v27 = vpop.eup %3924  ;;  %3942 = vpow2.f32 %v1095_v14  ;;  %v888_v50 = vpop.permute.xlu1 %887  ;;  %v996_v14 = vsub.f32 %v7794_v31, %v5659_v37  ;;  %v1109_v10 = vmul.f32 1.442695, %v995_v21  ;;  %v7795_v4 = vld [vmem:[#allocation40_spill] sm:$0xff] }
 0x1ed   : > { %3944 = vpow2.f32 %v1081_v25  ;;  %v985_v47 = vsub.f32 %v5121_v42, %v888_v50  ;;  %v986_v43 = vsub.f32 %v7793_v11, %v888_v50  ;;  %v3927_v51 = vpop.eup %3926  ;;  %v1237_v40 = vadd.f32 %v3925_v27, %v3923_v60  ;;  %v933_v27 = vpop.permute.xlu0 %932  ;;  %v7833_v11 = vld [vmem:[#allocation65_spill] sm:$0xff]  ;;  %v7834_v42 = vld [vmem:[#allocation67_spill] sm:$0xff] }
 0x1ee   : > { %3946 = vpow2.f32 %v1083_v26  ;;  %v999_v25 = vsub.f32 %v7795_v4, %v923_v49  ;;  %v7796_v26 = vld [vmem:[#allocation34_spill] sm:$0xff]  ;;  %v7835_v13 = vsub.f32 %v7833_v11, %v7834_v42 }
 0x1ef   : > { %v3929_v35 = vpop.eup %3928  ;;  %v1089_v36 = vmul.f32 1.442695, %v985_v47  ;;  %v1091_v33 = vmul.f32 1.442695, %v986_v43  ;;  %3948 = vpow2.f32 %v1101_v5  ;;  %1238 = vadd.xlane.f32.xlu0 %v1237_v40  ;;  %1241 = vadd.xlane.f32.xlu1 %v1240_v19  ;;  %v1246_v47 = vadd.f32 %v3919_v6, %v5657_v17  ;;  %v7798_v19 = vld [vmem:[#allocation41_spill] sm:$0xff] }
 0x1f0   : > { %v3931_v59 = vpop.eup %3930  ;;  %v898_v58 = vpop.permute.xlu1 %897  ;;  %v1111_v5 = vmul.f32 1.442695, %v996_v14  ;;  %v1000_v31 = vsub.f32 %v7798_v19, %v923_v49 }
 0x1f1   : > { %v3933_v50 = vpop.eup %3932  ;;  %3950 = vpow2.f32 %v1089_v36  ;;  %v989_v60 = vsub.f32 %v7796_v26, %v898_v58  ;;  %v990_v16 = vsub.f32 %v7797_v0, %v898_v58  ;;  %v1243_v37 = vadd.f32 %v3931_v59, %v3929_v35  ;;  %v7800_v59 = vld [vmem:[#allocation39_spill] sm:$0xff] }
 0x1f2   : > { %v3935_v54 = vpop.eup %3934  ;;  %3952 = vpow2.f32 %v1091_v33  ;;  %v1117_v36 = vmul.f32 1.442695, %v999_v25  ;;  %v7799_v33 = vld [vmem:[#allocation38_spill] sm:$0xff] }
 0x1f3   : > { %v3937_v43 = vpop.eup %3936  ;;  %3954 = vpow2.f32 %v1103_v63  ;;  %v1097_v21 = vmul.f32 1.442695, %v989_v60  ;;  %v1099_v4 = vmul.f32 1.442695, %v990_v16  ;;  %1244 = vadd.xlane.f32.xlu0 %v1243_v37  ;;  %1247 = vadd.xlane.f32.xlu1 %v1246_v47  ;;  %v1252_v63 = vadd.f32 %v3927_v51, %v5666_v32  ;;  %v943_v47 = vpop.permute.xlu0 %942 }
 0x1f4   : > { %v3939_v40 = vpop.eup %3938  ;;  %3956 = vpow2.f32 %v1109_v10  ;;  %v908_v28 = vpop.permute.xlu1 %907  ;;  %v1003_v10 = vsub.f32 %v5205_v62, %v933_v27  ;;  %v1119_v16 = vmul.f32 1.442695, %v1000_v31  ;;  %v1004_v37 = vsub.f32 %v5209_v52, %v933_v27  ;;  %v7803_v62 = vld [vmem:[#allocation48_spill] sm:$0xff] }
 0x1f5   : > { %v3941_v58 = vpop.eup %3940  ;;  %3958 = vpow2.f32 %v1097_v21  ;;  %v993_v0 = vsub.f32 %v7799_v33, %v908_v28  ;;  %v994_v35 = vsub.f32 %v7800_v59, %v908_v28  ;;  %v1249_v6 = vadd.f32 %v3939_v40, %v3937_v43  ;;  %v7802_v21 = vld [vmem:[#allocation43_spill] sm:$0xff]  ;;  %v1137_v33 = vld [vmem:[#allocation3] sm:$0xff] }
 0x1f6   : > { %v3943_v17 = vpop.eup %3942  ;;  %3960 = vpow2.f32 %v1099_v4  ;;  %v7801_v4 = vld [vmem:[#allocation42_spill] sm:$0xff]  ;;  %v1258_v40 = vadd.f32 %v3935_v54, %v3933_v50 }
 0x1f7   : > { %v3945_v14 = vpop.eup %3944  ;;  %3962 = vpow2.f32 %v1111_v5  ;;  %v1105_v49 = vmul.f32 1.442695, %v993_v0  ;;  %v1107_v25 = vmul.f32 1.442695, %v994_v35  ;;  %1250 = vadd.xlane.f32.xlu0 %v1249_v6  ;;  %1253 = vadd.xlane.f32.xlu1 %v1252_v63  ;;  %v1125_v35 = vmul.f32 1.442695, %v1003_v10 }
 0x1f8   : > { %v3947_v60 = vpop.eup %3946  ;;  %3964 = vpow2.f32 %v1117_v36  ;;  %v918_v28 = vpop.permute.xlu1 %917  ;;  %v1007_v36 = vsub.f32 %v7803_v62, %v943_v47  ;;  %v1127_v6 = vmul.f32 1.442695, %v1004_v37  ;;  %v7804_v63 = vld [vmem:[#allocation49_spill] sm:$0xff] }
 0x1f9   : > { %3966 = vpow2.f32 %v1105_v49  ;;  %v997_v43 = vsub.f32 %v7801_v4, %v918_v28  ;;  %v998_v32 = vsub.f32 %v7802_v21, %v918_v28  ;;  %v3949_v51 = vpop.eup %3948  ;;  %v1255_v5 = vadd.f32 %v3947_v60, %v3945_v14  ;;  %v7805_v28 = vld [vmem:[#allocation46_spill] sm:$0xff]  ;;  %v7806_v14 = vld [vmem:[#allocation47_spill] sm:$0xff] }
 0x1fa   : > { %3968 = vpow2.f32 %v1107_v25  ;;  %v1008_v52 = vsub.f32 %v7804_v63, %v943_v47  ;;  %v1264_v60 = vadd.f32 %v3943_v17, %v3941_v58 }
 0x1fb   : > { %v3951_v0 = vpop.eup %3950  ;;  %v1113_v31 = vmul.f32 1.442695, %v997_v43  ;;  %v1115_v19 = vmul.f32 1.442695, %v998_v32  ;;  %3970 = vpow2.f32 %v1119_v16  ;;  %1256 = vadd.xlane.f32.xlu0 %v1255_v5  ;;  %1259 = vadd.xlane.f32.xlu1 %v1258_v40  ;;  %v1133_v32 = vmul.f32 1.442695, %v1007_v36 }
 0x1fc   : > { %v3953_v27 = vpop.eup %3952  ;;  %v928_v49 = vpop.permute.xlu1 %927  ;;  %v1135_v47 = vmul.f32 1.442695, %v1008_v52 }
 0x1fd   : > { %v3955_v4 = vpop.eup %3954  ;;  %3972 = vpow2.f32 %v1113_v31  ;;  %v1001_v25 = vsub.f32 %v7805_v28, %v928_v49  ;;  %v1002_v50 = vsub.f32 %v7806_v14, %v928_v49  ;;  %v1261_v10 = vadd.f32 %v3953_v27, %v3951_v0  ;;  %v7807_v31 = vld [vmem:[#allocation50_spill] sm:$0xff]  ;;  %v7808_v49 = vld [vmem:[#allocation51_spill] sm:$0xff] }
 0x1fe   : > { %v3957_v54 = vpop.eup %3956  ;;  %3974 = vpow2.f32 %v1115_v19  ;;  %v1270_v17 = vadd.f32 %v3955_v4, %v3949_v51 }
 0x1ff   : > { %v3959_v43 = vpop.eup %3958  ;;  %3976 = vpow2.f32 %v1125_v35  ;;  %v1121_v16 = vmul.f32 1.442695, %v1001_v25  ;;  %v1123_v37 = vmul.f32 1.442695, %v1002_v50  ;;  %1262 = vadd.xlane.f32.xlu0 %v1261_v10  ;;  %1265 = vadd.xlane.f32.xlu1 %v1264_v60 }
 0x200   : > { %v3961_v62 = vpop.eup %3960  ;;  %3978 = vpow2.f32 %v1127_v6  ;;  %v938_v5 = vpop.permute.xlu1 %937 }
 0x201   : > { %v3963_v40 = vpop.eup %3962  ;;  %3980 = vpow2.f32 %v1121_v16  ;;  %v1005_v63 = vsub.f32 %v7807_v31, %v938_v5  ;;  %v1006_v14 = vsub.f32 %v7808_v49, %v938_v5  ;;  %v1267_v58 = vadd.f32 %v3961_v62, %v3959_v43  ;;  %v7816_v49 = vld [vmem:[#allocation54_spill] sm:$0xff] }
 0x202   : > { %v3965_v19 = vpop.eup %3964  ;;  %3982 = vpow2.f32 %v1123_v37  ;;  %v1276_v6 = vadd.f32 %v3963_v40, %v3957_v54  ;;  %v7819_v31 = vld [vmem:[#allocation58_spill] sm:$0xff] }
 0x203   : > { %v3967_v0 = vpop.eup %3966  ;;  %3984 = vpow2.f32 %v1133_v32  ;;  %v1129_v35 = vmul.f32 1.442695, %v1005_v63  ;;  %v1131_v36 = vmul.f32 1.442695, %v1006_v14  ;;  %1268 = vadd.xlane.f32.xlu0 %v1267_v58  ;;  %1271 = vadd.xlane.f32.xlu1 %v1270_v17 }
 0x204   : > { %v3969_v27 = vpop.eup %3968  ;;  %3986 = vpow2.f32 %v1135_v47  ;;  %v5696_v58 = vpop.permute.xlu1 %1463 }
 0x205   : > { %3988 = vpow2.f32 %v1129_v35  ;;  %v3971_v52 = vpop.eup %3970  ;;  %v1273_v50 = vadd.f32 %v3969_v27, %v3967_v0  ;;  %v1416_v0 = vld [vmem:[%s4658_s12 + $0xb0] sm:$0xff]  ;;  %v1413_v35 = vld [vmem:[%s4658_s12 + $0x98] sm:$0xff] }
 0x206   : > { %3990 = vpow2.f32 %v1131_v36  ;;  %v1282_v4 = vadd.f32 %v3971_v52, %v3965_v19  ;;  %v1414_v19 = vld [vmem:[%s4658_s12 + $0xa0] sm:$0xff]  ;;  %v5701_v36 = vpop.permute.xlu0 %1460  ;;  %v1449_v27 = vsub.s32 %v1416_v0, %v5552_v7 }
 0x207   : > { %v3973_v25 = vpop.eup %3972  ;;  %1277 = vadd.xlane.f32.xlu1 %v1276_v6  ;;  %1274 = vadd.xlane.f32.xlu0 %v1273_v50  ;;  %v1447_v17 = vsub.s32 %v1414_v19, %v5552_v7  ;;  %v1418_v6 = vld [vmem:[%s4658_s12 + $0xc0] sm:$0xff]  ;;  %v1415_v50 = vld [vmem:[%s4658_s12 + $0xa8] sm:$0xff]  ;;  %v1421_v19 = vld [vmem:[%s4658_s12 + $0xd8] sm:$0xff] }
 0x208   : > { %v3975_v10 = vpop.eup %3974  ;;  %v5704_v52 = vpop.permute.xlu1 %1466 }
 0x209   : > { %v3977_v60 = vpop.eup %3976  ;;  %v1279_v43 = vadd.f32 %v3975_v10, %v3973_v25  ;;  %v1446_v25 = vsub.s32 %v1413_v35, %v5552_v7  ;;  %v1451_v10 = vsub.s32 %v1418_v6, %v5552_v7  ;;  %v1454_v35 = vsub.s32 %v1421_v19, %v5552_v7  ;;  %v1423_v6 = vld [vmem:[%s4658_s12 + $0xe8] sm:$0xff] }
 0x20a   : > { %v3979_v62 = vpop.eup %3978 }
 0x20b   : > { %v3981_v51 = vpop.eup %3980  ;;  %1283 = vadd.xlane.f32.xlu1 %v1282_v4  ;;  %1280 = vadd.xlane.f32.xlu0 %v1279_v43  ;;  %v1288_v16 = vadd.f32 %v3979_v62, %v3977_v60  ;;  %v1420_v60 = vld [vmem:[%s4658_s12 + $0xd0] sm:$0xff]  ;;  %v5711_v62 = vpop.permute.xlu0 %1469  ;;  %v1448_v4 = vsub.s32 %v1415_v50, %v5552_v7  ;;  %v1417_v43 = vld [vmem:[%s4658_s12 + $0xb8] sm:$0xff] }
 0x20c   : > { %v3983_v63 = vpop.eup %3982  ;;  %v1425_v50 = vld [vmem:[%s4658_s12 + $0xf8] sm:$0xff] }
 0x20d   : > { %v3985_v14 = vpop.eup %3984  ;;  %v1285_v37 = vadd.f32 %v3983_v63, %v3981_v51  ;;  %v5714_v51 = vpop.permute.xlu1 %1472  ;;  %v1453_v63 = vsub.s32 %v1420_v60, %v5552_v7 }
 0x20e   : > { %v3987_v32 = vpop.eup %3986 }
 0x20f   : > { %v3989_v54 = vpop.eup %3988  ;;  %1289 = vadd.xlane.f32.xlu1 %v1288_v16  ;;  %1286 = vadd.xlane.f32.xlu0 %v1285_v37  ;;  %v1294_v5 = vadd.f32 %v3987_v32, %v3985_v14  ;;  %v1422_v14 = vld [vmem:[%s4658_s12 + $0xe0] sm:$0xff]  ;;  %v1450_v32 = vsub.s32 %v1417_v43, %v5552_v7  ;;  %v1419_v16 = vld [vmem:[%s4658_s12 + $0xc8] sm:$0xff] }
 0x210   : > { %v3991_v47 = vpop.eup %3990  ;;  %v1455_v37 = vsub.s32 %v1422_v14, %v5552_v7  ;;  %v7809_v14 = vld [vmem:[#allocation57_spill] sm:$0xff] }
 0x211   : > { %v1291_v40 = vadd.f32 %v3991_v47, %v3989_v54  ;;  %v5721_v54 = vpop.permute.xlu0 %1475  ;;  %v5724_v47 = vpop.permute.xlu1 %1478 }
 0x213   : > { %1295 = vadd.xlane.f32.xlu1 %v1294_v5  ;;  %1292 = vadd.xlane.f32.xlu0 %v1291_v40  ;;  %v1424_v5 = vld [vmem:[%s4658_s12 + $0xf0] sm:$0xff]  ;;  %v1452_v40 = vsub.s32 %v1419_v16, %v5552_v7 }
 0x215   : > { %v5730_v0 = vpop.permute.xlu0 %1481 }
 0x224   : > { %1520 = vperm.xlu1 %3863, %v1447_v17   ;;  %v1457_v17 = vsub.s32 %v1424_v5, %v5552_v7  ;;  %v7812_v5 = vld [vmem:[#allocation53_spill] sm:$0xff] }
 0x228   : > { %1526 = vperm.xlu1 %3863, %v1449_v27   ;;  %v5733_v27 = vpop.permute.xlu1 %1484 }
 0x229   : > { %1517 = vperm.xlu0 %3862, %v1446_v25   ;;  %v1456_v25 = vsub.s32 %v1423_v6, %v5552_v7 }
 0x22c   : > { %1532 = vperm.xlu1 %3863, %v1451_v10   ;;  %v5738_v10 = vpop.permute.xlu0 %1487  ;;  %v5740_v60 = vpop.permute.xlu1 %1490 }
 0x22d   : > { %1523 = vperm.xlu0 %3862, %v1448_v4   ;;  %v1458_v4 = vsub.s32 %v1425_v50, %v5552_v7 }
 0x230   : > { %1538 = vperm.xlu1 %3863, %v1453_v63   ;;  %v5743_v43 = vpop.permute.xlu0 %1493  ;;  %v5745_v63 = vpop.permute.xlu1 %1496 }
 0x231   : > { %1529 = vperm.xlu0 %3862, %v1450_v32   ;;  %v7810_v32 = vld [vmem:[#allocation59_spill] sm:$0xff] }
 0x232   : > { %v7811_v16 = vsub.f32 %v7809_v14, %v7810_v32 }
 0x234   : > { %1544 = vperm.xlu1 %3863, %v1455_v37   ;;  %v723_v37 = vmul.f32 1.442695, %v7811_v16  ;;  %v5755_v6 = vpop.permute.xlu1 %1502 }
 0x235   : > { %1535 = vperm.xlu0 %3862, %v1452_v40   ;;  %v7813_v40 = vld [vmem:[#allocation55_spill] sm:$0xff] }
 0x236   : > { %v7814_v19 = vsub.f32 %v7812_v5, %v7813_v40  ;;  %3992 = vpow2.f32 %v723_v37  ;;  %v7822_v5 = vld [vmem:[#allocation61_spill] sm:$0xff]  ;;  %v7823_v40 = vld [vmem:[#allocation63_spill] sm:$0xff] }
 0x237   : > { %v7826_v37 = vld [vmem:[#allocation11_spill] sm:$0xff] }
 0x238   : > { %1550 = vperm.xlu1 %3863, %v1457_v17   ;;  %v721_v17 = vmul.f32 1.442695, %v7814_v19  ;;  %v5765_v16 = vpop.permute.xlu1 %1508  ;;  %v7824_v19 = vsub.f32 %v7822_v5, %v7823_v40  ;;  %vm1556_vm5 = vcmp.eq.s32.totalorder %v7826_v37, %v5701_v36  ;;  %v7830_v5 = vld [vmem:[#allocation64_spill] sm:$0xff]  ;;  %v7831_v40 = vld [vmem:[#allocation66_spill] sm:$0xff]  ;;  %vm1562_vm7 = vcmp.eq.s32.totalorder %v7826_v37, %v5711_v62 }
 0x239   : > { %1541 = vperm.xlu0 %3862, %v1454_v35   ;;  %v5753_v35 = vpop.permute.xlu0 %1499  ;;  %7821 = vst [vmem:[#allocation57_spill] sm:$0xff] %v5765_v16  ;;  %v1620_v57 = vsel %vm1556_vm5, %v4896_v22, 0.0  ;;  %vm1558_vm9 = vcmp.eq.s32.totalorder %v7826_v37, %v5696_v58  ;;  %vm1566_vm11 = vcmp.eq.s32.totalorder %v7826_v37, %v5721_v54  ;;  %vm1560_vm13 = vcmp.eq.s32.totalorder %v7826_v37, %v5704_v52 }
 0x23a   : > { %3994 = vpow2.f32 %v721_v17  ;;  %v729_v21 = vmul.f32 1.442695, %v7824_v19  ;;  %v7832_v19 = vsub.f32 %v7830_v5, %v7831_v40  ;;  %vm1570_vm15 = vcmp.eq.s32.totalorder %v7826_v37, %v5730_v0 }
 0x23b   : > { %vm1564_vm1 = vcmp.eq.s32.totalorder %v7826_v37, %v5714_v51 }
 0x23c   : > { %v735_v26 = vmul.f32 1.442695, %v7832_v19 }
 0x23d   : > { %1547 = vperm.xlu0 %3862, %v1456_v25   ;;  %v7815_v25 = vld [vmem:[#allocation52_spill] sm:$0xff]  ;;  %v5763_v32 = vpop.permute.xlu0 %1505 }
 0x23e   : > { %v7817_v7 = vsub.f32 %v7815_v25, %v7816_v49  ;;  %v7825_v49 = vld [vmem:[#allocation10_spill] sm:$0xff]  ;;  %v7827_v25 = vld [vmem:[#allocation60_spill] sm:$0xff] }
 0x23f   : > { %vm1555_vm4 = vcmp.eq.s32.totalorder %v7825_v49, %v5701_v36  ;;  %v733_v36 = vmul.f32 1.442695, %v7835_v13  ;;  %vm1561_vm6 = vcmp.eq.s32.totalorder %v7825_v49, %v5711_v62  ;;  %vm1557_vm8 = vcmp.eq.s32.totalorder %v7825_v49, %v5696_v58  ;;  %v7839_v62 = vld [vmem:[#allocation70_spill] sm:$0xff] }
 0x240   : > { %v725_v50 = vmul.f32 1.442695, %v7817_v7  ;;  %v3993_v59 = vpop.eup %3992  ;;  %v7828_v7 = vld [vmem:[#allocation62_spill] sm:$0xff]  ;;  %v1619_v12 = vsel %vm1555_vm4, %v4873_v15, 0.0  ;;  %v1625_v11 = vsel %vm1561_vm6, %v4883_v18, 0.0  ;;  %vm1565_vm10 = vcmp.eq.s32.totalorder %v7825_v49, %v5721_v54 }
 0x241   : > { %1553 = vperm.xlu0 %3862, %v1458_v4   ;;  %v7818_v4 = vld [vmem:[#allocation56_spill] sm:$0xff]  ;;  %v5774_v17 = vpop.permute.xlu0 %1511  ;;  %v1683_v13 = vadd.f32 %v1620_v57, %v1619_v12  ;;  %v1140_v12 = vld [vmem:[#allocation3 + $0x18] sm:$0xff]  ;;  %vm1559_vm12 = vcmp.eq.s32.totalorder %v7825_v49, %v5704_v52  ;;  %vm1569_vm14 = vcmp.eq.s32.totalorder %v7825_v49, %v5730_v0  ;;  %vm1563_vm0 = vcmp.eq.s32.totalorder %v7825_v49, %v5714_v51 }
 0x242   : > { %3996 = vpow2.f32 %v725_v50  ;;  %v7820_v28 = vsub.f32 %v7818_v4, %v7819_v31  ;;  %v1138_v31 = vld [vmem:[#allocation3 + $0x8] sm:$0xff]  ;;  %v7829_v50 = vsub.f32 %v7827_v25, %v7828_v7  ;;  %v7845_v52 = vld [vmem:[#allocation12_spill] sm:$0xff]  ;;  %vm1573_vm2 = vcmp.eq.s32.totalorder %v7825_v49, %v5738_v10 }
 0x243   : > { %v1170_v53 = vmul.f32 %v3993_v59, %v1138_v31  ;;  %v1626_v59 = vsel %vm1562_vm7, %v4900_v23, 0.0  ;;  %v7838_v23 = vld [vmem:[#allocation68_spill] sm:$0xff]  ;;  %vm1574_vm4 = vcmp.eq.s32.totalorder %v7826_v37, %v5738_v10  ;;  %vm1567_vm5 = vcmp.eq.s32.totalorder %v7825_v49, %v5724_v47 }
 0x244   : > { %v727_v14 = vmul.f32 1.442695, %v7820_v28  ;;  %v3995_v28 = vpop.eup %3994  ;;  %v731_v4 = vmul.f32 1.442695, %v7829_v50  ;;  %v1139_v50 = vld [vmem:[#allocation3 + $0x10] sm:$0xff]  ;;  %v7840_v31 = vsub.f32 %v7838_v23, %v7839_v62  ;;  %v1692_v19 = vadd.f32 %v1626_v59, %v1625_v11  ;;  %v1141_v59 = vld [vmem:[#allocation3 + $0x20] sm:$0xff] }
 0x245   : > { %v1169_v7 = vmul.f32 %v3995_v28, %v1137_v33  ;;  %v7841_v28 = vld [vmem:[#allocation69_spill] sm:$0xff]  ;;  %vm1568_vm6 = vcmp.eq.s32.totalorder %v7826_v37, %v5724_v47  ;;  %vm1577_vm7 = vcmp.eq.s32.totalorder %v7825_v49, %v5743_v43 }
 0x246   : > { %3998 = vpow2.f32 %v727_v14  ;;  %v5779_v14 = vpop.permute.xlu1 %1514  ;;  %v1632_v10 = vsel %vm1568_vm6, %v4956_v46, 0.0  ;;  %v7863_v46 = vld [vmem:[#allocation80_spill] sm:$0xff]  ;;  %vm1583_vm6 = vcmp.eq.s32.totalorder %v7825_v49, %v5755_v6 }
 0x247   : > { %4000 = vpow2.f32 %v729_v21 }
 0x248   : > { %4002 = vpow2.f32 %v731_v4  ;;  %v7842_v4 = vld [vmem:[#allocation71_spill] sm:$0xff] }
 0x249   : > { %4004 = vpow2.f32 %v735_v26  ;;  %v7837_v26 = vld [vmem:[#allocation15_spill] sm:$0xff]  ;;  %v7843_v5 = vsub.f32 %v7841_v28, %v7842_v4 }
 0x24a   : > { %4006 = vpow2.f32 %v733_v36  ;;  %v1622_v57 = vsel %vm1558_vm9, %v7837_v26, 0.0  ;;  %v7844_v36 = vld [vmem:[#allocation16_spill] sm:$0xff]  ;;  %vm1571_vm9 = vcmp.eq.s32.totalorder %v7825_v49, %v5733_v27 }
 0x24b   : > { %v737_v40 = vmul.f32 1.442695, %v7843_v5  ;;  %v1142_v5 = vld [vmem:[#allocation3 + $0x28] sm:$0xff] }
 0x24c   : > { %v3997_v16 = vpop.eup %3996 }
 0x24d   : > { %v1171_v33 = vmul.f32 %v3997_v16, %v1139_v50  ;;  %v739_v16 = vmul.f32 1.442695, %v7840_v31 }
 0x24f   : > { %4008 = vpow2.f32 %v739_v16  ;;  %v1633_v16 = vsel %vm1569_vm14, %v4941_v41, 0.0  ;;  %vm1576_vm14 = vcmp.eq.s32.totalorder %v7826_v37, %v5740_v60 }
 0x250   : > { %v3999_v21 = vpop.eup %3998  ;;  %4010 = vpow2.f32 %v737_v40 }
 0x258   : > { %v1206_v25 = vpop.xlane.xlu0 %1205 }
 0x259   : > { %v1298_v15 = vadd.f32 %v1206_v25, %v1170_v53  ;;  %v7836_v53 = vld [vmem:[#allocation13_spill] sm:$0xff]  ;;  %v1629_v25 = vsel %vm1565_vm10, %v7844_v36, 0.0  ;;  %vm1572_vm10 = vcmp.eq.s32.totalorder %v7826_v37, %v5733_v27 }
 0x25a   : > { %v1203_v22 = vpop.xlane.xlu1 %1202  ;;  %v1621_v58 = vsel %vm1557_vm8, %v7836_v53, 0.0  ;;  %v7848_v53 = vld [vmem:[#allocation74_spill] sm:$0xff]  ;;  %v7853_v36 = vld [vmem:[#allocation17_spill] sm:$0xff]  ;;  %vm1578_vm8 = vcmp.eq.s32.totalorder %v7826_v37, %v5743_v43 }
 0x25b   : > { %v1297_v42 = vadd.f32 %v1203_v22, %v1169_v7  ;;  %1331 = vst.msk [vmem:[#allocation3 + $0x8] sm:$0xff] %vm1329_vm3, %v1298_v15  ;;  %v1630_v7 = vsel %vm1566_vm11, %v4924_v34, 0.0  ;;  %v1686_v50 = vadd.f32 %v1622_v57, %v1621_v58  ;;  %v1172_v15 = vmul.f32 %v3999_v21, %v1140_v12  ;;  %v4001_v22 = vpop.eup %4000  ;;  %v7847_v21 = vld [vmem:[#allocation72_spill] sm:$0xff]  ;;  %v7850_v57 = vld [vmem:[#allocation73_spill] sm:$0xff] }
 0x25c   : > { %1684 = vadd.xlane.f32.xlu1 %v1683_v13  ;;  %v1209_v18 = vpop.xlane.xlu0 %1208  ;;  %v1623_v13 = vsel %vm1559_vm12, %v7845_v52, 0.0  ;;  %v7849_v58 = vsub.f32 %v7847_v21, %v7848_v53  ;;  %v1698_v62 = vadd.f32 %v1630_v7, %v1629_v25  ;;  %v4003_v31 = vpop.eup %4002  ;;  %v1173_v4 = vmul.f32 %v4001_v22, %v1141_v59  ;;  %v7854_v25 = vld [vmem:[#allocation18_spill] sm:$0xff]  ;;  %v1143_v21 = vld [vmem:[#allocation3 + $0x30] sm:$0xff]  ;;  %v1144_v53 = vld [vmem:[#allocation3 + $0x38] sm:$0xff] }
 0x25d   : > { %1330 = vst.msk [vmem:[#allocation3] sm:$0xff] %vm1329_vm3, %v1297_v42  ;;  %v1299_v54 = vadd.f32 %v1209_v18, %v1171_v33  ;;  %v7846_v42 = vld [vmem:[#allocation14_spill] sm:$0xff]  ;;  %v7851_v18 = vld [vmem:[#allocation75_spill] sm:$0xff]  ;;  %v1627_v41 = vsel %vm1563_vm0, %v7853_v36, 0.0  ;;  %v1174_v51 = vmul.f32 %v4003_v31, %v1142_v5  ;;  %v1641_v5 = vsel %vm1577_vm7, %v4989_v61, 0.0 }
 0x25e   : > { %v1624_v33 = vsel %vm1560_vm13, %v7846_v42, 0.0  ;;  %v743_v26 = vmul.f32 1.442695, %v7849_v58  ;;  %v7852_v12 = vsub.f32 %v7850_v57, %v7851_v18  ;;  %v7856_v22 = vld [vmem:[#allocation78_spill] sm:$0xff]  ;;  %v1631_v58 = vsel %vm1567_vm5, %v4952_v45, 0.0  ;;  %v7860_v57 = vld [vmem:[#allocation77_spill] sm:$0xff] }
 0x25f   : > { %1332 = vst.msk [vmem:[#allocation3 + $0x10] sm:$0xff] %vm1329_vm3, %v1299_v54  ;;  %v1634_v54 = vsel %vm1570_vm15, %v4948_v44, 0.0  ;;  %v1689_v28 = vadd.f32 %v1624_v33, %v1623_v13  ;;  %v1628_v44 = vsel %vm1564_vm1, %v7854_v25, 0.0  ;;  %v7858_v33 = vld [vmem:[#allocation19_spill] sm:$0xff]  ;;  %v1642_v36 = vsel %vm1578_vm8, %v4997_v1, 0.0 }
 0x260   : > { %v1212_v11 = vpop.xlane.xlu1 %1211  ;;  %1693 = vadd.xlane.f32.xlu1 %v1692_v19  ;;  %1687 = vadd.xlane.f32.xlu0 %v1686_v50  ;;  %v741_v23 = vmul.f32 1.442695, %v7852_v12  ;;  %v4005_v19 = vpop.eup %4004  ;;  %4012 = vpow2.f32 %v743_v26  ;;  %v1704_v42 = vadd.f32 %v1634_v54, %v1633_v16  ;;  %v1637_v40 = vsel %vm1573_vm2, %v7858_v33, 0.0  ;;  %v7861_v18 = vld [vmem:[#allocation79_spill] sm:$0xff]  ;;  %v7864_v54 = vld [vmem:[#allocation82_spill] sm:$0xff] }
 0x261   : > { %v1300_v34 = vadd.f32 %v1212_v11, %v1172_v15  ;;  %v4007_v7 = vpop.eup %4006  ;;  %v7855_v15 = vld [vmem:[#allocation76_spill] sm:$0xff]  ;;  %v7862_v12 = vsub.f32 %v7860_v57, %v7861_v18  ;;  %v1176_v16 = vmul.f32 %v4005_v19, %v1144_v53  ;;  %v1146_v25 = vld [vmem:[#allocation3 + $0x48] sm:$0xff]  ;;  %vm1581_vm11 = vcmp.eq.s32.totalorder %v7825_v49, %v5753_v35  ;;  %v7866_v19 = vld [vmem:[#allocation81_spill] sm:$0xff] }
 0x262   : > { %v7857_v52 = vsub.f32 %v7855_v15, %v7856_v22  ;;  %4014 = vpow2.f32 %v741_v23  ;;  %v7859_v11 = vld [vmem:[#allocation20_spill] sm:$0xff]  ;;  %v1175_v31 = vmul.f32 %v4007_v7, %v1143_v21  ;;  %v4009_v47 = vpop.eup %4008  ;;  %vm1582_vm12 = vcmp.eq.s32.totalorder %v7826_v37, %v5753_v35  ;;  %v7870_v15 = vld [vmem:[#allocation86_spill] sm:$0xff]  ;;  %v7872_v21 = vld [vmem:[#allocation85_spill] sm:$0xff] }
 0x263   : > { %1333 = vst.msk [vmem:[#allocation3 + $0x18] sm:$0xff] %vm1329_vm3, %v1300_v34  ;;  %v1638_v59 = vsel %vm1574_vm4, %v7859_v11, 0.0  ;;  %v1695_v34 = vadd.f32 %v1628_v44, %v1627_v41  ;;  %v745_v23 = vmul.f32 1.442695, %v7862_v12  ;;  %v1701_v41 = vadd.f32 %v1632_v10, %v1631_v58  ;;  %v7867_v44 = vld [vmem:[#allocation83_spill] sm:$0xff] }
 0x264   : > { %1699 = vadd.xlane.f32.xlu1 %v1698_v62  ;;  %v1215_v0 = vpop.xlane.xlu0 %1214  ;;  %1690 = vadd.xlane.f32.xlu0 %v1689_v28  ;;  %v747_v13 = vmul.f32 1.442695, %v7857_v52  ;;  %v1710_v45 = vadd.f32 %v1638_v59, %v1637_v40  ;;  %v7865_v28 = vsub.f32 %v7863_v46, %v7864_v54  ;;  %v1635_v61 = vsel %vm1571_vm9, %v4976_v55, 0.0  ;;  %v7869_v55 = vld [vmem:[#allocation84_spill] sm:$0xff]  ;;  %v1145_v40 = vld [vmem:[#allocation3 + $0x40] sm:$0xff] }
 0x265   : > { %v1301_v50 = vadd.f32 %v1215_v0, %v1173_v4  ;;  %v1636_v1 = vsel %vm1572_vm10, %v4980_v56, 0.0  ;;  %v7868_v0 = vsub.f32 %v7866_v19, %v7867_v44  ;;  %vm1575_vm13 = vcmp.eq.s32.totalorder %v7825_v49, %v5740_v60  ;;  %v7882_v19 = vld [vmem:[#allocation92_spill] sm:$0xff]  ;;  %v7883_v44 = vld [vmem:[#allocation94_spill] sm:$0xff] }
 0x266   : > { %4016 = vpow2.f32 %v747_v13  ;;  %v751_v4 = vmul.f32 1.442695, %v7865_v28  ;;  %v7871_v22 = vsub.f32 %v7869_v55, %v7870_v15  ;;  %v1716_v56 = vadd.f32 %v1642_v36, %v1641_v5  ;;  %v4011_v13 = vpop.eup %4010  ;;  %v7879_v28 = vld [vmem:[#allocation91_spill] sm:$0xff]  ;;  %v7881_v36 = vld [vmem:[#allocation21_spill] sm:$0xff] }
 0x267   : > { %1334 = vst.msk [vmem:[#allocation3 + $0x20] sm:$0xff] %vm1329_vm3, %v1301_v50  ;;  %v749_v7 = vmul.f32 1.442695, %v7868_v0  ;;  %4018 = vpow2.f32 %v745_v23  ;;  %v1178_v27 = vmul.f32 %v4009_v47, %v1146_v25  ;;  %v1707_v33 = vadd.f32 %v1636_v1, %v1635_v61  ;;  %v1147_v47 = vld [vmem:[#allocation3 + $0x50] sm:$0xff]  ;;  %v1150_v15 = vld [vmem:[#allocation3 + $0x68] sm:$0xff] }
 0x268   : > { %v1218_v26 = vpop.xlane.xlu1 %1217  ;;  %1705 = vadd.xlane.f32.xlu1 %v1704_v42  ;;  %1696 = vadd.xlane.f32.xlu0 %v1695_v34  ;;  %v755_v52 = vmul.f32 1.442695, %v7871_v22  ;;  %4020 = vpow2.f32 %v751_v4  ;;  %v1645_v42 = vsel %vm1581_vm11, %v5013_v8, 0.0  ;;  %vm1585_vm15 = vcmp.eq.s32.totalorder %v7825_v49, %v5763_v32  ;;  %v1149_v22 = vld [vmem:[#allocation3 + $0x60] sm:$0xff] }
 0x269   : > { %v1302_v62 = vadd.f32 %v1218_v26, %v1174_v51  ;;  %v1646_v51 = vsel %vm1582_vm12, %v5017_v9, 0.0  ;;  %vm1586_vm0 = vcmp.eq.s32.totalorder %v7826_v37, %v5763_v32  ;;  %v1639_v8 = vsel %vm1575_vm13, %v5001_v2, 0.0  ;;  %v7873_v2 = vld [vmem:[#allocation87_spill] sm:$0xff]  ;;  %v7876_v26 = vld [vmem:[#allocation90_spill] sm:$0xff] }
 0x26a   : > { %v4013_v11 = vpop.eup %4012  ;;  %v1640_v9 = vsel %vm1576_vm14, %v5005_v3, 0.0  ;;  %4022 = vpow2.f32 %v749_v7  ;;  %vm1579_vm1 = vcmp.eq.s32.totalorder %v7825_v49, %v5745_v63  ;;  %vm1580_vm2 = vcmp.eq.s32.totalorder %v7826_v37, %v5745_v63  ;;  %v7875_v3 = vld [vmem:[#allocation88_spill] sm:$0xff] }
 0x26b   : > { %1335 = vst.msk [vmem:[#allocation3 + $0x28] sm:$0xff] %vm1329_vm3, %v1302_v62  ;;  %4024 = vpow2.f32 %v755_v52  ;;  %v7874_v53 = vsub.f32 %v7872_v21, %v7873_v2  ;;  %v1722_v10 = vadd.f32 %v1646_v51, %v1645_v42  ;;  %v1177_v60 = vmul.f32 %v4011_v13, %v1145_v40  ;;  %v7886_v13 = vld [vmem:[#allocation93_spill] sm:$0xff]  ;;  %v7887_v42 = vld [vmem:[#allocation95_spill] sm:$0xff]  ;;  %v7892_v2 = vld [vmem:[#allocation22_spill] sm:$0xff] }
 0x26c   : > { %1711 = vadd.xlane.f32.xlu1 %v1710_v45  ;;  %v1221_v43 = vpop.xlane.xlu0 %1220  ;;  %1702 = vadd.xlane.f32.xlu0 %v1701_v41  ;;  %v4015_v59 = vpop.eup %4014  ;;  %v7877_v57 = vsub.f32 %v7875_v3, %v7876_v26  ;;  %v1649_v12 = vsel %vm1585_vm15, %v5037_v29, 0.0  ;;  %v1650_v23 = vsel %vm1586_vm0, %v5041_v30, 0.0  ;;  %v1713_v62 = vadd.f32 %v1640_v9, %v1639_v8  ;;  %v1148_v45 = vld [vmem:[#allocation3 + $0x58] sm:$0xff] }
 0x26d   : > { %v1303_v50 = vadd.f32 %v1221_v43, %v1175_v31  ;;  %v753_v58 = vmul.f32 1.442695, %v7874_v53  ;;  %vm1589_vm4 = vcmp.eq.s32.totalorder %v7825_v49, %v5774_v17  ;;  %vm1590_vm5 = vcmp.eq.s32.totalorder %v7826_v37, %v5774_v17  ;;  %v1152_v26 = vld [vmem:[#allocation3 + $0x78] sm:$0xff] }
 0x26e   : > { %v759_v18 = vmul.f32 1.442695, %v7877_v57  ;;  %v1643_v29 = vsel %vm1579_vm1, %v5025_v20, 0.0  ;;  %v1644_v30 = vsel %vm1580_vm2, %v5029_v24, 0.0  ;;  %vm1584_vm7 = vcmp.eq.s32.totalorder %v7826_v37, %v5755_v6  ;;  %v7878_v20 = vld [vmem:[#allocation89_spill] sm:$0xff]  ;;  %v1151_v57 = vld [vmem:[#allocation3 + $0x70] sm:$0xff] }
 0x26f   : > { %1336 = vst.msk [vmem:[#allocation3 + $0x30] sm:$0xff] %vm1329_vm3, %v1303_v50  ;;  %4026 = vpow2.f32 %v753_v58  ;;  %v7880_v4 = vsub.f32 %v7878_v20, %v7879_v28  ;;  %v1728_v63 = vadd.f32 %v1650_v23, %v1649_v12  ;;  %v1180_v24 = vmul.f32 %v4013_v11, %v1148_v45  ;;  %v7893_v58 = vld [vmem:[#allocation23_spill] sm:$0xff]  ;;  %v7894_v23 = vld [vmem:[#allocation97_spill] sm:$0xff] }
 0x270   : > { %v1224_v35 = vpop.xlane.xlu1 %1223  ;;  %1717 = vadd.xlane.f32.xlu1 %v1716_v56  ;;  %1708 = vadd.xlane.f32.xlu0 %v1707_v33  ;;  %v4017_v31 = vpop.eup %4016  ;;  %v1653_v41 = vsel %vm1589_vm4, %v7881_v36, 0.0  ;;  %v1654_v25 = vsel %vm1590_vm5, %v5065_v48, 0.0  ;;  %v1719_v61 = vadd.f32 %v1644_v30, %v1643_v29  ;;  %v1179_v1 = vmul.f32 %v4015_v59, %v1147_v47  ;;  %v7885_v56 = vld [vmem:[#allocation57_spill] sm:$0xff]  ;;  %v7890_v59 = vld [vmem:[#allocation98_spill] sm:$0xff] }
 0x271   : > { %v1304_v34 = vadd.f32 %v1224_v35, %v1176_v16  ;;  %v757_v5 = vmul.f32 1.442695, %v7880_v4  ;;  %v4019_v43 = vpop.eup %4018  ;;  %4028 = vpow2.f32 %v759_v18  ;;  %v7884_v0 = vsub.f32 %v7882_v19, %v7883_v44  ;;  %v7889_v35 = vld [vmem:[#allocation96_spill] sm:$0xff]  ;;  %v7897_v47 = vld [vmem:[#allocation26_spill] sm:$0xff]  ;;  %v1154_v4 = vld [vmem:[#allocation3 + $0x88] sm:$0xff] }
 0x272   : > { %v1647_v50 = vsel %vm1583_vm6, %v5049_v38, 0.0  ;;  %v1648_v48 = vsel %vm1584_vm7, %v5053_v39, 0.0  ;;  %v4021_v52 = vpop.eup %4020  ;;  %vm1587_vm8 = vcmp.eq.s32.totalorder %v7825_v49, %v7885_v56  ;;  %vm1588_vm9 = vcmp.eq.s32.totalorder %v7826_v37, %v7885_v56  ;;  %v7903_v19 = vld [vmem:[#allocation103_spill] sm:$0xff] }
 0x273   : > { %1337 = vst.msk [vmem:[#allocation3 + $0x38] sm:$0xff] %vm1329_vm3, %v1304_v34  ;;  %v763_v7 = vmul.f32 1.442695, %v7884_v0  ;;  %4030 = vpow2.f32 %v757_v5  ;;  %v7888_v6 = vsub.f32 %v7886_v13, %v7887_v42  ;;  %v1734_v51 = vadd.f32 %v1654_v25, %v1653_v41  ;;  %v1153_v5 = vld [vmem:[#allocation3 + $0x80] sm:$0xff]  ;;  %v7899_v41 = vld [vmem:[#allocation100_spill] sm:$0xff] }
 0x274   : > { %v1230_v32 = vpop.xlane.xlu1 %1229  ;;  %1723 = vadd.xlane.f32.xlu1 %v1722_v10  ;;  %v1227_v16 = vpop.xlane.xlu0 %1226  ;;  %1714 = vadd.xlane.f32.xlu0 %v1713_v62  ;;  %v1725_v40 = vadd.f32 %v1648_v48, %v1647_v50  ;;  %v1182_v11 = vmul.f32 %v4017_v31, %v1150_v15  ;;  %v1181_v8 = vmul.f32 %v4019_v43, %v1149_v22  ;;  %v1651_v53 = vsel %vm1587_vm8, %v7892_v2, 0.0  ;;  %v7895_v62 = vld [vmem:[#allocation99_spill] sm:$0xff]  ;;  %v7900_v25 = vld [vmem:[#allocation102_spill] sm:$0xff]  ;;  %v7902_v43 = vld [vmem:[#allocation101_spill] sm:$0xff] }
 0x275   : > { %v1306_v46 = vadd.f32 %v1230_v32, %v1178_v27  ;;  %v1305_v54 = vadd.f32 %v1227_v16, %v1177_v60  ;;  %v761_v39 = vmul.f32 1.442695, %v7888_v6  ;;  %v4023_v33 = vpop.eup %4022  ;;  %4032 = vpow2.f32 %v763_v7  ;;  %v1156_v22 = vld [vmem:[#allocation3 + $0x98] sm:$0xff]  ;;  %v7905_v13 = vld [vmem:[#allocation104_spill] sm:$0xff]  ;;  %v7906_v42 = vld [vmem:[#allocation106_spill] sm:$0xff] }
 0x276   : > { %v4025_v9 = vpop.eup %4024  ;;  %v7891_v34 = vsub.f32 %v7889_v35, %v7890_v59  ;;  %v1652_v10 = vsel %vm1588_vm9, %v7893_v58, 0.0  ;;  %vm1591_vm10 = vcmp.eq.s32.totalorder %v7825_v49, %v5779_v14  ;;  %vm1592_vm11 = vcmp.eq.s32.totalorder %v7826_v37, %v5779_v14  ;;  %v1157_v2 = vld [vmem:[#allocation3 + $0xa0] sm:$0xff] }
 0x277   : > { %1339 = vst.msk [vmem:[#allocation3 + $0x48] sm:$0xff] %vm1329_vm3, %v1306_v46  ;;  %1338 = vst.msk [vmem:[#allocation3 + $0x40] sm:$0xff] %vm1329_vm3, %v1305_v54  ;;  %4034 = vpow2.f32 %v761_v39  ;;  %v7896_v45 = vsub.f32 %v7894_v23, %v7895_v62  ;;  %v1731_v29 = vadd.f32 %v1652_v10, %v1651_v53  ;;  %v1184_v30 = vmul.f32 %v4021_v52, %v1152_v26  ;;  %v7898_v54 = vld [vmem:[#allocation27_spill] sm:$0xff]  ;;  %v1155_v52 = vld [vmem:[#allocation3 + $0x90] sm:$0xff] }
 0x278   : > { %v1236_v17 = vpop.xlane.xlu1 %1235  ;;  %1729 = vadd.xlane.f32.xlu1 %v1728_v63  ;;  %v1233_v55 = vpop.xlane.xlu0 %1232  ;;  %1720 = vadd.xlane.f32.xlu0 %v1719_v61  ;;  %v767_v21 = vmul.f32 1.442695, %v7891_v34  ;;  %v1183_v32 = vmul.f32 %v4023_v33, %v1151_v57  ;;  %v1655_v46 = vsel %vm1591_vm10, %v7897_v47, 0.0  ;;  %v1656_v14 = vsel %vm1592_vm11, %v7898_v54, 0.0  ;;  %v7909_v33 = vld [vmem:[#allocation107_spill] sm:$0xff]  ;;  %v7911_v10 = vld [vmem:[#allocation108_spill] sm:$0xff] }
 0x279   : > { %v1308_v27 = vadd.f32 %v1236_v17, %v1180_v24  ;;  %v1307_v38 = vadd.f32 %v1233_v55, %v1179_v1  ;;  %v765_v31 = vmul.f32 1.442695, %v7896_v45  ;;  %v4027_v16 = vpop.eup %4026  ;;  %v7901_v61 = vsub.f32 %v7899_v41, %v7900_v25  ;;  %v1159_v47 = vld [vmem:[#allocation3 + $0xb0] sm:$0xff] }
 0x27a   : > { %4036 = vpow2.f32 %v767_v21  ;;  %v7904_v44 = vsub.f32 %v7902_v43, %v7903_v19  ;;  %v1737_v7 = vadd.f32 %v1656_v14, %v1655_v46  ;;  %v1186_v50 = vmul.f32 %v4025_v9, %v1154_v4  ;;  %v1158_v21 = vld [vmem:[#allocation3 + $0xa8] sm:$0xff]  ;;  %v7917_v14 = vld [vmem:[#allocation112_spill] sm:$0xff] }
 0x27b   : > { %1341 = vst.msk [vmem:[#allocation3 + $0x58] sm:$0xff] %vm1329_vm3, %v1308_v27  ;;  %1340 = vst.msk [vmem:[#allocation3 + $0x50] sm:$0xff] %vm1329_vm3, %v1307_v38  ;;  %v4029_v36 = vpop.eup %4028  ;;  %v771_v1 = vmul.f32 1.442695, %v7901_v61  ;;  %4038 = vpow2.f32 %v765_v31  ;;  %v1185_v48 = vmul.f32 %v4027_v16, %v1153_v5  ;;  %v7907_v6 = vsub.f32 %v7905_v13, %v7906_v42  ;;  %v1160_v16 = vld [vmem:[#allocation3 + $0xb8] sm:$0xff]  ;;  %v1162_v19 = vld [vmem:[#allocation3 + $0xc8] sm:$0xff] }
 0x27c   : > { %v1242_v60 = vpop.xlane.xlu1 %1241  ;;  %1735 = vadd.xlane.f32.xlu1 %v1734_v51  ;;  %v1239_v3 = vpop.xlane.xlu0 %1238  ;;  %1726 = vadd.xlane.f32.xlu0 %v1725_v40  ;;  %v769_v0 = vmul.f32 1.442695, %v7904_v44  ;;  %v7908_v51 = vld [vmem:[#allocation105_spill] sm:$0xff] }
 0x27d   : > { %v1310_v18 = vadd.f32 %v1242_v60, %v1182_v11  ;;  %v1309_v12 = vadd.f32 %v1239_v3, %v1181_v8  ;;  %v4031_v17 = vpop.eup %4030  ;;  %4040 = vpow2.f32 %v771_v1  ;;  %v775_v39 = vmul.f32 1.442695, %v7907_v6  ;;  %v7912_v60 = vld [vmem:[#allocation110_spill] sm:$0xff]  ;;  %v7920_v5 = vld [vmem:[#allocation113_spill] sm:$0xff] }
 0x27e   : > { %4042 = vpow2.f32 %v769_v0  ;;  %v7910_v40 = vsub.f32 %v7908_v51, %v7909_v33  ;;  %v1188_v8 = vmul.f32 %v4029_v36, %v1156_v22  ;;  %v1187_v9 = vmul.f32 %v4031_v17, %v1155_v52  ;;  %v1164_v22 = vld [vmem:[#allocation3 + $0xd8] sm:$0xff]  ;;  %v1166_v33 = vld [vmem:[#allocation3 + $0xe8] sm:$0xff] }
 0x27f   : > { %1343 = vst.msk [vmem:[#allocation3 + $0x68] sm:$0xff] %vm1329_vm3, %v1310_v18  ;;  %1342 = vst.msk [vmem:[#allocation3 + $0x60] sm:$0xff] %vm1329_vm3, %v1309_v12  ;;  %v4033_v38 = vpop.eup %4032  ;;  %4044 = vpow2.f32 %v775_v39  ;;  %v7913_v3 = vsub.f32 %v7911_v10, %v7912_v60  ;;  %v7914_v18 = vld [vmem:[#allocation109_spill] sm:$0xff]  ;;  %v7915_v12 = vld [vmem:[#allocation111_spill] sm:$0xff] }
 0x280   : > { %v1248_v20 = vpop.xlane.xlu1 %1247  ;;  %v1245_v28 = vpop.xlane.xlu0 %1244  ;;  %1732 = vadd.xlane.f32.xlu0 %v1731_v29  ;;  %v773_v11 = vmul.f32 1.442695, %v7910_v40  ;;  %v7916_v23 = vsub.f32 %v7914_v18, %v7915_v12  ;;  %v1190_v45 = vmul.f32 %v4033_v38, %v1158_v21  ;;  %v1163_v38 = vld [vmem:[#allocation3 + $0xd0] sm:$0xff] }
 0x281   : > { %v1312_v63 = vadd.f32 %v1248_v20, %v1184_v30  ;;  %v1311_v24 = vadd.f32 %v1245_v28, %v1183_v32  ;;  %v4035_v35 = vpop.eup %4034  ;;  %v779_v26 = vmul.f32 1.442695, %v7913_v3  ;;  %v7918_v20 = vld [vmem:[#allocation114_spill] sm:$0xff]  ;;  %v1167_v3 = vld [vmem:[#allocation3 + $0xf0] sm:$0xff] }
 0x282   : > { %4046 = vpow2.f32 %v773_v11  ;;  %v777_v62 = vmul.f32 1.442695, %v7916_v23  ;;  %v1189_v31 = vmul.f32 %v4035_v35, %v1157_v2  ;;  %v7919_v28 = vsub.f32 %v7917_v14, %v7918_v20  ;;  %v7925_v14 = vld [vmem:[#allocation34_spill] sm:$0xff] }
 0x283   : > { %1345 = vst.msk [vmem:[#allocation3 + $0x78] sm:$0xff] %vm1329_vm3, %v1312_v63  ;;  %1344 = vst.msk [vmem:[#allocation3 + $0x70] sm:$0xff] %vm1329_vm3, %v1311_v24  ;;  %4048 = vpow2.f32 %v779_v26  ;;  %v7921_v63 = vld [vmem:[#allocation115_spill] sm:$0xff] }
 0x284   : > { %v1254_v55 = vpop.xlane.xlu1 %1253  ;;  %v1251_v15 = vpop.xlane.xlu0 %1250  ;;  %1738 = vadd.xlane.f32.xlu0 %v1737_v7  ;;  %v783_v4 = vmul.f32 1.442695, %v7919_v28  ;;  %4050 = vpow2.f32 %v777_v62  ;;  %v7922_v24 = vsub.f32 %v7920_v5, %v7921_v63  ;;  %v7926_v28 = vld [vmem:[#allocation35_spill] sm:$0xff]  ;;  %v7927_v63 = vld [vmem:[#allocation24_spill] sm:$0xff] }
 0x285   : > { %v1314_v56 = vadd.f32 %v1254_v55, %v1186_v50  ;;  %v1313_v27 = vadd.f32 %v1251_v15, %v1185_v48  ;;  %v4037_v57 = vpop.eup %4036  ;;  %v1161_v50 = vld [vmem:[#allocation3 + $0xc0] sm:$0xff] }
 0x286   : > { %v4039_v29 = vpop.eup %4038  ;;  %v781_v36 = vmul.f32 1.442695, %v7922_v24  ;;  %v1192_v41 = vmul.f32 %v4037_v57, %v1160_v16  ;;  %4052 = vpow2.f32 %v783_v4 }
 0x287   : > { %1347 = vst.msk [vmem:[#allocation3 + $0x88] sm:$0xff] %vm1329_vm3, %v1314_v56  ;;  %1346 = vst.msk [vmem:[#allocation3 + $0x80] sm:$0xff] %vm1329_vm3, %v1313_v27  ;;  %v1191_v25 = vmul.f32 %v4039_v29, %v1159_v47  ;;  %v4041_v61 = vpop.eup %4040  ;;  %v7923_v29 = vld [vmem:[#allocation30_spill] sm:$0xff] }
 0x288   : > { %v1260_v59 = vpop.xlane.xlu1 %1259  ;;  %v1257_v34 = vpop.xlane.xlu0 %1256  ;;  %4054 = vpow2.f32 %v781_v36  ;;  %v1194_v48 = vmul.f32 %v4041_v61, %v1162_v19  ;;  %v7928_v36 = vld [vmem:[#allocation25_spill] sm:$0xff] }
 0x289   : > { %v1316_v53 = vadd.f32 %v1260_v59, %v1188_v8  ;;  %v1315_v58 = vadd.f32 %v1257_v34, %v1187_v9  ;;  %v4043_v44 = vpop.eup %4042  ;;  %v1165_v9 = vld [vmem:[#allocation3 + $0xe0] sm:$0xff] }
 0x28a   : > { %v4045_v17 = vpop.eup %4044  ;;  %v1193_v15 = vmul.f32 %v4043_v44, %v1161_v50  ;;  %v7930_v44 = vld [vmem:[#allocation39_spill] sm:$0xff]  ;;  %v7931_v50 = vld [vmem:[#allocation28_spill] sm:$0xff] }
 0x28b   : > { %1349 = vst.msk [vmem:[#allocation3 + $0x98] sm:$0xff] %vm1329_vm3, %v1316_v53  ;;  %1348 = vst.msk [vmem:[#allocation3 + $0x90] sm:$0xff] %vm1329_vm3, %v1315_v58  ;;  %v1196_v42 = vmul.f32 %v4045_v17, %v1164_v22  ;;  %v1168_v53 = vld [vmem:[#allocation3 + $0xf8] sm:$0xff] }
 0x28c   : > { %v1266_v30 = vpop.xlane.xlu1 %1265  ;;  %v1263_v32 = vpop.xlane.xlu0 %1262  ;;  %v7932_v17 = vld [vmem:[#allocation29_spill] sm:$0xff] }
 0x28d   : > { %v1318_v46 = vadd.f32 %v1266_v30, %v1190_v45  ;;  %v1317_v54 = vadd.f32 %v1263_v32, %v1189_v31  ;;  %v4047_v52 = vpop.eup %4046  ;;  %v7924_v32 = vld [vmem:[#allocation31_spill] sm:$0xff] }
 0x28e   : > { %v4049_v6 = vpop.eup %4048  ;;  %v1195_v51 = vmul.f32 %v4047_v52, %v1163_v38  ;;  %v7934_v38 = vld [vmem:[#allocation43_spill] sm:$0xff] }
 0x28f   : > { %1351 = vst.msk [vmem:[#allocation3 + $0xa8] sm:$0xff] %vm1329_vm3, %v1318_v46  ;;  %1350 = vst.msk [vmem:[#allocation3 + $0xa0] sm:$0xff] %vm1329_vm3, %v1317_v54  ;;  %v4051_v40 = vpop.eup %4050  ;;  %v1198_v59 = vmul.f32 %v4049_v6, %v1166_v33  ;;  %v7935_v6 = vld [vmem:[#allocation32_spill] sm:$0xff] }
 0x290   : > { %v1272_v1 = vpop.xlane.xlu1 %1271  ;;  %v1269_v43 = vpop.xlane.xlu0 %1268  ;;  %v1197_v2 = vmul.f32 %v4051_v40, %v1165_v9  ;;  %v7937_v9 = vld [vmem:[#allocation46_spill] sm:$0xff] }
 0x291   : > { %v1320_v0 = vadd.f32 %v1272_v1, %v1192_v41  ;;  %v1319_v7 = vadd.f32 %v1269_v43, %v1191_v25  ;;  %v4053_v34 = vpop.eup %4052  ;;  %v7929_v43 = vld [vmem:[#allocation38_spill] sm:$0xff] }
 0x292   : > { %v4055_v58 = vpop.eup %4054  ;;  %v1200_v57 = vmul.f32 %v4053_v34, %v1168_v53 }
 0x293   : > { %1353 = vst.msk [vmem:[#allocation3 + $0xb8] sm:$0xff] %vm1329_vm3, %v1320_v0  ;;  %1352 = vst.msk [vmem:[#allocation3 + $0xb0] sm:$0xff] %vm1329_vm3, %v1319_v7  ;;  %v1199_v12 = vmul.f32 %v4055_v58, %v1167_v3  ;;  %v7940_v58 = vld [vmem:[#allocation37_spill] sm:$0xff] }
 0x294   : > { %v1278_v55 = vpop.xlane.xlu1 %1277  ;;  %v1275_v27 = vpop.xlane.xlu0 %1274 }
 0x295   : > { %v1322_v56 = vadd.f32 %v1278_v55, %v1194_v48  ;;  %v1321_v13 = vadd.f32 %v1275_v27, %v1193_v15 }
 0x297   : > { %1355 = vst.msk [vmem:[#allocation3 + $0xc8] sm:$0xff] %vm1329_vm3, %v1322_v56  ;;  %1354 = vst.msk [vmem:[#allocation3 + $0xc0] sm:$0xff] %vm1329_vm3, %v1321_v13  ;;  %v7933_v56 = vld [vmem:[#allocation42_spill] sm:$0xff] }
 0x298   : > { %v1284_v39 = vpop.xlane.xlu1 %1283  ;;  %v1281_v8 = vpop.xlane.xlu0 %1280 }
 0x299   : > { %v1324_v11 = vadd.f32 %v1284_v39, %v1196_v42  ;;  %v1323_v35 = vadd.f32 %v1281_v8, %v1195_v51  ;;  %v7936_v51 = vld [vmem:[#allocation33_spill] sm:$0xff] }
 0x29b   : > { %1357 = vst.msk [vmem:[#allocation3 + $0xd8] sm:$0xff] %vm1329_vm3, %v1324_v11  ;;  %1356 = vst.msk [vmem:[#allocation3 + $0xd0] sm:$0xff] %vm1329_vm3, %v1323_v35 }
 0x29c   : > { %v1290_v21 = vpop.xlane.xlu1 %1289  ;;  %v1287_v60 = vpop.xlane.xlu0 %1286 }
 0x29d   : > { %v1326_v10 = vadd.f32 %v1290_v21, %v1198_v59  ;;  %v1325_v26 = vadd.f32 %v1287_v60, %v1197_v2  ;;  %v7938_v59 = vld [vmem:[#allocation47_spill] sm:$0xff]  ;;  %v7939_v2 = vld [vmem:[#allocation36_spill] sm:$0xff] }
 0x29f   : > { %1359 = vst.msk [vmem:[#allocation3 + $0xe8] sm:$0xff] %vm1329_vm3, %v1326_v10  ;;  %1358 = vst.msk [vmem:[#allocation3 + $0xe0] sm:$0xff] %vm1329_vm3, %v1325_v26 }
 0x2a0   : > { %v1296_v18 = vpop.xlane.xlu1 %1295  ;;  %v1293_v62 = vpop.xlane.xlu0 %1292 }
 0x2a1   : > { %v1328_v23 = vadd.f32 %v1296_v18, %v1200_v57  ;;  %v1327_v45 = vadd.f32 %v1293_v62, %v1199_v12  ;;  %v7941_v57 = vld [vmem:[#allocation50_spill] sm:$0xff]  ;;  %v7942_v12 = vld [vmem:[#allocation51_spill] sm:$0xff] }
 0x2a3   : > { %1361 = vst.msk [vmem:[#allocation3 + $0xf8] sm:$0xff] %vm1329_vm3, %v1328_v23  ;;  %1360 = vst.msk [vmem:[#allocation3 + $0xf0] sm:$0xff] %vm1329_vm3, %v1327_v45  ;;  %v7943_v45 = vld [vmem:[#allocation40_spill] sm:$0xff] }
 0x2a4   : > { %v1521_v31 = vpop.permute.xlu1 %1520 }
 0x2a5   : > { %vm1595_vm12 = vcmp.eq.s32.totalorder %v7825_v49, %v1521_v31  ;;  %vm1596_vm13 = vcmp.eq.s32.totalorder %v7826_v37, %v1521_v31 }
 0x2a6   : > { %v1659_v30 = vsel %vm1595_vm12, %v7923_v29, 0.0  ;;  %v1660_v16 = vsel %vm1596_vm13, %v7924_v32, 0.0  ;;  %v7944_v29 = vld [vmem:[#allocation41_spill] sm:$0xff] }
 0x2a7   : > { %v1743_v47 = vadd.f32 %v1660_v16, %v1659_v30 }
 0x2a8   : > { %v1527_v46 = vpop.permute.xlu1 %1526  ;;  %v1518_v54 = vpop.permute.xlu0 %1517 }
 0x2a9   : > { %vm1599_vm14 = vcmp.eq.s32.totalorder %v7825_v49, %v1527_v46  ;;  %vm1600_vm15 = vcmp.eq.s32.totalorder %v7826_v37, %v1527_v46  ;;  %1744 = vadd.xlane.f32.xlu0 %v1743_v47  ;;  %vm1593_vm0 = vcmp.eq.s32.totalorder %v7825_v49, %v1518_v54  ;;  %vm1594_vm1 = vcmp.eq.s32.totalorder %v7826_v37, %v1518_v54  ;;  %v7945_v47 = vld [vmem:[#allocation44_spill] sm:$0xff]  ;;  %v7946_v54 = vld [vmem:[#allocation45_spill] sm:$0xff] }
 0x2aa   : > { %v1663_v20 = vsel %vm1599_vm14, %v7925_v14, 0.0  ;;  %v1664_v4 = vsel %vm1600_vm15, %v7926_v28, 0.0  ;;  %v1657_v24 = vsel %vm1593_vm0, %v7927_v63, 0.0  ;;  %v1658_v41 = vsel %vm1594_vm1, %v7928_v36, 0.0  ;;  %v7948_v63 = vld [vmem:[#allocation49_spill] sm:$0xff] }
 0x2ab   : > { %v1749_v5 = vadd.f32 %v1664_v4, %v1663_v20  ;;  %v1740_v25 = vadd.f32 %v1658_v41, %v1657_v24  ;;  %v7947_v4 = vld [vmem:[#allocation48_spill] sm:$0xff]  ;;  %v1779_v41 = vld [vmem:[#allocation4] sm:$0xff] }
 0x2ac   : > { %v1533_v61 = vpop.permute.xlu1 %1532  ;;  %v1524_v1 = vpop.permute.xlu0 %1523 }
 0x2ad   : > { %vm1603_vm2 = vcmp.eq.s32.totalorder %v7825_v49, %v1533_v61  ;;  %vm1604_vm4 = vcmp.eq.s32.totalorder %v7826_v37, %v1533_v61  ;;  %1750 = vadd.xlane.f32.xlu0 %v1749_v5  ;;  %vm1597_vm5 = vcmp.eq.s32.totalorder %v7825_v49, %v1524_v1  ;;  %vm1598_vm6 = vcmp.eq.s32.totalorder %v7826_v37, %v1524_v1  ;;  %v1782_v1 = vld [vmem:[#allocation4 + $0x18] sm:$0xff] }
 0x2ae   : > { %v1667_v19 = vsel %vm1603_vm2, %v7929_v43, 0.0  ;;  %v1668_v0 = vsel %vm1604_vm4, %v7930_v44, 0.0  ;;  %1741 = vadd.xlane.f32.xlu1 %v1740_v25  ;;  %v1661_v48 = vsel %vm1597_vm5, %v7931_v50, 0.0  ;;  %v1662_v55 = vsel %vm1598_vm6, %v7932_v17, 0.0  ;;  %v1780_v43 = vld [vmem:[#allocation4 + $0x8] sm:$0xff] }
 0x2af   : > { %v1755_v7 = vadd.f32 %v1668_v0, %v1667_v19  ;;  %v1746_v15 = vadd.f32 %v1662_v55, %v1661_v48 }
 0x2b0   : > { %v1539_v22 = vpop.permute.xlu1 %1538  ;;  %v1530_v52 = vpop.permute.xlu0 %1529 }
 0x2b1   : > { %vm1607_vm7 = vcmp.eq.s32.totalorder %v7825_v49, %v1539_v22  ;;  %vm1608_vm8 = vcmp.eq.s32.totalorder %v7826_v37, %v1539_v22  ;;  %1756 = vadd.xlane.f32.xlu0 %v1755_v7  ;;  %vm1601_vm9 = vcmp.eq.s32.totalorder %v7825_v49, %v1530_v52  ;;  %vm1602_vm10 = vcmp.eq.s32.totalorder %v7826_v37, %v1530_v52  ;;  %v1784_v7 = vld [vmem:[#allocation4 + $0x28] sm:$0xff]  ;;  %v1783_v22 = vld [vmem:[#allocation4 + $0x20] sm:$0xff] }
 0x2b2   : > { %v1671_v27 = vsel %vm1607_vm7, %v7933_v56, 0.0  ;;  %v1672_v13 = vsel %vm1608_vm8, %v7934_v38, 0.0  ;;  %1747 = vadd.xlane.f32.xlu1 %v1746_v15  ;;  %v1665_v39 = vsel %vm1601_vm9, %v7935_v6, 0.0  ;;  %v1666_v33 = vsel %vm1602_vm10, %v7936_v51, 0.0  ;;  %v1786_v15 = vld [vmem:[#allocation4 + $0x38] sm:$0xff] }
 0x2b3   : > { %v1761_v42 = vadd.f32 %v1672_v13, %v1671_v27  ;;  %v1752_v40 = vadd.f32 %v1666_v33, %v1665_v39  ;;  %v1788_v13 = vld [vmem:[#allocation4 + $0x48] sm:$0xff] }
 0x2b4   : > { %v1545_v11 = vpop.permute.xlu1 %1544  ;;  %v1536_v8 = vpop.permute.xlu0 %1535 }
 0x2b5   : > { %vm1611_vm11 = vcmp.eq.s32.totalorder %v7825_v49, %v1545_v11  ;;  %vm1612_vm12 = vcmp.eq.s32.totalorder %v7826_v37, %v1545_v11  ;;  %1762 = vadd.xlane.f32.xlu0 %v1761_v42  ;;  %vm1605_vm13 = vcmp.eq.s32.totalorder %v7825_v49, %v1536_v8  ;;  %vm1606_vm14 = vcmp.eq.s32.totalorder %v7826_v37, %v1536_v8  ;;  %v1785_v42 = vld [vmem:[#allocation4 + $0x30] sm:$0xff]  ;;  %v1787_v11 = vld [vmem:[#allocation4 + $0x40] sm:$0xff] }
 0x2b6   : > { %v1675_v35 = vsel %vm1611_vm11, %v7937_v9, 0.0  ;;  %v1676_v34 = vsel %vm1612_vm12, %v7938_v59, 0.0  ;;  %1753 = vadd.xlane.f32.xlu1 %v1752_v40  ;;  %v1669_v53 = vsel %vm1605_vm13, %v7939_v2, 0.0  ;;  %v1670_v10 = vsel %vm1606_vm14, %v7940_v58, 0.0  ;;  %v1790_v40 = vld [vmem:[#allocation4 + $0x58] sm:$0xff] }
 0x2b7   : > { %v1767_v21 = vadd.f32 %v1676_v34, %v1675_v35  ;;  %v1758_v60 = vadd.f32 %v1670_v10, %v1669_v53  ;;  %v1792_v34 = vld [vmem:[#allocation4 + $0x68] sm:$0xff] }
 0x2b8   : > { %v1551_v3 = vpop.permute.xlu1 %1550  ;;  %v1542_v26 = vpop.permute.xlu0 %1541 }
 0x2b9   : > { %vm1615_vm15 = vcmp.eq.s32.totalorder %v7825_v49, %v1551_v3  ;;  %vm1616_vm0 = vcmp.eq.s32.totalorder %v7826_v37, %v1551_v3  ;;  %1768 = vadd.xlane.f32.xlu0 %v1767_v21  ;;  %vm1609_vm1 = vcmp.eq.s32.totalorder %v7825_v49, %v1542_v26  ;;  %vm1610_vm2 = vcmp.eq.s32.totalorder %v7826_v37, %v1542_v26  ;;  %v1789_v21 = vld [vmem:[#allocation4 + $0x50] sm:$0xff]  ;;  %v1791_v3 = vld [vmem:[#allocation4 + $0x60] sm:$0xff] }
 0x2ba   : > { %v1679_v18 = vsel %vm1615_vm15, %v7941_v57, 0.0  ;;  %v1680_v23 = vsel %vm1616_vm0, %v7942_v12, 0.0  ;;  %1759 = vadd.xlane.f32.xlu1 %v1758_v60  ;;  %v1673_v31 = vsel %vm1609_vm1, %v7943_v45, 0.0  ;;  %v1674_v30 = vsel %vm1610_vm2, %v7944_v29, 0.0  ;;  %v1794_v60 = vld [vmem:[#allocation4 + $0x78] sm:$0xff] }
 0x2bb   : > { %v1773_v62 = vadd.f32 %v1680_v23, %v1679_v18  ;;  %v1764_v32 = vadd.f32 %v1674_v30, %v1673_v31  ;;  %v1796_v23 = vld [vmem:[#allocation4 + $0x88] sm:$0xff] }
 0x2bc   : > { %v1548_v16 = vpop.permute.xlu0 %1547 }
 0x2bd   : > { %1774 = vadd.xlane.f32.xlu0 %v1773_v62  ;;  %vm1613_vm4 = vcmp.eq.s32.totalorder %v7825_v49, %v1548_v16  ;;  %vm1614_vm5 = vcmp.eq.s32.totalorder %v7826_v37, %v1548_v16  ;;  %v1793_v62 = vld [vmem:[#allocation4 + $0x70] sm:$0xff] }
 0x2be   : > { %1765 = vadd.xlane.f32.xlu1 %v1764_v32  ;;  %v1677_v46 = vsel %vm1613_vm4, %v7945_v47, 0.0  ;;  %v1678_v14 = vsel %vm1614_vm5, %v7946_v54, 0.0  ;;  %v1795_v32 = vld [vmem:[#allocation4 + $0x80] sm:$0xff] }
 0x2bf   : > { %v1770_v20 = vadd.f32 %v1678_v14, %v1677_v46  ;;  %v1797_v46 = vld [vmem:[#allocation4 + $0x90] sm:$0xff] }
 0x2c0   : > { %v1554_v28 = vpop.permute.xlu0 %1553 }
 0x2c1   : > { %vm1617_vm6 = vcmp.eq.s32.totalorder %v7825_v49, %v1554_v28  ;;  %vm1618_vm7 = vcmp.eq.s32.totalorder %v7826_v37, %v1554_v28  ;;  %v1781_v37 = vld [vmem:[#allocation4 + $0x10] sm:$0xff] }
 0x2c2   : > { %1771 = vadd.xlane.f32.xlu1 %v1770_v20  ;;  %v1681_v5 = vsel %vm1617_vm6, %v7947_v4, 0.0  ;;  %v1682_v24 = vsel %vm1618_vm7, %v7948_v63, 0.0  ;;  %v1799_v20 = vld [vmem:[#allocation4 + $0xa0] sm:$0xff]  ;;  %v1798_v63 = vld [vmem:[#allocation4 + $0x98] sm:$0xff] }
 0x2c3   : > { %v1776_v36 = vadd.f32 %v1682_v24, %v1681_v5  ;;  %v1801_v5 = vld [vmem:[#allocation4 + $0xb0] sm:$0xff] }
 0x2c6   : > { %1777 = vadd.xlane.f32.xlu1 %v1776_v36 }
 0x2e9   : > { %v1685_v25 = vpop.xlane.xlu1 %1684 }
 0x2ea   : > { %v1811_v61 = vadd.f32 %v1779_v41, %v1685_v25 }
 0x2ec   : > { %1843 = vst.msk [vmem:[#allocation4] sm:$0xff] %vm1329_vm3, %v1811_v61  ;;  %v1803_v61 = vld [vmem:[#allocation4 + $0xc0] sm:$0xff] }
 0x2ed   : > { %v1694_v19 = vpop.xlane.xlu1 %1693  ;;  %v1688_v0 = vpop.xlane.xlu0 %1687 }
 0x2ee   : > { %v1814_v44 = vadd.f32 %v1782_v1, %v1694_v19  ;;  %v1812_v49 = vadd.f32 %v1780_v43, %v1688_v0  ;;  %v1800_v1 = vld [vmem:[#allocation4 + $0xa8] sm:$0xff] }
 0x2f0   : > { %1846 = vst.msk [vmem:[#allocation4 + $0x18] sm:$0xff] %vm1329_vm3, %v1814_v44  ;;  %1844 = vst.msk [vmem:[#allocation4 + $0x8] sm:$0xff] %vm1329_vm3, %v1812_v49  ;;  %v1805_v49 = vld [vmem:[#allocation4 + $0xd0] sm:$0xff] }
 0x2f1   : > { %v1700_v50 = vpop.xlane.xlu1 %1699  ;;  %v1691_v17 = vpop.xlane.xlu0 %1690 }
 0x2f2   : > { %v1816_v48 = vadd.f32 %v1784_v7, %v1700_v50  ;;  %v1813_v55 = vadd.f32 %v1781_v37, %v1691_v17  ;;  %v1802_v7 = vld [vmem:[#allocation4 + $0xb8] sm:$0xff] }
 0x2f4   : > { %1848 = vst.msk [vmem:[#allocation4 + $0x28] sm:$0xff] %vm1329_vm3, %v1816_v48  ;;  %1845 = vst.msk [vmem:[#allocation4 + $0x10] sm:$0xff] %vm1329_vm3, %v1813_v55  ;;  %v1807_v55 = vld [vmem:[#allocation4 + $0xe0] sm:$0xff] }
 0x2f5   : > { %v1706_v52 = vpop.xlane.xlu1 %1705  ;;  %v1697_v27 = vpop.xlane.xlu0 %1696 }
 0x2f6   : > { %v1818_v56 = vadd.f32 %v1786_v15, %v1706_v52  ;;  %v1815_v38 = vadd.f32 %v1783_v22, %v1697_v27  ;;  %v1804_v15 = vld [vmem:[#allocation4 + $0xc8] sm:$0xff] }
 0x2f8   : > { %1850 = vst.msk [vmem:[#allocation4 + $0x38] sm:$0xff] %vm1329_vm3, %v1818_v56  ;;  %1847 = vst.msk [vmem:[#allocation4 + $0x20] sm:$0xff] %vm1329_vm3, %v1815_v38  ;;  %v1809_v38 = vld [vmem:[#allocation4 + $0xf0] sm:$0xff] }
 0x2f9   : > { %v1712_v6 = vpop.xlane.xlu1 %1711  ;;  %v1703_v51 = vpop.xlane.xlu0 %1702 }
 0x2fa   : > { %v1820_v39 = vadd.f32 %v1788_v13, %v1712_v6  ;;  %v1817_v33 = vadd.f32 %v1785_v42, %v1703_v51  ;;  %v1806_v13 = vld [vmem:[#allocation4 + $0xd8] sm:$0xff] }
 0x2fc   : > { %1852 = vst.msk [vmem:[#allocation4 + $0x48] sm:$0xff] %vm1329_vm3, %v1820_v39  ;;  %1849 = vst.msk [vmem:[#allocation4 + $0x30] sm:$0xff] %vm1329_vm3, %v1817_v33  ;;  %v1808_v33 = vld [vmem:[#allocation4 + $0xe8] sm:$0xff] }
 0x2fd   : > { %v1718_v8 = vpop.xlane.xlu1 %1717  ;;  %v1709_v35 = vpop.xlane.xlu0 %1708 }
 0x2fe   : > { %v1822_v9 = vadd.f32 %v1790_v40, %v1718_v8  ;;  %v1819_v59 = vadd.f32 %v1787_v11, %v1709_v35  ;;  %v1810_v8 = vld [vmem:[#allocation4 + $0xf8] sm:$0xff] }
 0x300   : > { %1854 = vst.msk [vmem:[#allocation4 + $0x58] sm:$0xff] %vm1329_vm3, %v1822_v9  ;;  %1851 = vst.msk [vmem:[#allocation4 + $0x40] sm:$0xff] %vm1329_vm3, %v1819_v59 }
 0x301   : > { %v1724_v2 = vpop.xlane.xlu1 %1723  ;;  %v1715_v58 = vpop.xlane.xlu0 %1714 }
 0x302   : > { %v1824_v53 = vadd.f32 %v1792_v34, %v1724_v2  ;;  %v1821_v10 = vadd.f32 %v1789_v21, %v1715_v58 }
 0x304   : > { %1856 = vst.msk [vmem:[#allocation4 + $0x68] sm:$0xff] %vm1329_vm3, %v1824_v53  ;;  %1853 = vst.msk [vmem:[#allocation4 + $0x50] sm:$0xff] %vm1329_vm3, %v1821_v10 }
 0x305   : > { %v1730_v26 = vpop.xlane.xlu1 %1729  ;;  %v1721_v18 = vpop.xlane.xlu0 %1720 }
 0x306   : > { %v1826_v57 = vadd.f32 %v1794_v60, %v1730_v26  ;;  %v1823_v12 = vadd.f32 %v1791_v3, %v1721_v18 }
 0x308   : > { %1858 = vst.msk [vmem:[#allocation4 + $0x78] sm:$0xff] %vm1329_vm3, %v1826_v57  ;;  %1855 = vst.msk [vmem:[#allocation4 + $0x60] sm:$0xff] %vm1329_vm3, %v1823_v12 }
 0x309   : > { %v1736_v45 = vpop.xlane.xlu1 %1735  ;;  %v1727_v29 = vpop.xlane.xlu0 %1726 }
 0x30a   : > { %v1828_v31 = vadd.f32 %v1796_v23, %v1736_v45  ;;  %v1825_v30 = vadd.f32 %v1793_v62, %v1727_v29 }
 0x30c   : > { %1860 = vst.msk [vmem:[#allocation4 + $0x88] sm:$0xff] %vm1329_vm3, %v1828_v31  ;;  %1857 = vst.msk [vmem:[#allocation4 + $0x70] sm:$0xff] %vm1329_vm3, %v1825_v30 }
 0x30d   : > { %v1733_v16 = vpop.xlane.xlu0 %1732 }
 0x30e   : > { %v1827_v47 = vadd.f32 %v1795_v32, %v1733_v16 }
 0x310   : > { %1859 = vst.msk [vmem:[#allocation4 + $0x80] sm:$0xff] %vm1329_vm3, %v1827_v47 }
 0x311   : > { %v1739_v54 = vpop.xlane.xlu0 %1738 }
 0x312   : > { %v1829_v14 = vadd.f32 %v1797_v46, %v1739_v54 }
 0x314   : > { %1861 = vst.msk [vmem:[#allocation4 + $0x90] sm:$0xff] %vm1329_vm3, %v1829_v14 }
 0x336   : > { %v1745_v28 = vpop.xlane.xlu0 %1744 }
 0x337   : > { %v1831_v4 = vadd.f32 %v1799_v20, %v1745_v28 }
 0x339   : > { %1863 = vst.msk [vmem:[#allocation4 + $0xa0] sm:$0xff] %vm1329_vm3, %v1831_v4 }
 0x33a   : > { %v1751_v24 = vpop.xlane.xlu0 %1750 }
 0x33b   : > { %v1742_v36 = vpop.xlane.xlu1 %1741  ;;  %v1833_v41 = vadd.f32 %v1801_v5, %v1751_v24 }
 0x33c   : > { %v1830_v25 = vadd.f32 %v1798_v63, %v1742_v36 }
 0x33d   : > { %1865 = vst.msk [vmem:[#allocation4 + $0xb0] sm:$0xff] %vm1329_vm3, %v1833_v41 }
 0x33e   : > { %1862 = vst.msk [vmem:[#allocation4 + $0x98] sm:$0xff] %vm1329_vm3, %v1830_v25  ;;  %v1757_v43 = vpop.xlane.xlu0 %1756 }
 0x33f   : > { %v1748_v19 = vpop.xlane.xlu1 %1747  ;;  %v1835_v44 = vadd.f32 %v1803_v61, %v1757_v43 }
 0x340   : > { %v1832_v0 = vadd.f32 %v1800_v1, %v1748_v19 }
 0x341   : > { %1867 = vst.msk [vmem:[#allocation4 + $0xc0] sm:$0xff] %vm1329_vm3, %v1835_v44 }
 0x342   : > { %1864 = vst.msk [vmem:[#allocation4 + $0xa8] sm:$0xff] %vm1329_vm3, %v1832_v0  ;;  %v1763_v37 = vpop.xlane.xlu0 %1762 }
 0x343   : > { %v1754_v50 = vpop.xlane.xlu1 %1753  ;;  %v1837_v48 = vadd.f32 %v1805_v49, %v1763_v37 }
 0x344   : > { %v1834_v17 = vadd.f32 %v1802_v7, %v1754_v50 }
 0x345   : > { %1869 = vst.msk [vmem:[#allocation4 + $0xd0] sm:$0xff] %vm1329_vm3, %v1837_v48 }
 0x346   : > { %1866 = vst.msk [vmem:[#allocation4 + $0xb8] sm:$0xff] %vm1329_vm3, %v1834_v17  ;;  %v1769_v22 = vpop.xlane.xlu0 %1768 }
 0x347   : > { %v1760_v52 = vpop.xlane.xlu1 %1759  ;;  %v1839_v56 = vadd.f32 %v1807_v55, %v1769_v22 }
 0x348   : > { %v1836_v27 = vadd.f32 %v1804_v15, %v1760_v52 }
 0x349   : > { %1871 = vst.msk [vmem:[#allocation4 + $0xe0] sm:$0xff] %vm1329_vm3, %v1839_v56 }
 0x34a   : > { %1868 = vst.msk [vmem:[#allocation4 + $0xc8] sm:$0xff] %vm1329_vm3, %v1836_v27  ;;  %v1775_v42 = vpop.xlane.xlu0 %1774 }
 0x34b   : > { %v1766_v6 = vpop.xlane.xlu1 %1765  ;;  %v1841_v39 = vadd.f32 %v1809_v38, %v1775_v42 }
 0x34c   : > { %v1838_v51 = vadd.f32 %v1806_v13, %v1766_v6 }
 0x34d   : > { %1873 = vst.msk [vmem:[#allocation4 + $0xf0] sm:$0xff] %vm1329_vm3, %v1841_v39 }
 0x34e   : > { %1870 = vst.msk [vmem:[#allocation4 + $0xd8] sm:$0xff] %vm1329_vm3, %v1838_v51 }
 0x34f   : > { %v1772_v40 = vpop.xlane.xlu1 %1771 }
 0x350   : > { %v1840_v11 = vadd.f32 %v1808_v33, %v1772_v40 }
 0x352   : > { %1872 = vst.msk [vmem:[#allocation4 + $0xe8] sm:$0xff] %vm1329_vm3, %v1840_v11 }
 0x353   : > { %v1778_v9 = vpop.xlane.xlu1 %1777 }
 0x354   : > { %v1842_v35 = vadd.f32 %v1810_v8, %v1778_v9 }
 0x356   : > { %1874 = vst.msk [vmem:[#allocation4 + $0xf8] sm:$0xff] %vm1329_vm3, %v1842_v35 }
 0x357 PF: > { %p1875_p13 = scmp.ne.s32.totalorder %s4468_s20, 1 }
 0x359   : > { %p1876_p1 = pnand %p1875_p13, %p285_p8 }
 0x35b   : > { %1879 = sbr.rel (%p1876_p1) target bundleno = 1568 (0x620), region = 48 }
 0x362   : > { %v6168_v59 = vld [vmem:[%s4645_s5 + $0x20] sm:$0xff]  ;;  %v6171_v34 = vld [vmem:[%s4645_s5 + $0x28] sm:$0xff]  ;;  %v6182_v58 = vld [vmem:[%s4645_s5 + $0x30] sm:$0xff]  ;;  %v4492_v1 = vmov 0   ;;  %vm2747_vm3 = vcmask 7168   ;;  %s3784_s30 = sshll.u32 %s4468_s20, 8 }
 0x363   : > { %v6174_v21 = vld [vmem:[%s4645_s5] sm:$0xff]  ;;  %v1953_v2 = vmax.f32 %v6168_v59, %v6171_v34  ;;  %v6179_v53 = vld [vmem:[%s4645_s5 + $0x8] sm:$0xff]  ;;  %v6185_v10 = vld [vmem:[%s4645_s5 + $0x38] sm:$0xff]  ;;  %4056 = vset.pattern.permute.xlu0 %v4492_v1  ;;  %4057 = vset.pattern.permute.xlu1 %v4492_v1 }
 0x364   : > { %v1947_v60 = vmax.f32 %v6174_v21, %v6179_v53  ;;  %v6190_v3 = vld [vmem:[%s4645_s5 + $0x10] sm:$0xff]  ;;  %v6193_v26 = vld [vmem:[%s4645_s5 + $0x18] sm:$0xff]  ;;  %v1956_v57 = vmax.f32 %v6182_v58, %v6185_v10  ;;  %v6206_v62 = vld [vmem:[%s4645_s5 + $0x40] sm:$0xff] }
 0x365   : > { %1954 = vmax.xlane.f32.xlu1 %v1953_v2  ;;  %v1950_v18 = vmax.f32 %v6190_v3, %v6193_v26  ;;  %v6200_v12 = vld [vmem:[%s4645_s5 + $0x50] sm:$0xff]  ;;  %v6203_v23 = vld [vmem:[%s4645_s5 + $0x58] sm:$0xff]  ;;  %v6209_v45 = vld [vmem:[%s4645_s5 + $0x48] sm:$0xff] }
 0x366   : > { %1948 = vmax.xlane.f32.xlu0 %v1947_v60  ;;  %v1962_v31 = vmax.f32 %v6200_v12, %v6203_v23  ;;  %v6214_v29 = vld [vmem:[%s4645_s5 + $0x70] sm:$0xff]  ;;  %v6217_v30 = vld [vmem:[%s4645_s5 + $0x78] sm:$0xff]  ;;  %v1959_v32 = vmax.f32 %v6206_v62, %v6209_v45  ;;  %v6222_v16 = vld [vmem:[%s4645_s5 + $0x60] sm:$0xff] }
 0x367   : > { %v6225_v47 = vld [vmem:[%s4645_s5 + $0x68] sm:$0xff]  ;;  %v1968_v46 = vmax.f32 %v6214_v29, %v6217_v30  ;;  %v6230_v54 = vld [vmem:[%s4645_s5 + $0x90] sm:$0xff]  ;;  %v6233_v14 = vld [vmem:[%s4645_s5 + $0x98] sm:$0xff] }
 0x368   : > { %v1965_v20 = vmax.f32 %v6222_v16, %v6225_v47  ;;  %v6238_v28 = vld [vmem:[%s4645_s5 + $0x80] sm:$0xff]  ;;  %v6241_v4 = vld [vmem:[%s4645_s5 + $0x88] sm:$0xff]  ;;  %v1974_v5 = vmax.f32 %v6230_v54, %v6233_v14  ;;  %v6246_v63 = vld [vmem:[%s4645_s5 + $0xb0] sm:$0xff] }
 0x369   : > { %1957 = vmax.xlane.f32.xlu1 %v1956_v57  ;;  %v6249_v24 = vld [vmem:[%s4645_s5 + $0xb8] sm:$0xff]  ;;  %v1971_v36 = vmax.f32 %v6238_v28, %v6241_v4  ;;  %v6254_v41 = vld [vmem:[%s4645_s5 + $0xa0] sm:$0xff]  ;;  %v6257_v25 = vld [vmem:[%s4645_s5 + $0xa8] sm:$0xff] }
 0x36a   : > { %1951 = vmax.xlane.f32.xlu0 %v1950_v18  ;;  %v1980_v61 = vmax.f32 %v6246_v63, %v6249_v24  ;;  %v6262_v43 = vld [vmem:[%s4645_s5 + $0xd0] sm:$0xff]  ;;  %v6265_v19 = vld [vmem:[%s4645_s5 + $0xd8] sm:$0xff]  ;;  %v1977_v44 = vmax.f32 %v6254_v41, %v6257_v25  ;;  %v6270_v0 = vld [vmem:[%s4645_s5 + $0xc0] sm:$0xff] }
 0x36b   : > { %v6273_v49 = vld [vmem:[%s4645_s5 + $0xc8] sm:$0xff]  ;;  %v1986_v7 = vmax.f32 %v6262_v43, %v6265_v19  ;;  %v6278_v37 = vld [vmem:[%s4645_s5 + $0xf0] sm:$0xff]  ;;  %v6281_v50 = vld [vmem:[%s4645_s5 + $0xf8] sm:$0xff] }
 0x36c   : > { %v1983_v48 = vmax.f32 %v6270_v0, %v6273_v49  ;;  %v6286_v17 = vld [vmem:[%s4645_s5 + $0xe0] sm:$0xff]  ;;  %v6289_v55 = vld [vmem:[%s4645_s5 + $0xe8] sm:$0xff]  ;;  %v1992_v15 = vmax.f32 %v6278_v37, %v6281_v50  ;;  %v6294_v22 = vld [vmem:[%s4645_s5 + $0x110] sm:$0xff] }
 0x36d   : > { %1963 = vmax.xlane.f32.xlu1 %v1962_v31  ;;  %v6297_v52 = vld [vmem:[%s4645_s5 + $0x118] sm:$0xff]  ;;  %v1989_v56 = vmax.f32 %v6286_v17, %v6289_v55  ;;  %v6302_v27 = vld [vmem:[%s4645_s5 + $0x100] sm:$0xff]  ;;  %v6305_v38 = vld [vmem:[%s4645_s5 + $0x108] sm:$0xff] }
 0x36e   : > { %1960 = vmax.xlane.f32.xlu0 %v1959_v32  ;;  %v1998_v13 = vmax.f32 %v6294_v22, %v6297_v52  ;;  %v6310_v42 = vld [vmem:[%s4645_s5 + $0x130] sm:$0xff]  ;;  %v6313_v6 = vld [vmem:[%s4645_s5 + $0x138] sm:$0xff]  ;;  %v1995_v39 = vmax.f32 %v6302_v27, %v6305_v38  ;;  %v6318_v51 = vld [vmem:[%s4645_s5 + $0x120] sm:$0xff] }
 0x36f   : > { %v6321_v33 = vld [vmem:[%s4645_s5 + $0x128] sm:$0xff]  ;;  %v2004_v40 = vmax.f32 %v6310_v42, %v6313_v6  ;;  %v6326_v11 = vld [vmem:[%s4645_s5 + $0x150] sm:$0xff]  ;;  %v6329_v8 = vld [vmem:[%s4645_s5 + $0x158] sm:$0xff] }
 0x370   : > { %v2001_v9 = vmax.f32 %v6318_v51, %v6321_v33  ;;  %v6334_v35 = vld [vmem:[%s4645_s5 + $0x140] sm:$0xff]  ;;  %v6337_v2 = vld [vmem:[%s4645_s5 + $0x148] sm:$0xff]  ;;  %v2010_v60 = vmax.f32 %v6326_v11, %v6329_v8  ;;  %v6342_v57 = vld [vmem:[%s4645_s5 + $0x170] sm:$0xff] }
 0x371   : > { %1969 = vmax.xlane.f32.xlu1 %v1968_v46  ;;  %7949 = vst [vmem:[#allocation116_spill] sm:$0xff] %v6334_v35  ;;  %7950 = vst [vmem:[#allocation117_spill] sm:$0xff] %v6337_v2  ;;  %v6345_v18 = vld [vmem:[%s4645_s5 + $0x178] sm:$0xff]  ;;  %v2007_v31 = vmax.f32 %v6334_v35, %v6337_v2  ;;  %v6350_v32 = vld [vmem:[%s4645_s5 + $0x160] sm:$0xff] }
 0x372   : > { %1966 = vmax.xlane.f32.xlu0 %v1965_v20  ;;  %7951 = vst [vmem:[#allocation118_spill] sm:$0xff] %v6350_v32  ;;  %v6353_v46 = vld [vmem:[%s4645_s5 + $0x168] sm:$0xff]  ;;  %v2016_v20 = vmax.f32 %v6342_v57, %v6345_v18  ;;  %v1928_v1 = vld [vmem:[%s4645_s5 + $0x180] sm:$0xff]  ;;  %v1943_v2 = vld [vmem:[%s4645_s5 + $0x1f8] sm:$0xff] }
 0x373   : > { %7952 = vst [vmem:[#allocation119_spill] sm:$0xff] %v6353_v46 }
 0x375   : > { %1975 = vmax.xlane.f32.xlu1 %v1974_v5  ;;  %v6358_v5 = vld [vmem:[%s4645_s5 + $0x190] sm:$0xff] }
 0x376   : > { %1972 = vmax.xlane.f32.xlu0 %v1971_v36  ;;  %v6361_v36 = vld [vmem:[%s4645_s5 + $0x198] sm:$0xff] }
 0x377   : > { %7953 = vst [vmem:[#allocation120_spill] sm:$0xff] %v6361_v36 }
 0x379   : > { %1981 = vmax.xlane.f32.xlu1 %v1980_v61  ;;  %v2013_v61 = vmax.f32 %v6350_v32, %v6353_v46  ;;  %v1937_v46 = vld [vmem:[%s4645_s5 + $0x1c8] sm:$0xff] }
 0x37a   : > { %1978 = vmax.xlane.f32.xlu0 %v1977_v44  ;;  %v1929_v44 = vld [vmem:[%s4645_s5 + $0x188] sm:$0xff] }
 0x37d   : > { %1987 = vmax.xlane.f32.xlu1 %v1986_v7  ;;  %v2022_v7 = vmax.f32 %v6358_v5, %v6361_v36  ;;  %v1942_v36 = vld [vmem:[%s4645_s5 + $0x1f0] sm:$0xff] }
 0x37e   : > { %1984 = vmax.xlane.f32.xlu0 %v1983_v48  ;;  %v6370_v48 = vld [vmem:[%s4645_s5 + $0x1b0] sm:$0xff]  ;;  %v2040_v35 = vmax.f32 %v1942_v36, %v1943_v2 }
 0x381   : > { %1993 = vmax.xlane.f32.xlu1 %v1992_v15  ;;  %v6373_v15 = vld [vmem:[%s4645_s5 + $0x1b8] sm:$0xff] }
 0x382   : > { %1990 = vmax.xlane.f32.xlu0 %v1989_v56  ;;  %7954 = vst [vmem:[#allocation121_spill] sm:$0xff] %v6373_v15  ;;  %v2019_v56 = vmax.f32 %v1928_v1, %v1929_v44  ;;  %v1940_v1 = vld [vmem:[%s4645_s5 + $0x1e0] sm:$0xff]  ;;  %v1941_v44 = vld [vmem:[%s4645_s5 + $0x1e8] sm:$0xff] }
 0x385   : > { %1999 = vmax.xlane.f32.xlu1 %v1998_v13  ;;  %v1932_v13 = vld [vmem:[%s4645_s5 + $0x1a0] sm:$0xff] }
 0x386   : > { %1996 = vmax.xlane.f32.xlu0 %v1995_v39  ;;  %v1933_v39 = vld [vmem:[%s4645_s5 + $0x1a8] sm:$0xff] }
 0x389   : > { %2005 = vmax.xlane.f32.xlu1 %v2004_v40  ;;  %v2028_v40 = vmax.f32 %v6370_v48, %v6373_v15  ;;  %v6387_v15 = vld [vmem:[#allocation2 + $0x10] sm:$0xff] }
 0x38a   : > { %2002 = vmax.xlane.f32.xlu0 %v2001_v9  ;;  %v1938_v9 = vld [vmem:[%s4645_s5 + $0x1d0] sm:$0xff]  ;;  %7955 = vst [vmem:[#allocation122_spill] sm:$0xff] %v6387_v15 }
 0x38d   : > { %2011 = vmax.xlane.f32.xlu1 %v2010_v60  ;;  %v1939_v60 = vld [vmem:[%s4645_s5 + $0x1d8] sm:$0xff] }
 0x38e   : > { %2008 = vmax.xlane.f32.xlu0 %v2007_v31  ;;  %v2025_v31 = vmax.f32 %v1932_v13, %v1933_v39  ;;  %v2034_v32 = vmax.f32 %v1938_v9, %v1939_v60  ;;  %v6397_v9 = vld [vmem:[#allocation2 + $0x18] sm:$0xff] }
 0x38f   : > { %7957 = vst [vmem:[#allocation124_spill] sm:$0xff] %v6397_v9 }
 0x391   : > { %2017 = vmax.xlane.f32.xlu1 %v2016_v20  ;;  %v1936_v20 = vld [vmem:[%s4645_s5 + $0x1c0] sm:$0xff] }
 0x392   : > { %2014 = vmax.xlane.f32.xlu0 %v2013_v61  ;;  %v2031_v61 = vmax.f32 %v1936_v20, %v1937_v46 }
 0x395   : > { %2023 = vmax.xlane.f32.xlu1 %v2022_v7  ;;  %v2037_v7 = vmax.f32 %v1940_v1, %v1941_v44  ;;  %v6422_v44 = vld [vmem:[#allocation2 + $0x20] sm:$0xff] }
 0x396   : > { %2020 = vmax.xlane.f32.xlu0 %v2019_v56  ;;  %v6389_v56 = vld [vmem:[#allocation2] sm:$0xff]  ;;  %7961 = vst [vmem:[#allocation128_spill] sm:$0xff] %v6422_v44 }
 0x399   : > { %2029 = vmax.xlane.f32.xlu1 %v2028_v40 }
 0x39a   : > { %2026 = vmax.xlane.f32.xlu0 %v2025_v31 }
 0x39d   : > { %2035 = vmax.xlane.f32.xlu1 %v2034_v32 }
 0x39e   : > { %2032 = vmax.xlane.f32.xlu0 %v2031_v61  ;;  %v6416_v61 = vld [vmem:[#allocation2 + $0x28] sm:$0xff] }
 0x39f   : > { %7960 = vst [vmem:[#allocation127_spill] sm:$0xff] %v6416_v61 }
 0x3a1   : > { %2041 = vmax.xlane.f32.xlu1 %v2040_v35  ;;  %v6403_v35 = vld [vmem:[#allocation2 + $0x8] sm:$0xff] }
 0x3a2   : > { %2038 = vmax.xlane.f32.xlu0 %v2037_v7  ;;  %v6441_v7 = vld [vmem:[#allocation2 + $0x30] sm:$0xff] }
 0x3a3   : > { %7965 = vst [vmem:[#allocation132_spill] sm:$0xff] %v6441_v7 }
 0x3f2   : > { %v1955_v13 = vpop.xlane.xlu1 %1954 }
 0x3f3   : > { %v6392_v39 = vmax.f32 %v6387_v15, %v1955_v13  ;;  %v1949_v40 = vpop.xlane.xlu0 %1948  ;;  %v6451_v15 = vld [vmem:[#allocation2 + $0x48] sm:$0xff] }
 0x3f4   : > { %v6395_v46 = vmax.f32 %v6389_v56, %v1949_v40  ;;  %7967 = vst [vmem:[#allocation134_spill] sm:$0xff] %v6451_v15 }
 0x3f5   : > { %7956 = vst [vmem:[#allocation123_spill] sm:$0xff] %v6392_v39  ;;  %2782 = vst.msk [vmem:[#allocation2 + $0x10] sm:$0xff] %vm2747_vm3, %v6392_v39 }
 0x3f6   : > { %2780 = vst.msk [vmem:[#allocation2] sm:$0xff] %vm2747_vm3, %v6395_v46  ;;  %2205 = vperm.xlu0 %4056, %v6395_v46   ;;  %v1958_v36 = vpop.xlane.xlu1 %1957 }
 0x3f7   : > { %v6411_v60 = vmax.f32 %v6397_v9, %v1958_v36  ;;  %v1952_v31 = vpop.xlane.xlu0 %1951 }
 0x3f8   : > { %v6414_v20 = vmax.f32 %v6403_v35, %v1952_v31  ;;  %v6432_v31 = vld [vmem:[#allocation2 + $0x38] sm:$0xff] }
 0x3f9   : > { %7958 = vst [vmem:[#allocation125_spill] sm:$0xff] %v6411_v60  ;;  %2783 = vst.msk [vmem:[#allocation2 + $0x18] sm:$0xff] %vm2747_vm3, %v6411_v60 }
 0x3fa   : > { %7959 = vst [vmem:[#allocation126_spill] sm:$0xff] %v6414_v20  ;;  %2781 = vst.msk [vmem:[#allocation2 + $0x8] sm:$0xff] %vm2747_vm3, %v6414_v20  ;;  %2210 = vperm.xlu1 %4057, %v6414_v20   ;;  %v1964_v13 = vpop.xlane.xlu1 %1963  ;;  %v6470_v20 = vld [vmem:[#allocation2 + $0x58] sm:$0xff] }
 0x3fb   : > { %v6430_v40 = vmax.f32 %v6416_v61, %v1964_v13  ;;  %v1961_v36 = vpop.xlane.xlu0 %1960  ;;  %7963 = vst [vmem:[#allocation130_spill] sm:$0xff] %v6432_v31  ;;  %7971 = vst [vmem:[#allocation138_spill] sm:$0xff] %v6470_v20 }
 0x3fc   : > { %v6435_v1 = vmax.f32 %v6422_v44, %v1961_v36 }
 0x3fd   : > { %7962 = vst [vmem:[#allocation129_spill] sm:$0xff] %v6430_v40  ;;  %2785 = vst.msk [vmem:[#allocation2 + $0x28] sm:$0xff] %vm2747_vm3, %v6430_v40 }
 0x3fe   : > { %7964 = vst [vmem:[#allocation131_spill] sm:$0xff] %v6435_v1  ;;  %2215 = vperm.xlu1 %4057, %v6392_v39   ;;  %v1970_v32 = vpop.xlane.xlu1 %1969  ;;  %2784 = vst.msk [vmem:[#allocation2 + $0x20] sm:$0xff] %vm2747_vm3, %v6435_v1  ;;  %v6460_v39 = vld [vmem:[#allocation2 + $0x40] sm:$0xff] }
 0x3ff   : > { %v6449_v36 = vmax.f32 %v6432_v31, %v1970_v32  ;;  %v1967_v9 = vpop.xlane.xlu0 %1966  ;;  %7969 = vst [vmem:[#allocation136_spill] sm:$0xff] %v6460_v39  ;;  %v6480_v32 = vld [vmem:[#allocation2 + $0x50] sm:$0xff] }
 0x400   : > { %v6454_v2 = vmax.f32 %v6441_v7, %v1967_v9  ;;  %7973 = vst [vmem:[#allocation140_spill] sm:$0xff] %v6480_v32  ;;  %v6500_v7 = vld [vmem:[#allocation2 + $0x60] sm:$0xff] }
 0x401   : > { %7966 = vst [vmem:[#allocation133_spill] sm:$0xff] %v6449_v36  ;;  %2787 = vst.msk [vmem:[#allocation2 + $0x38] sm:$0xff] %vm2747_vm3, %v6449_v36 }
 0x402   : > { %7968 = vst [vmem:[#allocation135_spill] sm:$0xff] %v6454_v2  ;;  %2220 = vperm.xlu1 %4057, %v6411_v60   ;;  %v1976_v13 = vpop.xlane.xlu1 %1975  ;;  %2786 = vst.msk [vmem:[#allocation2 + $0x30] sm:$0xff] %vm2747_vm3, %v6454_v2 }
 0x403   : > { %v6468_v9 = vmax.f32 %v6451_v15, %v1976_v13  ;;  %v1973_v44 = vpop.xlane.xlu0 %1972  ;;  %v6490_v15 = vld [vmem:[#allocation2 + $0x68] sm:$0xff]  ;;  %7977 = vst [vmem:[#allocation144_spill] sm:$0xff] %v6500_v7 }
 0x404   : > { %v6473_v61 = vmax.f32 %v6460_v39, %v1973_v44  ;;  %7975 = vst [vmem:[#allocation142_spill] sm:$0xff] %v6490_v15  ;;  %v6520_v39 = vld [vmem:[#allocation2 + $0x70] sm:$0xff] }
 0x405   : > { %7970 = vst [vmem:[#allocation137_spill] sm:$0xff] %v6468_v9  ;;  %2789 = vst.msk [vmem:[#allocation2 + $0x48] sm:$0xff] %vm2747_vm3, %v6468_v9  ;;  %2250 = vperm.xlu0 %4056, %v6468_v9  }
 0x406   : > { %7972 = vst [vmem:[#allocation139_spill] sm:$0xff] %v6473_v61  ;;  %2225 = vperm.xlu1 %4057, %v6435_v1   ;;  %v1982_v13 = vpop.xlane.xlu1 %1981  ;;  %2788 = vst.msk [vmem:[#allocation2 + $0x40] sm:$0xff] %vm2747_vm3, %v6473_v61 }
 0x407   : > { %v6488_v44 = vmax.f32 %v6470_v20, %v1982_v13  ;;  %v1979_v31 = vpop.xlane.xlu0 %1978  ;;  %v6510_v20 = vld [vmem:[#allocation2 + $0x78] sm:$0xff]  ;;  %7981 = vst [vmem:[#allocation148_spill] sm:$0xff] %v6520_v39 }
 0x408   : > { %v6493_v60 = vmax.f32 %v6480_v32, %v1979_v31  ;;  %7979 = vst [vmem:[#allocation146_spill] sm:$0xff] %v6510_v20  ;;  %v6540_v32 = vld [vmem:[#allocation2 + $0x80] sm:$0xff] }
 0x409   : > { %7974 = vst [vmem:[#allocation141_spill] sm:$0xff] %v6488_v44  ;;  %2791 = vst.msk [vmem:[#allocation2 + $0x58] sm:$0xff] %vm2747_vm3, %v6488_v44  ;;  %2260 = vperm.xlu0 %4056, %v6488_v44  }
 0x40a   : > { %7976 = vst [vmem:[#allocation143_spill] sm:$0xff] %v6493_v60  ;;  %2230 = vperm.xlu1 %4057, %v6430_v40   ;;  %v1988_v13 = vpop.xlane.xlu1 %1987  ;;  %2790 = vst.msk [vmem:[#allocation2 + $0x50] sm:$0xff] %vm2747_vm3, %v6493_v60 }
 0x40b   : > { %v6508_v31 = vmax.f32 %v6490_v15, %v1988_v13  ;;  %v1985_v9 = vpop.xlane.xlu0 %1984  ;;  %v6530_v15 = vld [vmem:[#allocation2 + $0x88] sm:$0xff]  ;;  %7985 = vst [vmem:[#allocation152_spill] sm:$0xff] %v6540_v32 }
 0x40c   : > { %v6513_v1 = vmax.f32 %v6500_v7, %v1985_v9  ;;  %7983 = vst [vmem:[#allocation150_spill] sm:$0xff] %v6530_v15  ;;  %v6560_v7 = vld [vmem:[#allocation2 + $0x90] sm:$0xff] }
 0x40d   : > { %7978 = vst [vmem:[#allocation145_spill] sm:$0xff] %v6508_v31  ;;  %2793 = vst.msk [vmem:[#allocation2 + $0x68] sm:$0xff] %vm2747_vm3, %v6508_v31  ;;  %2270 = vperm.xlu0 %4056, %v6508_v31  }
 0x40e   : > { %7980 = vst [vmem:[#allocation147_spill] sm:$0xff] %v6513_v1  ;;  %2235 = vperm.xlu1 %4057, %v6454_v2   ;;  %v1994_v13 = vpop.xlane.xlu1 %1993  ;;  %2792 = vst.msk [vmem:[#allocation2 + $0x60] sm:$0xff] %vm2747_vm3, %v6513_v1 }
 0x40f   : > { %v6528_v9 = vmax.f32 %v6510_v20, %v1994_v13  ;;  %v1991_v44 = vpop.xlane.xlu0 %1990  ;;  %v6550_v20 = vld [vmem:[#allocation2 + $0x98] sm:$0xff]  ;;  %7989 = vst [vmem:[#allocation156_spill] sm:$0xff] %v6560_v7 }
 0x410   : > { %v6533_v40 = vmax.f32 %v6520_v39, %v1991_v44  ;;  %7987 = vst [vmem:[#allocation154_spill] sm:$0xff] %v6550_v20  ;;  %v6580_v39 = vld [vmem:[#allocation2 + $0xa0] sm:$0xff] }
 0x411   : > { %7982 = vst [vmem:[#allocation149_spill] sm:$0xff] %v6528_v9  ;;  %2795 = vst.msk [vmem:[#allocation2 + $0x78] sm:$0xff] %vm2747_vm3, %v6528_v9  ;;  %2280 = vperm.xlu0 %4056, %v6528_v9  }
 0x412   : > { %7984 = vst [vmem:[#allocation151_spill] sm:$0xff] %v6533_v40  ;;  %2240 = vperm.xlu1 %4057, %v6449_v36   ;;  %v2000_v13 = vpop.xlane.xlu1 %1999  ;;  %2794 = vst.msk [vmem:[#allocation2 + $0x70] sm:$0xff] %vm2747_vm3, %v6533_v40 }
 0x413   : > { %v6548_v44 = vmax.f32 %v6530_v15, %v2000_v13  ;;  %v1997_v31 = vpop.xlane.xlu0 %1996  ;;  %v6570_v15 = vld [vmem:[#allocation2 + $0xa8] sm:$0xff]  ;;  %7993 = vst [vmem:[#allocation160_spill] sm:$0xff] %v6580_v39 }
 0x414   : > { %v6553_v2 = vmax.f32 %v6540_v32, %v1997_v31  ;;  %7991 = vst [vmem:[#allocation158_spill] sm:$0xff] %v6570_v15  ;;  %v6600_v32 = vld [vmem:[#allocation2 + $0xb0] sm:$0xff] }
 0x415   : > { %7986 = vst [vmem:[#allocation153_spill] sm:$0xff] %v6548_v44  ;;  %2797 = vst.msk [vmem:[#allocation2 + $0x88] sm:$0xff] %vm2747_vm3, %v6548_v44  ;;  %2290 = vperm.xlu0 %4056, %v6548_v44  }
 0x416   : > { %7988 = vst [vmem:[#allocation155_spill] sm:$0xff] %v6553_v2  ;;  %2245 = vperm.xlu1 %4057, %v6473_v61   ;;  %v2006_v13 = vpop.xlane.xlu1 %2005  ;;  %2796 = vst.msk [vmem:[#allocation2 + $0x80] sm:$0xff] %vm2747_vm3, %v6553_v2 }
 0x417   : > { %v6568_v31 = vmax.f32 %v6550_v20, %v2006_v13  ;;  %v2003_v9 = vpop.xlane.xlu0 %2002  ;;  %v6590_v20 = vld [vmem:[#allocation2 + $0xb8] sm:$0xff]  ;;  %7997 = vst [vmem:[#allocation164_spill] sm:$0xff] %v6600_v32 }
 0x418   : > { %v6573_v36 = vmax.f32 %v6560_v7, %v2003_v9  ;;  %7995 = vst [vmem:[#allocation162_spill] sm:$0xff] %v6590_v20  ;;  %v6620_v7 = vld [vmem:[#allocation2 + $0xc0] sm:$0xff] }
 0x419   : > { %7990 = vst [vmem:[#allocation157_spill] sm:$0xff] %v6568_v31  ;;  %2799 = vst.msk [vmem:[#allocation2 + $0x98] sm:$0xff] %vm2747_vm3, %v6568_v31  ;;  %2300 = vperm.xlu0 %4056, %v6568_v31  }
 0x41a   : > { %7992 = vst [vmem:[#allocation159_spill] sm:$0xff] %v6573_v36  ;;  %2255 = vperm.xlu1 %4057, %v6493_v60   ;;  %v2012_v13 = vpop.xlane.xlu1 %2011  ;;  %2798 = vst.msk [vmem:[#allocation2 + $0x90] sm:$0xff] %vm2747_vm3, %v6573_v36 }
 0x41b   : > { %v6588_v9 = vmax.f32 %v6570_v15, %v2012_v13  ;;  %v2009_v44 = vpop.xlane.xlu0 %2008  ;;  %v6610_v15 = vld [vmem:[#allocation2 + $0xc8] sm:$0xff]  ;;  %8000 = vst [vmem:[#allocation167_spill] sm:$0xff] %v6620_v7 }
 0x41c   : > { %v6593_v61 = vmax.f32 %v6580_v39, %v2009_v44  ;;  %7999 = vst [vmem:[#allocation166_spill] sm:$0xff] %v6610_v15  ;;  %v6640_v39 = vld [vmem:[#allocation2 + $0xd0] sm:$0xff] }
 0x41d   : > { %7994 = vst [vmem:[#allocation161_spill] sm:$0xff] %v6588_v9  ;;  %2801 = vst.msk [vmem:[#allocation2 + $0xa8] sm:$0xff] %vm2747_vm3, %v6588_v9  ;;  %2310 = vperm.xlu0 %4056, %v6588_v9  }
 0x41e   : > { %7996 = vst [vmem:[#allocation163_spill] sm:$0xff] %v6593_v61  ;;  %2265 = vperm.xlu1 %4057, %v6513_v1   ;;  %v2018_v13 = vpop.xlane.xlu1 %2017  ;;  %2800 = vst.msk [vmem:[#allocation2 + $0xa0] sm:$0xff] %vm2747_vm3, %v6593_v61 }
 0x41f   : > { %v6608_v44 = vmax.f32 %v6590_v20, %v2018_v13  ;;  %v2015_v31 = vpop.xlane.xlu0 %2014  ;;  %v6630_v20 = vld [vmem:[#allocation2 + $0xd8] sm:$0xff]  ;;  %8004 = vst [vmem:[#allocation171_spill] sm:$0xff] %v6640_v39 }
 0x420   : > { %v6613_v60 = vmax.f32 %v6600_v32, %v2015_v31  ;;  %8002 = vst [vmem:[#allocation169_spill] sm:$0xff] %v6630_v20  ;;  %v6660_v32 = vld [vmem:[#allocation2 + $0xe0] sm:$0xff] }
 0x421   : > { %7998 = vst [vmem:[#allocation165_spill] sm:$0xff] %v6608_v44  ;;  %2803 = vst.msk [vmem:[#allocation2 + $0xb8] sm:$0xff] %vm2747_vm3, %v6608_v44  ;;  %2320 = vperm.xlu0 %4056, %v6608_v44  }
 0x422   : > { %2275 = vperm.xlu1 %4057, %v6533_v40   ;;  %v2024_v13 = vpop.xlane.xlu1 %2023  ;;  %2802 = vst.msk [vmem:[#allocation2 + $0xb0] sm:$0xff] %vm2747_vm3, %v6613_v60  ;;  %8008 = vst [vmem:[#allocation175_spill] sm:$0xff] %v6660_v32  ;;  %v6685_v40 = vstv %s3784_s30 }
 0x423   : > { %v6628_v31 = vmax.f32 %v6610_v15, %v2024_v13  ;;  %v2021_v9 = vpop.xlane.xlu0 %2020  ;;  %v6650_v15 = vld [vmem:[#allocation2 + $0xe8] sm:$0xff] }
 0x424   : > { %v6633_v1 = vmax.f32 %v6620_v7, %v2021_v9  ;;  %8006 = vst [vmem:[#allocation173_spill] sm:$0xff] %v6650_v15  ;;  %v6681_v7 = vld [vmem:[#allocation2 + $0xf0] sm:$0xff] }
 0x425   : > { %8001 = vst [vmem:[#allocation168_spill] sm:$0xff] %v6628_v31  ;;  %2805 = vst.msk [vmem:[#allocation2 + $0xc8] sm:$0xff] %vm2747_vm3, %v6628_v31  ;;  %2330 = vperm.xlu0 %4056, %v6628_v31  }
 0x426   : > { %8003 = vst [vmem:[#allocation170_spill] sm:$0xff] %v6633_v1  ;;  %2285 = vperm.xlu1 %4057, %v6553_v2   ;;  %v2030_v13 = vpop.xlane.xlu1 %2029  ;;  %2804 = vst.msk [vmem:[#allocation2 + $0xc0] sm:$0xff] %vm2747_vm3, %v6633_v1 }
 0x427   : > { %v6648_v9 = vmax.f32 %v6630_v20, %v2030_v13  ;;  %v2027_v44 = vpop.xlane.xlu0 %2026  ;;  %v6671_v20 = vld [vmem:[#allocation2 + $0xf8] sm:$0xff]  ;;  %8012 = vst [vmem:[#allocation179_spill] sm:$0xff] %v6681_v7 }
 0x428   : > { %v6653_v31 = vmax.f32 %v6640_v39, %v2027_v44  ;;  %8010 = vst [vmem:[#allocation177_spill] sm:$0xff] %v6671_v20  ;;  %v2812_v39 = vld [vmem:[%s4658_s12] sm:$0xff] }
 0x429   : > { %8005 = vst [vmem:[#allocation172_spill] sm:$0xff] %v6648_v9  ;;  %2807 = vst.msk [vmem:[#allocation2 + $0xd8] sm:$0xff] %vm2747_vm3, %v6648_v9  ;;  %2340 = vperm.xlu0 %4056, %v6648_v9  }
 0x42a   : > { %8007 = vst [vmem:[#allocation174_spill] sm:$0xff] %v6653_v31  ;;  %2295 = vperm.xlu1 %4057, %v6573_v36   ;;  %v2036_v13 = vpop.xlane.xlu1 %2035  ;;  %2806 = vst.msk [vmem:[#allocation2 + $0xd0] sm:$0xff] %vm2747_vm3, %v6653_v31 }
 0x42b   : > { %v6668_v44 = vmax.f32 %v6650_v15, %v2036_v13  ;;  %v2033_v2 = vpop.xlane.xlu0 %2032 }
 0x42c   : > { %v6674_v9 = vmax.f32 %v6660_v32, %v2033_v2  ;;  %v2846_v2 = vsub.s32 %v2812_v39, %v6685_v40  ;;  %v2814_v32 = vld [vmem:[%s4658_s12 + $0x10] sm:$0xff] }
 0x42d   : > { %8009 = vst [vmem:[#allocation176_spill] sm:$0xff] %v6668_v44  ;;  %2809 = vst.msk [vmem:[#allocation2 + $0xe8] sm:$0xff] %vm2747_vm3, %v6668_v44  ;;  %2350 = vperm.xlu0 %4056, %v6668_v44  }
 0x42e   : > { %8011 = vst [vmem:[#allocation178_spill] sm:$0xff] %v6674_v9  ;;  %2305 = vperm.xlu1 %4057, %v6593_v61   ;;  %v2042_v13 = vpop.xlane.xlu1 %2041  ;;  %2808 = vst.msk [vmem:[#allocation2 + $0xe0] sm:$0xff] %vm2747_vm3, %v6674_v9 }
 0x42f   : > { %v6692_v36 = vmax.f32 %v6671_v20, %v2042_v13  ;;  %v2039_v44 = vpop.xlane.xlu0 %2038  ;;  %v2815_v13 = vld [vmem:[%s4658_s12 + $0x18] sm:$0xff] }
 0x430   : > { %v6695_v15 = vmax.f32 %v6681_v7, %v2039_v44  ;;  %v2849_v61 = vsub.s32 %v2815_v13, %v6685_v40  ;;  %v2819_v20 = vld [vmem:[%s4658_s12 + $0x38] sm:$0xff]  ;;  %v2813_v13 = vld [vmem:[%s4658_s12 + $0x8] sm:$0xff] }
 0x431   : > { %8013 = vst [vmem:[#allocation180_spill] sm:$0xff] %v6692_v36  ;;  %2811 = vst.msk [vmem:[#allocation2 + $0xf8] sm:$0xff] %vm2747_vm3, %v6692_v36  ;;  %2360 = vperm.xlu0 %4056, %v6692_v36   ;;  %v2817_v36 = vld [vmem:[%s4658_s12 + $0x28] sm:$0xff]  ;;  %v2853_v44 = vsub.s32 %v2819_v20, %v6685_v40  ;;  %v2848_v20 = vsub.s32 %v2814_v32, %v6685_v40  ;;  %v2822_v32 = vld [vmem:[%s4658_s12 + $0x50] sm:$0xff] }
 0x432   : > { %8014 = vst [vmem:[#allocation181_spill] sm:$0xff] %v6695_v15  ;;  %2315 = vperm.xlu1 %4057, %v6613_v60   ;;  %2810 = vst.msk [vmem:[#allocation2 + $0xf0] sm:$0xff] %vm2747_vm3, %v6695_v15  ;;  %v2851_v39 = vsub.s32 %v2817_v36, %v6685_v40  ;;  %v2823_v36 = vld [vmem:[%s4658_s12 + $0x58] sm:$0xff] }
 0x435   : > { %2879 = vperm.xlu0 %4056, %v2846_v2   ;;  %v2821_v2 = vld [vmem:[%s4658_s12 + $0x48] sm:$0xff] }
 0x436   : > { %2325 = vperm.xlu1 %4057, %v6633_v1   ;;  %v2855_v7 = vsub.s32 %v2821_v2, %v6685_v40 }
 0x439   : > { %2888 = vperm.xlu0 %4056, %v2849_v61   ;;  %v2847_v61 = vsub.s32 %v2813_v13, %v6685_v40 }
 0x43a   : > { %2335 = vperm.xlu1 %4057, %v6653_v31   ;;  %v2856_v31 = vsub.s32 %v2822_v32, %v6685_v40 }
 0x43d   : > { %2894 = vperm.xlu0 %4056, %v2851_v39   ;;  %v2857_v39 = vsub.s32 %v2823_v36, %v6685_v40  ;;  %v2820_v36 = vld [vmem:[%s4658_s12 + $0x40] sm:$0xff] }
 0x43e   : > { %2345 = vperm.xlu1 %4057, %v6674_v9   ;;  %v2825_v9 = vld [vmem:[%s4658_s12 + $0x68] sm:$0xff] }
 0x43f   : > { %v2859_v2 = vsub.s32 %v2825_v9, %v6685_v40 }
 0x441   : > { %2900 = vperm.xlu0 %4056, %v2853_v44   ;;  %v2816_v44 = vld [vmem:[%s4658_s12 + $0x20] sm:$0xff] }
 0x442   : > { %2355 = vperm.xlu1 %4057, %v6695_v15   ;;  %v2850_v13 = vsub.s32 %v2816_v44, %v6685_v40  ;;  %v2818_v15 = vld [vmem:[%s4658_s12 + $0x30] sm:$0xff] }
 0x445   : > { %2906 = vperm.xlu0 %4056, %v2855_v7   ;;  %v2852_v7 = vsub.s32 %v2818_v15, %v6685_v40 }
 0x446   : > { %2882 = vperm.xlu1 %4057, %v2847_v61   ;;  %v2854_v61 = vsub.s32 %v2820_v36, %v6685_v40 }
 0x449   : > { %2912 = vperm.xlu0 %4056, %v2857_v39   ;;  %v2824_v39 = vld [vmem:[%s4658_s12 + $0x60] sm:$0xff] }
 0x44a   : > { %2885 = vperm.xlu1 %4057, %v2848_v20   ;;  %v2858_v9 = vsub.s32 %v2824_v39, %v6685_v40  ;;  %v2826_v20 = vld [vmem:[%s4658_s12 + $0x70] sm:$0xff] }
 0x44b   : > { %v2860_v44 = vsub.s32 %v2826_v20, %v6685_v40 }
 0x44d   : > { %2918 = vperm.xlu0 %4056, %v2859_v2  }
 0x44e   : > { %2891 = vperm.xlu1 %4057, %v2850_v13  }
 0x452   : > { %2897 = vperm.xlu1 %4057, %v2852_v7  }
 0x456   : > { %2903 = vperm.xlu1 %4057, %v2854_v61  }
 0x45a   : > { %2909 = vperm.xlu1 %4057, %v2856_v31  }
 0x45e   : > { %2915 = vperm.xlu1 %4057, %v2858_v9  }
 0x462   : > { %2921 = vperm.xlu1 %4057, %v2860_v44  }
 0x475   : > { %v2206_v2 = vpop.permute.xlu0 %2205 }
 0x476   : > { %v2363_v15 = vsub.f32 %v6174_v21, %v2206_v2  ;;  %v2364_v13 = vsub.f32 %v6179_v53, %v2206_v2 }
 0x478   : > { %v2427_v7 = vmul.f32 1.442695, %v2363_v15  ;;  %v2429_v36 = vmul.f32 1.442695, %v2364_v13 }
 0x479   : > { %v2211_v1 = vpop.permute.xlu1 %2210 }
 0x47a   : > { %4058 = vpow2.f32 %v2427_v7  ;;  %v2365_v61 = vsub.f32 %v6190_v3, %v2211_v1  ;;  %v2366_v31 = vsub.f32 %v6193_v26, %v2211_v1 }
 0x47b   : > { %4060 = vpow2.f32 %v2429_v36 }
 0x47c   : > { %v2431_v32 = vmul.f32 1.442695, %v2365_v61  ;;  %v2433_v39 = vmul.f32 1.442695, %v2366_v31 }
 0x47d   : > { %v2216_v9 = vpop.permute.xlu1 %2215 }
 0x47e   : > { %4062 = vpow2.f32 %v2431_v32  ;;  %v2367_v20 = vsub.f32 %v6168_v59, %v2216_v9  ;;  %v2368_v44 = vsub.f32 %v6171_v34, %v2216_v9 }
 0x47f   : > { %4064 = vpow2.f32 %v2433_v39 }
 0x480   : > { %v2435_v21 = vmul.f32 1.442695, %v2367_v20  ;;  %v2437_v53 = vmul.f32 1.442695, %v2368_v44 }
 0x481   : > { %v2221_v2 = vpop.permute.xlu1 %2220 }
 0x482   : > { %4066 = vpow2.f32 %v2435_v21  ;;  %v2369_v15 = vsub.f32 %v6182_v58, %v2221_v2  ;;  %v2370_v3 = vsub.f32 %v6185_v10, %v2221_v2 }
 0x483   : > { %4068 = vpow2.f32 %v2437_v53 }
 0x484   : > { %v4059_v26 = vpop.eup %4058  ;;  %v2439_v1 = vmul.f32 1.442695, %v2369_v15  ;;  %v2441_v13 = vmul.f32 1.442695, %v2370_v3  ;;  %v2251_v7 = vpop.permute.xlu0 %2250 }
 0x485   : > { %v4061_v36 = vpop.eup %4060  ;;  %v2226_v61 = vpop.permute.xlu1 %2225 }
 0x486   : > { %4070 = vpow2.f32 %v2439_v1  ;;  %v2371_v59 = vsub.f32 %v6206_v62, %v2226_v61  ;;  %v2372_v34 = vsub.f32 %v6209_v45, %v2226_v61  ;;  %v2619_v31 = vadd.f32 %v4061_v36, %v4059_v26 }
 0x487   : > { %4072 = vpow2.f32 %v2441_v13  ;;  %v2381_v26 = vsub.f32 %v6230_v54, %v2251_v7 }
 0x488   : > { %v4063_v32 = vpop.eup %4062  ;;  %v2443_v39 = vmul.f32 1.442695, %v2371_v59  ;;  %v2445_v9 = vmul.f32 1.442695, %v2372_v34  ;;  %2620 = vadd.xlane.f32.xlu1 %v2619_v31  ;;  %v2261_v58 = vpop.permute.xlu0 %2260 }
 0x489   : > { %v4065_v10 = vpop.eup %4064  ;;  %v2231_v20 = vpop.permute.xlu1 %2230  ;;  %v2385_v54 = vsub.f32 %v6246_v63, %v2261_v58 }
 0x48a   : > { %4074 = vpow2.f32 %v2443_v39  ;;  %v2373_v44 = vsub.f32 %v6200_v12, %v2231_v20  ;;  %v2374_v21 = vsub.f32 %v6203_v23, %v2231_v20  ;;  %v2622_v53 = vadd.f32 %v4065_v10, %v4063_v32 }
 0x48b   : > { %4076 = vpow2.f32 %v2445_v9  ;;  %v2382_v23 = vsub.f32 %v6233_v14, %v2251_v7  ;;  %v2463_v39 = vmul.f32 1.442695, %v2381_v26  ;;  %v2386_v20 = vsub.f32 %v6249_v24, %v2261_v58 }
 0x48c   : > { %v4067_v2 = vpop.eup %4066  ;;  %v2447_v62 = vmul.f32 1.442695, %v2373_v44  ;;  %v2449_v15 = vmul.f32 1.442695, %v2374_v21  ;;  %2623 = vadd.xlane.f32.xlu0 %v2622_v53  ;;  %v2271_v45 = vpop.permute.xlu0 %2270  ;;  %v2471_v63 = vmul.f32 1.442695, %v2385_v54 }
 0x48d   : > { %v4069_v3 = vpop.eup %4068  ;;  %v2236_v1 = vpop.permute.xlu1 %2235  ;;  %v2465_v7 = vmul.f32 1.442695, %v2382_v23  ;;  %v2473_v58 = vmul.f32 1.442695, %v2386_v20  ;;  %v2390_v26 = vsub.f32 %v6265_v19, %v2271_v45 }
 0x48e   : > { %4078 = vpow2.f32 %v2447_v62  ;;  %v2375_v13 = vsub.f32 %v6222_v16, %v2236_v1  ;;  %v2376_v36 = vsub.f32 %v6225_v47, %v2236_v1  ;;  %v2625_v61 = vadd.f32 %v4069_v3, %v4067_v2 }
 0x48f   : > { %4080 = vpow2.f32 %v2449_v15  ;;  %v2389_v62 = vsub.f32 %v6262_v43, %v2271_v45 }
 0x490   : > { %v4071_v12 = vpop.eup %4070  ;;  %v2451_v59 = vmul.f32 1.442695, %v2375_v13  ;;  %v2453_v34 = vmul.f32 1.442695, %v2376_v36  ;;  %2626 = vadd.xlane.f32.xlu0 %v2625_v61  ;;  %v6756_v31 = vpop.permute.xlu0 %2280 }
 0x491   : > { %v4073_v32 = vpop.eup %4072  ;;  %v2241_v9 = vpop.permute.xlu1 %2240  ;;  %v2479_v43 = vmul.f32 1.442695, %v2389_v62  ;;  %v2394_v19 = vsub.f32 %v6281_v50, %v6756_v31 }
 0x492   : > { %4082 = vpow2.f32 %v2451_v59  ;;  %v2377_v16 = vsub.f32 %v6214_v29, %v2241_v9  ;;  %v2378_v47 = vsub.f32 %v6217_v30, %v2241_v9  ;;  %v2628_v10 = vadd.f32 %v4073_v32, %v4071_v12 }
 0x493   : > { %4084 = vpow2.f32 %v2453_v34  ;;  %v2481_v34 = vmul.f32 1.442695, %v2390_v26 }
 0x494   : > { %v4075_v14 = vpop.eup %4074  ;;  %v2455_v44 = vmul.f32 1.442695, %v2377_v16  ;;  %v2457_v21 = vmul.f32 1.442695, %v2378_v47  ;;  %2629 = vadd.xlane.f32.xlu1 %v2628_v10  ;;  %v6762_v53 = vpop.permute.xlu0 %2290  ;;  %4086 = vpow2.f32 %v2463_v39  ;;  %v2489_v10 = vmul.f32 1.442695, %v2394_v19 }
 0x495   : > { %v4077_v2 = vpop.eup %4076  ;;  %v2246_v15 = vpop.permute.xlu1 %2245 }
 0x496   : > { %4088 = vpow2.f32 %v2455_v44  ;;  %v2379_v29 = vsub.f32 %v6238_v28, %v2246_v15  ;;  %v2380_v30 = vsub.f32 %v6241_v4, %v2246_v15  ;;  %v2631_v24 = vadd.f32 %v4077_v2, %v4075_v14 }
 0x497   : > { %4090 = vpow2.f32 %v2457_v21  ;;  %v2393_v28 = vsub.f32 %v6278_v37, %v6756_v31  ;;  %v2398_v14 = vsub.f32 %v6297_v52, %v6762_v53 }
 0x498   : > { %v4079_v3 = vpop.eup %4078  ;;  %4092 = vpow2.f32 %v2465_v7  ;;  %v2459_v1 = vmul.f32 1.442695, %v2379_v29  ;;  %v2461_v13 = vmul.f32 1.442695, %v2380_v30  ;;  %2632 = vadd.xlane.f32.xlu0 %v2631_v24  ;;  %v6768_v36 = vpop.permute.xlu0 %2300 }
 0x499   : > { %v4081_v61 = vpop.eup %4080  ;;  %4094 = vpow2.f32 %v2471_v63  ;;  %v2256_v12 = vpop.permute.xlu1 %2255  ;;  %v2487_v9 = vmul.f32 1.442695, %v2393_v28  ;;  %v2497_v24 = vmul.f32 1.442695, %v2398_v14 }
 0x49a   : > { %4096 = vpow2.f32 %v2459_v1  ;;  %v2383_v4 = vsub.f32 %v6254_v41, %v2256_v12  ;;  %v2384_v23 = vsub.f32 %v6257_v25, %v2256_v12  ;;  %v2634_v59 = vadd.f32 %v4081_v61, %v4079_v3 }
 0x49b   : > { %4098 = vpow2.f32 %v2461_v13  ;;  %v2397_v41 = vsub.f32 %v6294_v22, %v6762_v53  ;;  %v2402_v53 = vsub.f32 %v6313_v6, %v6768_v36 }
 0x49c   : > { %v4083_v45 = vpop.eup %4082  ;;  %4100 = vpow2.f32 %v2473_v58  ;;  %v2467_v32 = vmul.f32 1.442695, %v2383_v4  ;;  %v2469_v39 = vmul.f32 1.442695, %v2384_v23  ;;  %2635 = vadd.xlane.f32.xlu1 %v2634_v59  ;;  %v6776_v54 = vpop.permute.xlu0 %2310 }
 0x49d   : > { %v4085_v37 = vpop.eup %4084  ;;  %4102 = vpow2.f32 %v2479_v43  ;;  %v2266_v25 = vpop.permute.xlu1 %2265  ;;  %v2495_v22 = vmul.f32 1.442695, %v2397_v41  ;;  %v2505_v28 = vmul.f32 1.442695, %v2402_v53  ;;  %v2406_v23 = vsub.f32 %v6329_v8, %v6776_v54 }
 0x49e   : > { %4104 = vpow2.f32 %v2467_v32  ;;  %v2387_v16 = vsub.f32 %v6270_v0, %v2266_v25  ;;  %v2388_v50 = vsub.f32 %v6273_v49, %v2266_v25  ;;  %v2637_v31 = vadd.f32 %v4085_v37, %v4083_v45  ;;  %v4087_v47 = vpop.eup %4086 }
 0x49f   : > { %4106 = vpow2.f32 %v2469_v39  ;;  %v2401_v0 = vsub.f32 %v6310_v42, %v6768_v36  ;;  %v2513_v25 = vmul.f32 1.442695, %v2406_v23 }
 0x4a0   : > { %v4089_v20 = vpop.eup %4088  ;;  %4108 = vpow2.f32 %v2481_v34  ;;  %v2475_v7 = vmul.f32 1.442695, %v2387_v16  ;;  %v2477_v44 = vmul.f32 1.442695, %v2388_v50  ;;  %2638 = vadd.xlane.f32.xlu0 %v2637_v31  ;;  %v6786_v49 = vpop.permute.xlu0 %2320 }
 0x4a1   : > { %v4091_v21 = vpop.eup %4090  ;;  %4110 = vpow2.f32 %v2487_v9  ;;  %v2276_v2 = vpop.permute.xlu1 %2275  ;;  %v2503_v26 = vmul.f32 1.442695, %v2401_v0 }
 0x4a2   : > { %v4093_v63 = vpop.eup %4092  ;;  %4112 = vpow2.f32 %v2475_v7  ;;  %v2391_v62 = vsub.f32 %v6286_v17, %v2276_v2  ;;  %v2392_v15 = vsub.f32 %v6289_v55, %v2276_v2  ;;  %v2640_v29 = vadd.f32 %v4091_v21, %v4089_v20  ;;  %v8016_v7 = vld [vmem:[#allocation117_spill] sm:$0xff] }
 0x4a3   : > { %v4095_v52 = vpop.eup %4094  ;;  %4114 = vpow2.f32 %v2477_v44  ;;  %v2405_v17 = vsub.f32 %v6326_v11, %v6776_v54  ;;  %v2646_v55 = vadd.f32 %v4093_v63, %v4087_v47  ;;  %v2410_v54 = vsub.f32 %v6345_v18, %v6786_v49  ;;  %v8015_v18 = vld [vmem:[#allocation116_spill] sm:$0xff] }
 0x4a4   : > { %v4097_v30 = vpop.eup %4096  ;;  %4116 = vpow2.f32 %v2489_v10  ;;  %v2483_v58 = vmul.f32 1.442695, %v2391_v62  ;;  %v2485_v42 = vmul.f32 1.442695, %v2392_v15  ;;  %2641 = vadd.xlane.f32.xlu1 %v2640_v29  ;;  %v6796_v12 = vpop.permute.xlu0 %2330 }
 0x4a5   : > { %v4099_v3 = vpop.eup %4098  ;;  %4118 = vpow2.f32 %v2495_v22  ;;  %v2286_v1 = vpop.permute.xlu1 %2285  ;;  %v2521_v0 = vmul.f32 1.442695, %v2410_v54 }
 0x4a6   : > { %v4101_v13 = vpop.eup %4100  ;;  %4120 = vpow2.f32 %v2483_v58  ;;  %v2395_v61 = vsub.f32 %v6302_v27, %v2286_v1  ;;  %v2396_v6 = vsub.f32 %v6305_v38, %v2286_v1  ;;  %v2643_v36 = vadd.f32 %v4099_v3, %v4097_v30  ;;  %v8018_v58 = vld [vmem:[#allocation118_spill] sm:$0xff]  ;;  %v8019_v3 = vld [vmem:[#allocation119_spill] sm:$0xff] }
 0x4a7   : > { %v4103_v43 = vpop.eup %4102  ;;  %4122 = vpow2.f32 %v2485_v42  ;;  %v2511_v27 = vmul.f32 1.442695, %v2405_v17  ;;  %v2409_v38 = vsub.f32 %v6342_v57, %v6786_v49  ;;  %v2652_v34 = vadd.f32 %v4101_v13, %v4095_v52  ;;  %v8017_v49 = vld [vmem:[#allocation120_spill] sm:$0xff] }
 0x4a8   : > { %v4105_v4 = vpop.eup %4104  ;;  %4124 = vpow2.f32 %v2497_v24  ;;  %v2491_v11 = vmul.f32 1.442695, %v2395_v61  ;;  %v2493_v59 = vmul.f32 1.442695, %v2396_v6  ;;  %2644 = vadd.xlane.f32.xlu0 %v2643_v36  ;;  %2647 = vadd.xlane.f32.xlu1 %v2646_v55  ;;  %v2414_v63 = vsub.f32 %v8017_v49, %v6796_v12 }
 0x4a9   : > { %v4107_v19 = vpop.eup %4106  ;;  %4126 = vpow2.f32 %v2503_v26  ;;  %v2296_v45 = vpop.permute.xlu1 %2295  ;;  %v2519_v31 = vmul.f32 1.442695, %v2409_v38 }
 0x4aa   : > { %v4109_v32 = vpop.eup %4108  ;;  %4128 = vpow2.f32 %v2491_v11  ;;  %v2399_v39 = vsub.f32 %v6318_v51, %v2296_v45  ;;  %v2400_v37 = vsub.f32 %v6321_v33, %v2296_v45  ;;  %v2649_v9 = vadd.f32 %v4107_v19, %v4105_v4  ;;  %v6808_v33 = vpop.permute.xlu0 %2340  ;;  %v4250_v11 = vld [vmem:[%s4645_s5 + $0x180] sm:$0xff]  ;;  %v4251_v19 = vld [vmem:[%s4645_s5 + $0x188] sm:$0xff] }
 0x4ab   : > { %v4111_v8 = vpop.eup %4110  ;;  %4130 = vpow2.f32 %v2493_v59  ;;  %v2413_v51 = vsub.f32 %v6358_v5, %v6796_v12  ;;  %v2658_v10 = vadd.f32 %v4109_v32, %v4103_v43  ;;  %v2417_v52 = vsub.f32 %v6370_v48, %v6808_v33  ;;  %v8020_v43 = vld [vmem:[#allocation121_spill] sm:$0xff] }
 0x4ac   : > { %v4113_v41 = vpop.eup %4112  ;;  %4132 = vpow2.f32 %v2505_v28  ;;  %v2499_v16 = vmul.f32 1.442695, %v2399_v39  ;;  %v2501_v50 = vmul.f32 1.442695, %v2400_v37  ;;  %2650 = vadd.xlane.f32.xlu0 %v2649_v9  ;;  %2653 = vadd.xlane.f32.xlu1 %v2652_v34  ;;  %v2529_v61 = vmul.f32 1.442695, %v2414_v63 }
 0x4ad   : > { %v4115_v57 = vpop.eup %4114  ;;  %4134 = vpow2.f32 %v2511_v27  ;;  %v2306_v47 = vpop.permute.xlu1 %2305  ;;  %v2527_v29 = vmul.f32 1.442695, %v2413_v51  ;;  %v2418_v28 = vsub.f32 %v8020_v43, %v6808_v33  ;;  %v2535_v12 = vmul.f32 1.442695, %v2417_v52  ;;  %v4252_v39 = vld [vmem:[%s4645_s5 + $0x1d0] sm:$0xff]  ;;  %v4254_v51 = vld [vmem:[%s4645_s5 + $0x1a0] sm:$0xff] }
 0x4ae   : > { %v4117_v20 = vpop.eup %4116  ;;  %4136 = vpow2.f32 %v2499_v16  ;;  %v2403_v14 = vsub.f32 %v8015_v18, %v2306_v47  ;;  %v2404_v44 = vsub.f32 %v8016_v7, %v2306_v47  ;;  %v2655_v21 = vadd.f32 %v4115_v57, %v4113_v41  ;;  %v2351_v55 = vpop.permute.xlu0 %2350  ;;  %v4255_v47 = vld [vmem:[%s4645_s5 + $0x1a8] sm:$0xff]  ;;  %v4258_v52 = vld [vmem:[%s4645_s5 + $0x1c0] sm:$0xff] }
 0x4af   : > { %v4119_v22 = vpop.eup %4118  ;;  %4138 = vpow2.f32 %v2501_v50  ;;  %v2664_v30 = vadd.f32 %v4117_v20, %v4111_v8  ;;  %v2421_v37 = vsub.f32 %v4252_v39, %v2351_v55  ;;  %v2537_v41 = vmul.f32 1.442695, %v2418_v28  ;;  %v4261_v28 = vld [vmem:[%s4645_s5 + $0x1e8] sm:$0xff] }
 0x4b0   : > { %v4121_v2 = vpop.eup %4120  ;;  %4140 = vpow2.f32 %v2513_v25  ;;  %v2507_v5 = vmul.f32 1.442695, %v2403_v14  ;;  %v2509_v62 = vmul.f32 1.442695, %v2404_v44  ;;  %2656 = vadd.xlane.f32.xlu0 %v2655_v21  ;;  %2659 = vadd.xlane.f32.xlu1 %v2658_v10  ;;  %v4253_v25 = vld [vmem:[%s4645_s5 + $0x1d8] sm:$0xff]  ;;  %v4256_v21 = vld [vmem:[%s4645_s5 + $0x1f0] sm:$0xff] }
 0x4b1   : > { %v4123_v15 = vpop.eup %4122  ;;  %4142 = vpow2.f32 %v2519_v31  ;;  %v2316_v53 = vpop.permute.xlu1 %2315  ;;  %v2422_v16 = vsub.f32 %v4253_v25, %v2351_v55  ;;  %v2543_v44 = vmul.f32 1.442695, %v2421_v37 }
 0x4b2   : > { %v4125_v24 = vpop.eup %4124  ;;  %4144 = vpow2.f32 %v2507_v5  ;;  %v2407_v42 = vsub.f32 %v8018_v58, %v2316_v53  ;;  %v2408_v26 = vsub.f32 %v8019_v3, %v2316_v53  ;;  %v2661_v17 = vadd.f32 %v4123_v15, %v4121_v2  ;;  %v2361_v50 = vpop.permute.xlu0 %2360  ;;  %v4257_v5 = vld [vmem:[%s4645_s5 + $0x1f8] sm:$0xff] }
 0x4b3   : > { %v4127_v1 = vpop.eup %4126  ;;  %4146 = vpow2.f32 %v2509_v62  ;;  %v2670_v38 = vadd.f32 %v4125_v24, %v4119_v22  ;;  %v2425_v22 = vsub.f32 %v4256_v21, %v2361_v50  ;;  %v2545_v63 = vmul.f32 1.442695, %v2422_v16  ;;  %v2827_v21 = vld [vmem:[%s4658_s12 + $0x78] sm:$0xff] }
 0x4b4   : > { %v4129_v13 = vpop.eup %4128  ;;  %4148 = vpow2.f32 %v2521_v0  ;;  %v2515_v6 = vmul.f32 1.442695, %v2407_v42  ;;  %v2517_v36 = vmul.f32 1.442695, %v2408_v26  ;;  %2662 = vadd.xlane.f32.xlu0 %v2661_v17  ;;  %2665 = vadd.xlane.f32.xlu1 %v2664_v30  ;;  %v2426_v62 = vsub.f32 %v4257_v5, %v2361_v50  ;;  %v4259_v30 = vld [vmem:[%s4645_s5 + $0x1c8] sm:$0xff]  ;;  %v2834_v5 = vld [vmem:[%s4658_s12 + $0xb0] sm:$0xff] }
 0x4b5   : > { %v4131_v48 = vpop.eup %4130  ;;  %4150 = vpow2.f32 %v2527_v29  ;;  %v2326_v4 = vpop.permute.xlu1 %2325  ;;  %v2551_v17 = vmul.f32 1.442695, %v2425_v22  ;;  %v2832_v22 = vld [vmem:[%s4658_s12 + $0xa0] sm:$0xff] }
 0x4b6   : > { %v4133_v23 = vpop.eup %4132  ;;  %4152 = vpow2.f32 %v2515_v6  ;;  %v2411_v59 = vsub.f32 %v4250_v11, %v2326_v4  ;;  %v2412_v27 = vsub.f32 %v4251_v19, %v2326_v4  ;;  %v2667_v34 = vadd.f32 %v4131_v48, %v4129_v13  ;;  %v4260_v48 = vld [vmem:[%s4645_s5 + $0x1e0] sm:$0xff] }
 0x4b7   : > { %v4135_v45 = vpop.eup %4134  ;;  %4154 = vpow2.f32 %v2517_v36  ;;  %v2676_v20 = vadd.f32 %v4133_v23, %v4127_v1 }
 0x4b8   : > { %v4137_v32 = vpop.eup %4136  ;;  %4156 = vpow2.f32 %v2529_v61  ;;  %v2523_v9 = vmul.f32 1.442695, %v2411_v59  ;;  %v2525_v8 = vmul.f32 1.442695, %v2412_v27  ;;  %2671 = vadd.xlane.f32.xlu1 %v2670_v38  ;;  %2668 = vadd.xlane.f32.xlu0 %v2667_v34  ;;  %v2553_v61 = vmul.f32 1.442695, %v2426_v62 }
 0x4b9   : > { %v4139_v54 = vpop.eup %4138  ;;  %4158 = vpow2.f32 %v2535_v12  ;;  %v2336_v57 = vpop.permute.xlu1 %2335 }
 0x4ba   : > { %v4141_v31 = vpop.eup %4140  ;;  %4160 = vpow2.f32 %v2523_v9  ;;  %v2415_v33 = vsub.f32 %v4254_v51, %v2336_v57  ;;  %v2416_v10 = vsub.f32 %v4255_v47, %v2336_v57  ;;  %v2673_v14 = vadd.f32 %v4139_v54, %v4137_v32 }
 0x4bb   : > { %v4143_v18 = vpop.eup %4142  ;;  %4162 = vpow2.f32 %v2525_v8  ;;  %v2682_v58 = vadd.f32 %v4141_v31, %v4135_v45 }
 0x4bc   : > { %v4145_v7 = vpop.eup %4144  ;;  %v2531_v0 = vmul.f32 1.442695, %v2415_v33  ;;  %v2533_v2 = vmul.f32 1.442695, %v2416_v10  ;;  %2677 = vadd.xlane.f32.xlu1 %v2676_v20  ;;  %4164 = vpow2.f32 %v2537_v41  ;;  %2674 = vadd.xlane.f32.xlu0 %v2673_v14 }
 0x4bd   : > { %v4147_v49 = vpop.eup %4146  ;;  %v2346_v15 = vpop.permute.xlu1 %2345 }
 0x4be   : > { %v4149_v29 = vpop.eup %4148  ;;  %4166 = vpow2.f32 %v2531_v0  ;;  %v2419_v53 = vsub.f32 %v4258_v52, %v2346_v15  ;;  %v2420_v24 = vsub.f32 %v4259_v30, %v2346_v15  ;;  %v2679_v3 = vadd.f32 %v4147_v49, %v4145_v7  ;;  %v2830_v7 = vld [vmem:[%s4658_s12 + $0x90] sm:$0xff]  ;;  %v2831_v52 = vld [vmem:[%s4658_s12 + $0x98] sm:$0xff] }
 0x4bf   : > { %v4151_v42 = vpop.eup %4150  ;;  %4168 = vpow2.f32 %v2533_v2  ;;  %v2688_v4 = vadd.f32 %v4149_v29, %v4143_v18  ;;  %v2828_v18 = vld [vmem:[%s4658_s12 + $0x80] sm:$0xff]  ;;  %v2861_v2 = vsub.s32 %v2827_v21, %v6685_v40  ;;  %v2866_v49 = vsub.s32 %v2832_v22, %v6685_v40 }
 0x4c0   : > { %v4153_v26 = vpop.eup %4152  ;;  %4170 = vpow2.f32 %v2543_v44  ;;  %v2539_v1 = vmul.f32 1.442695, %v2419_v53  ;;  %v2541_v55 = vmul.f32 1.442695, %v2420_v24  ;;  %2683 = vadd.xlane.f32.xlu1 %v2682_v58  ;;  %2680 = vadd.xlane.f32.xlu0 %v2679_v3  ;;  %v2862_v14 = vsub.s32 %v2828_v18, %v6685_v40  ;;  %v2836_v53 = vld [vmem:[%s4658_s12 + $0xc0] sm:$0xff]  ;;  %v6851_v24 = vpop.permute.xlu0 %2879  ;;  %v2838_v3 = vld [vmem:[%s4658_s12 + $0xd0] sm:$0xff] }
 0x4c1   : > { %v4155_v13 = vpop.eup %4154  ;;  %4172 = vpow2.f32 %v2545_v63  ;;  %v2356_v6 = vpop.permute.xlu1 %2355  ;;  %v2864_v44 = vsub.s32 %v2830_v7, %v6685_v40  ;;  %v2829_v63 = vld [vmem:[%s4658_s12 + $0x88] sm:$0xff]  ;;  %v2868_v29 = vsub.s32 %v2834_v5, %v6685_v40  ;;  %v2865_v30 = vsub.s32 %v2831_v52, %v6685_v40  ;;  %v2555_v18 = vld [vmem:[#allocation3] sm:$0xff]  ;;  %v8031_v7 = vld [vmem:[#allocation131_spill] sm:$0xff] }
 0x4c2   : > { %v4157_v36 = vpop.eup %4156  ;;  %4174 = vpow2.f32 %v2539_v1  ;;  %v2423_v43 = vsub.f32 %v4260_v48, %v2356_v6  ;;  %v2424_v12 = vsub.f32 %v4261_v28, %v2356_v6  ;;  %v2685_v11 = vadd.f32 %v4155_v13, %v4153_v26  ;;  %v2840_v13 = vld [vmem:[%s4658_s12 + $0xe0] sm:$0xff]  ;;  %v2842_v28 = vld [vmem:[%s4658_s12 + $0xf0] sm:$0xff]  ;;  %v8033_v52 = vld [vmem:[#allocation127_spill] sm:$0xff] }
 0x4c3   : > { %v4159_v23 = vpop.eup %4158  ;;  %4176 = vpow2.f32 %v2541_v55  ;;  %v2694_v45 = vadd.f32 %v4157_v36, %v4151_v42  ;;  %v2863_v62 = vsub.s32 %v2829_v63, %v6685_v40  ;;  %v2870_v58 = vsub.s32 %v2836_v53, %v6685_v40  ;;  %v2833_v42 = vld [vmem:[%s4658_s12 + $0xa8] sm:$0xff]  ;;  %v2835_v55 = vld [vmem:[%s4658_s12 + $0xb8] sm:$0xff] }
 0x4c4   : > { %v4161_v59 = vpop.eup %4160  ;;  %4178 = vpow2.f32 %v2551_v17  ;;  %v2547_v19 = vmul.f32 1.442695, %v2423_v43  ;;  %v2549_v27 = vmul.f32 1.442695, %v2424_v12  ;;  %2689 = vadd.xlane.f32.xlu1 %v2688_v4  ;;  %2686 = vadd.xlane.f32.xlu0 %v2685_v11  ;;  %v2867_v17 = vsub.s32 %v2833_v42, %v6685_v40  ;;  %v2837_v43 = vld [vmem:[%s4658_s12 + $0xc8] sm:$0xff]  ;;  %v2839_v11 = vld [vmem:[%s4658_s12 + $0xd8] sm:$0xff] }
 0x4c5   : > { %v4163_v38 = vpop.eup %4162  ;;  %4180 = vpow2.f32 %v2553_v61  ;;  %v6838_v0 = vpop.permute.xlu1 %2882  ;;  %v2872_v1 = vsub.s32 %v2838_v3, %v6685_v40  ;;  %v2869_v6 = vsub.s32 %v2835_v55, %v6685_v40  ;;  %v2874_v48 = vsub.s32 %v2840_v13, %v6685_v40  ;;  %v8034_v53 = vld [vmem:[#allocation129_spill] sm:$0xff] }
 0x4c6   : > { %4182 = vpow2.f32 %v2547_v19  ;;  %v4165_v34 = vpop.eup %4164  ;;  %v2691_v39 = vadd.f32 %v4163_v38, %v4161_v59  ;;  %v6862_v61 = vpop.permute.xlu0 %2888  ;;  %v2871_v12 = vsub.s32 %v2837_v43, %v6685_v40  ;;  %v2873_v19 = vsub.s32 %v2839_v11, %v6685_v40  ;;  %v2557_v43 = vld [vmem:[#allocation3 + $0x10] sm:$0xff] }
 0x4c7   : > { %4184 = vpow2.f32 %v2549_v27  ;;  %v2700_v8 = vadd.f32 %v4165_v34, %v4159_v23  ;;  %v2876_v23 = vsub.s32 %v2842_v28, %v6685_v40  ;;  %v2841_v27 = vld [vmem:[%s4658_s12 + $0xe8] sm:$0xff]  ;;  %v8021_v38 = vsub.f32 %v6389_v56, %v6395_v46  ;;  %v8024_v56 = vld [vmem:[#allocation122_spill] sm:$0xff]  ;;  %v8025_v46 = vld [vmem:[#allocation123_spill] sm:$0xff] }
 0x4c8   : > { %v4167_v32 = vpop.eup %4166  ;;  %2695 = vadd.xlane.f32.xlu1 %v2694_v45  ;;  %2692 = vadd.xlane.f32.xlu0 %v2691_v39 }
 0x4c9   : > { %v4169_v37 = vpop.eup %4168  ;;  %v6845_v15 = vpop.permute.xlu1 %2885  ;;  %v2139_v45 = vmul.f32 1.442695, %v8021_v38 }
 0x4ca   : > { %v4171_v9 = vpop.eup %4170  ;;  %v2697_v41 = vadd.f32 %v4169_v37, %v4167_v32  ;;  %v6871_v4 = vpop.permute.xlu0 %2894  ;;  %v2875_v32 = vsub.s32 %v2841_v27, %v6685_v40  ;;  %v2843_v37 = vld [vmem:[%s4658_s12 + $0xf8] sm:$0xff] }
 0x4cb   : > { %v4173_v54 = vpop.eup %4172  ;;  %4186 = vpow2.f32 %v2139_v45 }
 0x4cc   : > { %v4175_v25 = vpop.eup %4174  ;;  %2701 = vadd.xlane.f32.xlu1 %v2700_v8  ;;  %2698 = vadd.xlane.f32.xlu0 %v2697_v41  ;;  %v2706_v57 = vadd.f32 %v4173_v54, %v4171_v9  ;;  %v8022_v9 = vld [vmem:[#allocation126_spill] sm:$0xff]  ;;  %v2877_v41 = vsub.s32 %v2843_v37, %v6685_v40 }
 0x4cd   : > { %v4177_v16 = vpop.eup %4176  ;;  %v6856_v26 = vpop.permute.xlu1 %2891  ;;  %v8023_v8 = vsub.f32 %v6403_v35, %v8022_v9  ;;  %v8042_v37 = vld [vmem:[#allocation134_spill] sm:$0xff]  ;;  %v8043_v9 = vld [vmem:[#allocation137_spill] sm:$0xff] }
 0x4ce   : > { %v4179_v50 = vpop.eup %4178  ;;  %v2703_v51 = vadd.f32 %v4177_v16, %v4175_v25  ;;  %v6882_v34 = vpop.permute.xlu0 %2900  ;;  %v8026_v16 = vsub.f32 %v8024_v56, %v8025_v46  ;;  %v8045_v56 = vld [vmem:[#allocation136_spill] sm:$0xff]  ;;  %v8046_v46 = vld [vmem:[#allocation139_spill] sm:$0xff] }
 0x4cf   : > { %v4181_v31 = vpop.eup %4180  ;;  %v2141_v54 = vmul.f32 1.442695, %v8023_v8  ;;  %v8044_v8 = vsub.f32 %v8042_v37, %v8043_v9  ;;  %v4269_v37 = vld [vmem:[%s4645_s5 + $0x58] sm:$0xff] }
 0x4d0   : > { %v4183_v33 = vpop.eup %4182  ;;  %2707 = vadd.xlane.f32.xlu1 %v2706_v57  ;;  %2704 = vadd.xlane.f32.xlu0 %v2703_v51  ;;  %v2712_v20 = vadd.f32 %v4181_v31, %v4179_v50  ;;  %v2143_v50 = vmul.f32 1.442695, %v8026_v16  ;;  %v8027_v31 = vld [vmem:[#allocation124_spill] sm:$0xff]  ;;  %v8028_v51 = vld [vmem:[#allocation125_spill] sm:$0xff]  ;;  %v8047_v16 = vsub.f32 %v8045_v56, %v8046_v46  ;;  %v8058_v56 = vld [vmem:[#allocation147_spill] sm:$0xff] }
 0x4d1   : > { %v4185_v47 = vpop.eup %4184  ;;  %v6865_v36 = vpop.permute.xlu1 %2897  ;;  %4188 = vpow2.f32 %v2141_v54  ;;  %v2157_v54 = vmul.f32 1.442695, %v8044_v8 }
 0x4d2   : > { %v2709_v10 = vadd.f32 %v4185_v47, %v4183_v33  ;;  %v6892_v25 = vpop.permute.xlu0 %2906  ;;  %4190 = vpow2.f32 %v2143_v50  ;;  %v8029_v33 = vsub.f32 %v8027_v31, %v8028_v51  ;;  %v2155_v50 = vmul.f32 1.442695, %v8047_v16  ;;  %v4262_v31 = vld [vmem:[%s4645_s5] sm:$0xff] }
 0x4d4   : > { %2713 = vadd.xlane.f32.xlu1 %v2712_v20  ;;  %2710 = vadd.xlane.f32.xlu0 %v2709_v10  ;;  %v2145_v47 = vmul.f32 1.442695, %v8029_v33  ;;  %v1944_v20 = vlaneseq  ;;  %v4263_v33 = vld [vmem:[%s4645_s5 + $0x8] sm:$0xff] }
 0x4d5   : > { %v6875_v59 = vpop.permute.xlu1 %2903  ;;  %v4187_v10 = vpop.eup %4186 }
 0x4d6   : > { %v6902_v35 = vpop.permute.xlu0 %2912  ;;  %4192 = vpow2.f32 %v2145_v47  ;;  %v2587_v22 = vmul.f32 %v4187_v10, %v2555_v18  ;;  %v2559_v18 = vld [vmem:[#allocation3 + $0x20] sm:$0xff] }
 0x4d9   : > { %v6885_v39 = vpop.permute.xlu1 %2909 }
 0x4da   : > { %v6911_v63 = vpop.permute.xlu0 %2918 }
 0x4dd   : > { %v6897_v57 = vpop.permute.xlu1 %2915 }
 0x4e1   : > { %v6904_v40 = vpop.permute.xlu1 %2921 }
 0x4e5   : > { %2927 = vperm.xlu1 %4057, %v2862_v14   ;;  %v8030_v14 = vld [vmem:[#allocation128_spill] sm:$0xff] }
 0x4e9   : > { %2933 = vperm.xlu1 %4057, %v2864_v44   ;;  %v8032_v44 = vsub.f32 %v8030_v14, %v8031_v7  ;;  %v8048_v14 = vld [vmem:[#allocation138_spill] sm:$0xff]  ;;  %v8049_v7 = vld [vmem:[#allocation141_spill] sm:$0xff] }
 0x4ea   : > { %2924 = vperm.xlu0 %4056, %v2861_v2   ;;  %v4189_v2 = vpop.eup %4188 }
 0x4eb   : > { %v2147_v21 = vmul.f32 1.442695, %v8032_v44  ;;  %v4191_v3 = vpop.eup %4190  ;;  %v8050_v44 = vsub.f32 %v8048_v14, %v8049_v7  ;;  %v8060_v7 = vld [vmem:[#allocation146_spill] sm:$0xff] }
 0x4ec   : > { %v2589_v27 = vmul.f32 %v4191_v3, %v2557_v43  ;;  %v4193_v38 = vpop.eup %4192 }
 0x4ed   : > { %2939 = vperm.xlu1 %4057, %v2866_v49   ;;  %v6909_v49 = vand.u32 127, %v1944_v20  ;;  %4194 = vpow2.f32 %v2147_v21  ;;  %v2161_v21 = vmul.f32 1.442695, %v8050_v44  ;;  %v8061_v44 = vld [vmem:[#allocation149_spill] sm:$0xff] }
 0x4ee   : > { %2930 = vperm.xlu0 %4056, %v2863_v62   ;;  %v2556_v62 = vld [vmem:[#allocation3 + $0x8] sm:$0xff] }
 0x4ef   : > { %v2588_v42 = vmul.f32 %v4189_v2, %v2556_v62  ;;  %vm2974_vm8 = vcmp.eq.s32.totalorder %v6909_v49, %v6851_v24  ;;  %vm2980_vm10 = vcmp.eq.s32.totalorder %v6909_v49, %v6862_v61  ;;  %vm2976_vm12 = vcmp.eq.s32.totalorder %v6909_v49, %v6838_v0  ;;  %v8052_v62 = vld [vmem:[#allocation143_spill] sm:$0xff] }
 0x4f0   : > { %v3038_v51 = vsel %vm2974_vm8, %v4262_v31, 0.0  ;;  %vm2984_vm14 = vcmp.eq.s32.totalorder %v6909_v49, %v6871_v4  ;;  %vm2978_vm0 = vcmp.eq.s32.totalorder %v6909_v49, %v6845_v15  ;;  %vm2988_vm2 = vcmp.eq.s32.totalorder %v6909_v49, %v6882_v34 }
 0x4f1   : > { %2945 = vperm.xlu1 %4057, %v2868_v29   ;;  %vm2982_vm5 = vcmp.eq.s32.totalorder %v6909_v49, %v6856_v26  ;;  %vm2992_vm7 = vcmp.eq.s32.totalorder %v6909_v49, %v6892_v25 }
 0x4f2   : > { %2936 = vperm.xlu0 %4056, %v2865_v30   ;;  %v8035_v30 = vsub.f32 %v8033_v52, %v8034_v53  ;;  %v4264_v52 = vld [vmem:[%s4645_s5 + $0x30] sm:$0xff] }
 0x4f3   : > { %v3044_v53 = vsel %vm2980_vm10, %v4264_v52, 0.0 }
 0x4f5   : > { %2951 = vperm.xlu1 %4057, %v2870_v58   ;;  %v2149_v58 = vmul.f32 1.442695, %v8035_v30  ;;  %v4265_v30 = vld [vmem:[%s4645_s5 + $0x38] sm:$0xff] }
 0x4f6   : > { %2942 = vperm.xlu0 %4056, %v2867_v17   ;;  %v8036_v17 = vld [vmem:[#allocation130_spill] sm:$0xff] }
 0x4f7   : > { %4196 = vpow2.f32 %v2149_v58  ;;  %v4195_v10 = vpop.eup %4194 }
 0x4f9   : > { %2957 = vperm.xlu1 %4057, %v2872_v1   ;;  %v8037_v1 = vld [vmem:[#allocation133_spill] sm:$0xff] }
 0x4fa   : > { %2948 = vperm.xlu0 %4056, %v2869_v6   ;;  %v8038_v55 = vsub.f32 %v8036_v17, %v8037_v1  ;;  %v6921_v6 = vadd.s32 128, %v6909_v49  ;;  %v2560_v1 = vld [vmem:[#allocation3 + $0x28] sm:$0xff] }
 0x4fc   : > { %v2153_v13 = vmul.f32 1.442695, %v8038_v55  ;;  %vm2975_vm9 = vcmp.eq.s32.totalorder %v6921_v6, %v6851_v24  ;;  %vm2981_vm11 = vcmp.eq.s32.totalorder %v6921_v6, %v6862_v61  ;;  %vm2977_vm13 = vcmp.eq.s32.totalorder %v6921_v6, %v6838_v0  ;;  %v4266_v55 = vld [vmem:[%s4645_s5 + $0x10] sm:$0xff] }
 0x4fd   : > { %2963 = vperm.xlu1 %4057, %v2874_v48   ;;  %v3039_v47 = vsel %vm2975_vm9, %v4263_v33, 0.0  ;;  %v3045_v58 = vsel %vm2981_vm11, %v4265_v30, 0.0  ;;  %vm2985_vm15 = vcmp.eq.s32.totalorder %v6921_v6, %v6871_v4  ;;  %vm2979_vm1 = vcmp.eq.s32.totalorder %v6921_v6, %v6845_v15  ;;  %v2561_v4 = vld [vmem:[#allocation3 + $0x30] sm:$0xff] }
 0x4fe   : > { %2954 = vperm.xlu0 %4056, %v2871_v12   ;;  %v8039_v12 = vld [vmem:[#allocation132_spill] sm:$0xff]  ;;  %4198 = vpow2.f32 %v2153_v13  ;;  %v3102_v2 = vadd.f32 %v3039_v47, %v3038_v51  ;;  %v3040_v13 = vsel %vm2976_vm12, %v4266_v55, 0.0  ;;  %v3049_v9 = vsel %vm2985_vm15, %v4269_v37, 0.0  ;;  %v4271_v47 = vld [vmem:[%s4645_s5 + $0x28] sm:$0xff] }
 0x4ff   : > { %vm2989_vm4 = vcmp.eq.s32.totalorder %v6921_v6, %v6882_v34  ;;  %v4270_v51 = vld [vmem:[%s4645_s5 + $0x20] sm:$0xff]  ;;  %vm2983_vm6 = vcmp.eq.s32.totalorder %v6921_v6, %v6856_v26  ;;  %vm2993_vm8 = vcmp.eq.s32.totalorder %v6921_v6, %v6892_v25  ;;  %v4275_v55 = vld [vmem:[%s4645_s5 + $0x48] sm:$0xff]  ;;  %vm2986_vm9 = vcmp.eq.s32.totalorder %v6909_v49, %v6865_v36  ;;  %v4276_v26 = vld [vmem:[%s4645_s5 + $0x90] sm:$0xff] }
 0x500   : > { %v3042_v33 = vsel %vm2978_vm0, %v4270_v51, 0.0  ;;  %vm2987_vm10 = vcmp.eq.s32.totalorder %v6921_v6, %v6865_v36  ;;  %vm2996_vm11 = vcmp.eq.s32.totalorder %v6909_v49, %v6902_v35  ;;  %vm2997_vm12 = vcmp.eq.s32.totalorder %v6921_v6, %v6902_v35 }
 0x501   : > { %2969 = vperm.xlu1 %4057, %v2876_v23   ;;  %v8040_v23 = vld [vmem:[#allocation135_spill] sm:$0xff]  ;;  %v4197_v3 = vpop.eup %4196  ;;  %vm3000_vm15 = vcmp.eq.s32.totalorder %v6909_v49, %v6911_v63  ;;  %vm3001_vm0 = vcmp.eq.s32.totalorder %v6921_v6, %v6911_v63 }
 0x502   : > { %2960 = vperm.xlu0 %4056, %v2873_v19   ;;  %v8041_v11 = vsub.f32 %v8039_v12, %v8040_v23  ;;  %v8054_v23 = vld [vmem:[#allocation142_spill] sm:$0xff]  ;;  %v2592_v8 = vmul.f32 %v4197_v3, %v2560_v1 }
 0x504   : > { %v2151_v19 = vmul.f32 1.442695, %v8041_v11  ;;  %v8055_v11 = vld [vmem:[#allocation145_spill] sm:$0xff] }
 0x506   : > { %2966 = vperm.xlu0 %4056, %v2875_v32   ;;  %v2558_v32 = vld [vmem:[#allocation3 + $0x18] sm:$0xff]  ;;  %4200 = vpow2.f32 %v2151_v19  ;;  %v8056_v19 = vsub.f32 %v8054_v23, %v8055_v11  ;;  %v8066_v11 = vld [vmem:[#allocation150_spill] sm:$0xff] }
 0x507   : > { %v2590_v24 = vmul.f32 %v4193_v38, %v2558_v32  ;;  %4202 = vpow2.f32 %v2157_v54  ;;  %v3111_v38 = vadd.f32 %v3045_v58, %v3044_v53  ;;  %v4268_v32 = vld [vmem:[%s4645_s5 + $0x50] sm:$0xff]  ;;  %v8063_v58 = vld [vmem:[#allocation148_spill] sm:$0xff] }
 0x508   : > { %4204 = vpow2.f32 %v2155_v50  ;;  %v4199_v12 = vpop.eup %4198  ;;  %v3048_v0 = vsel %vm2984_vm14, %v4268_v32, 0.0  ;;  %v4277_v32 = vld [vmem:[%s4645_s5 + $0x98] sm:$0xff]  ;;  %vm2991_vm14 = vcmp.eq.s32.totalorder %v6921_v6, %v6875_v59 }
 0x509   : > { %4206 = vpow2.f32 %v2161_v21  ;;  %v8062_v21 = vsub.f32 %v8060_v7, %v8061_v44  ;;  %v8072_v44 = vld [vmem:[#allocation154_spill] sm:$0xff] }
 0x50a   : > { %2972 = vperm.xlu0 %4056, %v2877_v41  }
 0x510   : > { %v4201_v54 = vpop.eup %4200 }
 0x511   : > { %v4203_v14 = vpop.eup %4202 }
 0x512   : > { %v4205_v52 = vpop.eup %4204 }
 0x513   : > { %v4207_v23 = vpop.eup %4206 }
 0x515   : > { %v2621_v5 = vpop.xlane.xlu1 %2620 }
 0x516   : > { %v2715_v29 = vadd.f32 %v2621_v5, %v2587_v22  ;;  %v8051_v5 = vld [vmem:[#allocation140_spill] sm:$0xff] }
 0x517   : > { %v8053_v61 = vsub.f32 %v8051_v5, %v8052_v62  ;;  %v4273_v5 = vld [vmem:[%s4645_s5 + $0x78] sm:$0xff] }
 0x518   : > { %2748 = vst.msk [vmem:[#allocation3] sm:$0xff] %vm2747_vm3, %v2715_v29  ;;  %v3053_v62 = vsel %vm2989_vm4, %v4273_v5, 0.0  ;;  %vm2998_vm4 = vcmp.eq.s32.totalorder %v6909_v49, %v6897_v57 }
 0x519   : > { %v2624_v48 = vpop.xlane.xlu0 %2623  ;;  %v2159_v29 = vmul.f32 1.442695, %v8053_v61  ;;  %v2593_v61 = vmul.f32 %v4201_v54, %v2561_v4  ;;  %v2566_v54 = vld [vmem:[#allocation3 + $0x58] sm:$0xff] }
 0x51a   : > { %v2716_v28 = vadd.f32 %v2624_v48, %v2588_v42  ;;  %v2591_v42 = vmul.f32 %v4195_v10, %v2559_v18  ;;  %v4267_v48 = vld [vmem:[%s4645_s5 + $0x18] sm:$0xff]  ;;  %v3117_v18 = vadd.f32 %v3049_v9, %v3048_v0  ;;  %v3057_v0 = vsel %vm2993_vm8, %v4277_v32, 0.0 }
 0x51b   : > { %v3041_v43 = vsel %vm2977_vm13, %v4267_v48, 0.0  ;;  %4208 = vpow2.f32 %v2159_v29  ;;  %v2564_v29 = vld [vmem:[#allocation3 + $0x48] sm:$0xff]  ;;  %v8070_v4 = vld [vmem:[#allocation155_spill] sm:$0xff]  ;;  %vm2990_vm13 = vcmp.eq.s32.totalorder %v6909_v49, %v6875_v59  ;;  %v4284_v59 = vld [vmem:[%s4645_s5 + $0xd0] sm:$0xff] }
 0x51c   : > { %2749 = vst.msk [vmem:[#allocation3 + $0x8] sm:$0xff] %vm2747_vm3, %v2716_v28  ;;  %v3105_v50 = vadd.f32 %v3041_v43, %v3040_v13  ;;  %v3047_v13 = vsel %vm2983_vm6, %v4275_v55, 0.0  ;;  %v2563_v43 = vld [vmem:[#allocation3 + $0x40] sm:$0xff]  ;;  %vm3002_vm6 = vcmp.eq.s32.totalorder %v6909_v49, %v6904_v40 }
 0x51d   : > { %v2627_v45 = vpop.xlane.xlu0 %2626 }
 0x51e   : > { %v2717_v41 = vadd.f32 %v2627_v45, %v2589_v27  ;;  %v2165_v27 = vmul.f32 1.442695, %v8056_v19  ;;  %v2562_v45 = vld [vmem:[#allocation3 + $0x38] sm:$0xff]  ;;  %v8067_v19 = vld [vmem:[#allocation153_spill] sm:$0xff] }
 0x520   : > { %2750 = vst.msk [vmem:[#allocation3 + $0x10] sm:$0xff] %vm2747_vm3, %v2717_v41  ;;  %v8057_v41 = vld [vmem:[#allocation144_spill] sm:$0xff]  ;;  %4210 = vpow2.f32 %v2165_v27  ;;  %v8068_v27 = vsub.f32 %v8066_v11, %v8067_v19  ;;  %v2568_v11 = vld [vmem:[#allocation3 + $0x68] sm:$0xff] }
 0x521   : > { %v2630_v20 = vpop.xlane.xlu1 %2629  ;;  %v8059_v46 = vsub.f32 %v8057_v41, %v8058_v56  ;;  %v4278_v56 = vld [vmem:[%s4645_s5 + $0x60] sm:$0xff] }
 0x522   : > { %v2718_v22 = vadd.f32 %v2630_v20, %v2590_v24  ;;  %v3043_v24 = vsel %vm2979_vm1, %v4271_v47, 0.0  ;;  %v2594_v20 = vmul.f32 %v4199_v12, %v2562_v45  ;;  %v2596_v12 = vmul.f32 %v4203_v14, %v2564_v29  ;;  %v2565_v14 = vld [vmem:[#allocation3 + $0x50] sm:$0xff]  ;;  %v4283_v29 = vld [vmem:[%s4645_s5 + $0x88] sm:$0xff]  ;;  %v2567_v19 = vld [vmem:[#allocation3 + $0x60] sm:$0xff] }
 0x523   : > { %v2163_v16 = vmul.f32 1.442695, %v8059_v46  ;;  %v3108_v53 = vadd.f32 %v3043_v24, %v3042_v33  ;;  %v3056_v45 = vsel %vm2992_vm7, %v4276_v26, 0.0  ;;  %v3050_v25 = vsel %vm2986_vm9, %v4278_v56, 0.0  ;;  %v4279_v46 = vld [vmem:[%s4645_s5 + $0x68] sm:$0xff]  ;;  %v4280_v24 = vld [vmem:[%s4645_s5 + $0xb0] sm:$0xff] }
 0x524   : > { %2751 = vst.msk [vmem:[#allocation3 + $0x18] sm:$0xff] %vm2747_vm3, %v2718_v22  ;;  %v2169_v22 = vmul.f32 1.442695, %v8062_v21  ;;  %v3129_v47 = vadd.f32 %v3057_v0, %v3056_v45  ;;  %v3060_v36 = vsel %vm2996_vm11, %v4280_v24, 0.0  ;;  %v8073_v21 = vld [vmem:[#allocation157_spill] sm:$0xff]  ;;  %vm2994_vm1 = vcmp.eq.s32.totalorder %v6909_v49, %v6885_v39  ;;  %v2569_v24 = vld [vmem:[#allocation3 + $0x70] sm:$0xff] }
 0x525   : > { %3103 = vadd.xlane.f32.xlu1 %v3102_v2  ;;  %v2633_v17 = vpop.xlane.xlu0 %2632  ;;  %v4272_v2 = vld [vmem:[%s4645_s5 + $0x70] sm:$0xff]  ;;  %4212 = vpow2.f32 %v2163_v16  ;;  %v4209_v41 = vpop.eup %4208  ;;  %v3051_v16 = vsel %vm2987_vm10, %v4279_v46, 0.0  ;;  %v4287_v45 = vld [vmem:[%s4645_s5 + $0xa8] sm:$0xff]  ;;  %vm3003_vm7 = vcmp.eq.s32.totalorder %v6921_v6, %v6904_v40 }
 0x526   : > { %v2719_v28 = vadd.f32 %v2633_v17, %v2591_v42  ;;  %v3052_v15 = vsel %vm2988_vm2, %v4272_v2, 0.0  ;;  %v8064_v42 = vld [vmem:[#allocation151_spill] sm:$0xff]  ;;  %v4274_v17 = vld [vmem:[%s4645_s5 + $0x40] sm:$0xff]  ;;  %4214 = vpow2.f32 %v2169_v22  ;;  %v8074_v22 = vsub.f32 %v8072_v44, %v8073_v21  ;;  %v8084_v21 = vld [vmem:[#allocation162_spill] sm:$0xff] }
 0x527   : > { %v8065_v3 = vsub.f32 %v8063_v58, %v8064_v42  ;;  %v3046_v1 = vsel %vm2982_vm5, %v4274_v17, 0.0  ;;  %vm2995_vm2 = vcmp.eq.s32.totalorder %v6921_v6, %v6885_v39  ;;  %v8076_v17 = vld [vmem:[#allocation159_spill] sm:$0xff]  ;;  %vm2999_vm5 = vcmp.eq.s32.totalorder %v6921_v6, %v6897_v57  ;;  %v8081_v39 = vld [vmem:[#allocation160_spill] sm:$0xff] }
 0x528   : > { %2752 = vst.msk [vmem:[#allocation3 + $0x20] sm:$0xff] %vm2747_vm3, %v2719_v28  ;;  %v3123_v28 = vadd.f32 %v3053_v62, %v3052_v15  ;;  %v3114_v37 = vadd.f32 %v3047_v13, %v3046_v1  ;;  %v2177_v2 = vmul.f32 1.442695, %v8074_v22  ;;  %v3120_v15 = vadd.f32 %v3051_v16, %v3050_v25  ;;  %v4282_v62 = vld [vmem:[%s4645_s5 + $0x80] sm:$0xff]  ;;  %v8082_v25 = vld [vmem:[#allocation163_spill] sm:$0xff]  ;;  %v8085_v22 = vld [vmem:[#allocation165_spill] sm:$0xff] }
 0x529   : > { %v2636_v31 = vpop.xlane.xlu1 %2635  ;;  %3112 = vadd.xlane.f32.xlu1 %v3111_v38  ;;  %3106 = vadd.xlane.f32.xlu0 %v3105_v50  ;;  %v2167_v34 = vmul.f32 1.442695, %v8065_v3  ;;  %v2173_v38 = vmul.f32 1.442695, %v8068_v27  ;;  %v2597_v3 = vmul.f32 %v4209_v41, %v2565_v14  ;;  %v3064_v13 = vsel %vm3000_vm15, %v4284_v59, 0.0 }
 0x52a   : > { %v2720_v10 = vadd.f32 %v2636_v31, %v2592_v8  ;;  %v2595_v8 = vmul.f32 %v4205_v52, %v2563_v43  ;;  %v8069_v31 = vld [vmem:[#allocation152_spill] sm:$0xff]  ;;  %v4211_v7 = vpop.eup %4210  ;;  %v3055_v52 = vsel %vm2991_vm14, %v4283_v29, 0.0  ;;  %v3059_v63 = vsel %vm2995_vm2, %v4287_v45, 0.0  ;;  %v2574_v45 = vld [vmem:[#allocation3 + $0x98] sm:$0xff] }
 0x52b   : > { %4216 = vpow2.f32 %v2167_v34  ;;  %v8071_v51 = vsub.f32 %v8069_v31, %v8070_v4  ;;  %v8075_v34 = vld [vmem:[#allocation156_spill] sm:$0xff]  ;;  %v8083_v46 = vsub.f32 %v8081_v39, %v8082_v25 }
 0x52c   : > { %2753 = vst.msk [vmem:[#allocation3 + $0x28] sm:$0xff] %vm2747_vm3, %v2720_v10  ;;  %4218 = vpow2.f32 %v2173_v38  ;;  %v4281_v10 = vld [vmem:[%s4645_s5 + $0xb8] sm:$0xff]  ;;  %v8077_v1 = vsub.f32 %v8075_v34, %v8076_v17  ;;  %v4286_v38 = vld [vmem:[%s4645_s5 + $0xa0] sm:$0xff]  ;;  %v4291_v34 = vld [vmem:[%s4645_s5 + $0xe8] sm:$0xff] }
 0x52d   : > { %3118 = vadd.xlane.f32.xlu1 %v3117_v18  ;;  %v2639_v30 = vpop.xlane.xlu0 %2638  ;;  %3109 = vadd.xlane.f32.xlu0 %v3108_v53  ;;  %v2171_v33 = vmul.f32 1.442695, %v8071_v51  ;;  %v2598_v18 = vmul.f32 %v4207_v23, %v2566_v54  ;;  %v3058_v26 = vsel %vm2994_vm1, %v4286_v38, 0.0  ;;  %v2179_v16 = vmul.f32 1.442695, %v8083_v46  ;;  %v8098_v46 = vld [vmem:[#allocation171_spill] sm:$0xff] }
 0x52e   : > { %v2721_v48 = vadd.f32 %v2639_v30, %v2593_v61  ;;  %v3054_v61 = vsel %vm2990_vm13, %v4282_v62, 0.0  ;;  %v2175_v55 = vmul.f32 1.442695, %v8077_v1  ;;  %v3132_v4 = vadd.f32 %v3059_v63, %v3058_v26 }
 0x52f   : > { %v4213_v58 = vpop.eup %4212  ;;  %4220 = vpow2.f32 %v2171_v33  ;;  %v3067_v17 = vsel %vm3003_vm7, %v4291_v34, 0.0 }
 0x530   : > { %2754 = vst.msk [vmem:[#allocation3 + $0x30] sm:$0xff] %vm2747_vm3, %v2721_v48  ;;  %v4285_v48 = vld [vmem:[%s4645_s5 + $0xd8] sm:$0xff]  ;;  %4222 = vpow2.f32 %v2177_v2  ;;  %v4215_v27 = vpop.eup %4214  ;;  %v2599_v31 = vmul.f32 %v4213_v58, %v2567_v19  ;;  %v8086_v2 = vsub.f32 %v8084_v21, %v8085_v22 }
 0x531   : > { %v2642_v9 = vpop.xlane.xlu1 %2641  ;;  %3124 = vadd.xlane.f32.xlu1 %v3123_v28  ;;  %3115 = vadd.xlane.f32.xlu0 %v3114_v37  ;;  %v3065_v43 = vsel %vm3001_vm0, %v4285_v48, 0.0  ;;  %v3126_v28 = vadd.f32 %v3055_v52, %v3054_v61  ;;  %v8078_v37 = vld [vmem:[#allocation158_spill] sm:$0xff]  ;;  %4224 = vpow2.f32 %v2175_v55  ;;  %v2571_v55 = vld [vmem:[#allocation3 + $0x80] sm:$0xff] }
 0x532   : > { %v2722_v50 = vadd.f32 %v2642_v9, %v2594_v20  ;;  %v3061_v20 = vsel %vm2997_vm12, %v4281_v10, 0.0  ;;  %v8079_v9 = vld [vmem:[#allocation161_spill] sm:$0xff]  ;;  %v3141_v41 = vadd.f32 %v3065_v43, %v3064_v13  ;;  %v4288_v10 = vld [vmem:[%s4645_s5 + $0xc0] sm:$0xff]  ;;  %v8089_v13 = vld [vmem:[#allocation166_spill] sm:$0xff] }
 0x533   : > { %v3135_v42 = vadd.f32 %v3061_v20, %v3060_v36  ;;  %v3062_v20 = vsel %vm2998_vm4, %v4288_v10, 0.0  ;;  %v8090_v48 = vld [vmem:[#allocation168_spill] sm:$0xff] }
 0x534   : > { %2755 = vst.msk [vmem:[#allocation3 + $0x38] sm:$0xff] %vm2747_vm3, %v2722_v50  ;;  %v2600_v50 = vmul.f32 %v4211_v7, %v2568_v11  ;;  %v8091_v43 = vsub.f32 %v8089_v13, %v8090_v48  ;;  %v8093_v11 = vld [vmem:[#allocation170_spill] sm:$0xff]  ;;  %v2575_v10 = vld [vmem:[#allocation3 + $0xa0] sm:$0xff] }
 0x535   : > { %v2648_v5 = vpop.xlane.xlu1 %2647  ;;  %3130 = vadd.xlane.f32.xlu1 %v3129_v47  ;;  %v2645_v35 = vpop.xlane.xlu0 %2644  ;;  %3121 = vadd.xlane.f32.xlu0 %v3120_v15  ;;  %v2570_v47 = vld [vmem:[#allocation3 + $0x78] sm:$0xff]  ;;  %v2185_v15 = vmul.f32 1.442695, %v8086_v2 }
 0x536   : > { %v2724_v53 = vadd.f32 %v2648_v5, %v2596_v12  ;;  %v2723_v30 = vadd.f32 %v2645_v35, %v2595_v8  ;;  %v8080_v8 = vsub.f32 %v8078_v37, %v8079_v9  ;;  %v4217_v56 = vpop.eup %4216  ;;  %v8087_v5 = vld [vmem:[#allocation164_spill] sm:$0xff]  ;;  %v2602_v62 = vmul.f32 %v4215_v27, %v2570_v47  ;;  %v2573_v37 = vld [vmem:[#allocation3 + $0x90] sm:$0xff]  ;;  %v8095_v9 = vld [vmem:[#allocation169_spill] sm:$0xff] }
 0x537   : > { %v4219_v36 = vpop.eup %4218  ;;  %v8088_v57 = vsub.f32 %v8087_v5, %v6613_v60  ;;  %v2601_v61 = vmul.f32 %v4217_v56, %v2569_v24  ;;  %v8104_v2 = vld [vmem:[#allocation175_spill] sm:$0xff] }
 0x538   : > { %2757 = vst.msk [vmem:[#allocation3 + $0x48] sm:$0xff] %vm2747_vm3, %v2724_v53  ;;  %2756 = vst.msk [vmem:[#allocation3 + $0x40] sm:$0xff] %vm2747_vm3, %v2723_v30  ;;  %v2181_v54 = vmul.f32 1.442695, %v8080_v8  ;;  %v2572_v30 = vld [vmem:[#allocation3 + $0x88] sm:$0xff]  ;;  %v8096_v8 = vld [vmem:[#allocation172_spill] sm:$0xff] }
 0x539   : > { %v2654_v12 = vpop.xlane.xlu1 %2653  ;;  %3136 = vadd.xlane.f32.xlu1 %v3135_v42  ;;  %v2651_v23 = vpop.xlane.xlu0 %2650  ;;  %3127 = vadd.xlane.f32.xlu0 %v3126_v28  ;;  %v2183_v35 = vmul.f32 1.442695, %v8088_v57  ;;  %v4290_v42 = vld [vmem:[%s4645_s5 + $0xe0] sm:$0xff]  ;;  %v2189_v28 = vmul.f32 1.442695, %v8091_v43 }
 0x53a   : > { %v2726_v32 = vadd.f32 %v2654_v12, %v2598_v18  ;;  %v2725_v0 = vadd.f32 %v2651_v23, %v2597_v3  ;;  %v4289_v18 = vld [vmem:[%s4645_s5 + $0xc8] sm:$0xff]  ;;  %4226 = vpow2.f32 %v2181_v54  ;;  %v4221_v58 = vpop.eup %4220  ;;  %v3066_v3 = vsel %vm3002_vm6, %v4290_v42, 0.0  ;;  %v8092_v23 = vld [vmem:[#allocation167_spill] sm:$0xff]  ;;  %v8108_v42 = vld [vmem:[#allocation180_spill] sm:$0xff] }
 0x53b   : > { %v3063_v14 = vsel %vm2999_vm5, %v4289_v18, 0.0  ;;  %4228 = vpow2.f32 %v2179_v16  ;;  %v4223_v59 = vpop.eup %4222  ;;  %v2604_v12 = vmul.f32 %v4219_v36, %v2572_v30  ;;  %v8094_v40 = vsub.f32 %v8092_v23, %v8093_v11  ;;  %v8099_v16 = vld [vmem:[#allocation174_spill] sm:$0xff]  ;;  %v8102_v18 = vld [vmem:[#allocation176_spill] sm:$0xff] }
 0x53c   : > { %2759 = vst.msk [vmem:[#allocation3 + $0x58] sm:$0xff] %vm2747_vm3, %v2726_v32  ;;  %2758 = vst.msk [vmem:[#allocation3 + $0x50] sm:$0xff] %vm2747_vm3, %v2725_v0  ;;  %v3138_v29 = vadd.f32 %v3063_v14, %v3062_v20  ;;  %4230 = vpow2.f32 %v2185_v15  ;;  %v3144_v27 = vadd.f32 %v3067_v17, %v3066_v3  ;;  %v2603_v26 = vmul.f32 %v4221_v58, %v2571_v55  ;;  %v4225_v63 = vpop.eup %4224  ;;  %v8101_v20 = vld [vmem:[#allocation173_spill] sm:$0xff]  ;;  %v8105_v15 = vld [vmem:[#allocation178_spill] sm:$0xff] }
 0x53d   : > { %v2660_v51 = vpop.xlane.xlu1 %2659  ;;  %3142 = vadd.xlane.f32.xlu1 %v3141_v41  ;;  %v2657_v33 = vpop.xlane.xlu0 %2656  ;;  %3133 = vadd.xlane.f32.xlu0 %v3132_v4  ;;  %4232 = vpow2.f32 %v2183_v35  ;;  %v2187_v19 = vmul.f32 1.442695, %v8094_v40  ;;  %v8097_v54 = vsub.f32 %v8095_v9, %v8096_v8  ;;  %v2606_v39 = vmul.f32 %v4223_v59, %v2574_v45  ;;  %v2577_v30 = vld [vmem:[#allocation3 + $0xb0] sm:$0xff]  ;;  %v8107_v58 = vld [vmem:[#allocation177_spill] sm:$0xff]  ;;  %v8110_v55 = vld [vmem:[#allocation179_spill] sm:$0xff] }
 0x53e   : > { %v2728_v44 = vadd.f32 %v2660_v51, %v2600_v50  ;;  %v2727_v7 = vadd.f32 %v2657_v33, %v2599_v31  ;;  %4234 = vpow2.f32 %v2189_v28  ;;  %v8100_v50 = vsub.f32 %v8098_v46, %v8099_v16  ;;  %v2576_v33 = vld [vmem:[#allocation3 + $0xa8] sm:$0xff]  ;;  %v2581_v8 = vld [vmem:[#allocation3 + $0xd0] sm:$0xff] }
 0x53f   : > { %v2193_v41 = vmul.f32 1.442695, %v8097_v54  ;;  %4236 = vpow2.f32 %v2187_v19  ;;  %v2605_v51 = vmul.f32 %v4225_v63, %v2573_v37  ;;  %v8103_v14 = vsub.f32 %v8101_v20, %v8102_v18  ;;  %v8111_v59 = vld [vmem:[#allocation181_spill] sm:$0xff]  ;;  %v2582_v63 = vld [vmem:[#allocation3 + $0xd8] sm:$0xff] }
 0x540   : > { %2761 = vst.msk [vmem:[#allocation3 + $0x68] sm:$0xff] %vm2747_vm3, %v2728_v44  ;;  %2760 = vst.msk [vmem:[#allocation3 + $0x60] sm:$0xff] %vm2747_vm3, %v2727_v7  ;;  %v2191_v31 = vmul.f32 1.442695, %v8100_v50  ;;  %v8106_v5 = vsub.f32 %v8104_v2, %v8105_v15  ;;  %v8109_v3 = vsub.f32 %v8107_v58, %v8108_v42  ;;  %v8112_v13 = vsub.f32 %v8110_v55, %v8111_v59  ;;  %v4294_v58 = vld [vmem:[%s4645_s5 + $0x120] sm:$0xff]  ;;  %v4297_v59 = vld [vmem:[%s4645_s5 + $0xf8] sm:$0xff] }
 0x541   : > { %v2666_v52 = vpop.xlane.xlu1 %2665  ;;  %v2663_v53 = vpop.xlane.xlu0 %2662  ;;  %3139 = vadd.xlane.f32.xlu0 %v3138_v29  ;;  %4238 = vpow2.f32 %v2193_v41  ;;  %v2197_v44 = vmul.f32 1.442695, %v8103_v14 }
 0x542   : > { %v2730_v60 = vadd.f32 %v2666_v52, %v2602_v62  ;;  %v2729_v1 = vadd.f32 %v2663_v53, %v2601_v61  ;;  %4240 = vpow2.f32 %v2191_v31  ;;  %v2195_v57 = vmul.f32 1.442695, %v8106_v5  ;;  %v2578_v61 = vld [vmem:[#allocation3 + $0xb8] sm:$0xff] }
 0x543   : > { %4242 = vpow2.f32 %v2197_v44  ;;  %v2201_v34 = vmul.f32 1.442695, %v8109_v3  ;;  %v2199_v48 = vmul.f32 1.442695, %v8112_v13  ;;  %v2585_v44 = vld [vmem:[#allocation3 + $0xf0] sm:$0xff]  ;;  %v4295_v3 = vld [vmem:[%s4645_s5 + $0x128] sm:$0xff] }
 0x544   : > { %2763 = vst.msk [vmem:[#allocation3 + $0x78] sm:$0xff] %vm2747_vm3, %v2730_v60  ;;  %2762 = vst.msk [vmem:[#allocation3 + $0x70] sm:$0xff] %vm2747_vm3, %v2729_v1  ;;  %v4227_v25 = vpop.eup %4226  ;;  %4244 = vpow2.f32 %v2195_v57 }
 0x545   : > { %v2672_v38 = vpop.xlane.xlu1 %2671  ;;  %v2669_v0 = vpop.xlane.xlu0 %2668  ;;  %3145 = vadd.xlane.f32.xlu0 %v3144_v27  ;;  %v2608_v21 = vmul.f32 %v4227_v25, %v2576_v33  ;;  %4246 = vpow2.f32 %v2201_v34  ;;  %v2579_v27 = vld [vmem:[#allocation3 + $0xc0] sm:$0xff]  ;;  %v2584_v25 = vld [vmem:[#allocation3 + $0xe8] sm:$0xff] }
 0x546   : > { %v2732_v32 = vadd.f32 %v2672_v38, %v2604_v12  ;;  %v2731_v56 = vadd.f32 %v2669_v0, %v2603_v26  ;;  %v4229_v47 = vpop.eup %4228  ;;  %v2580_v12 = vld [vmem:[#allocation3 + $0xc8] sm:$0xff]  ;;  %4248 = vpow2.f32 %v2199_v48 }
 0x547   : > { %v4231_v22 = vpop.eup %4230  ;;  %v2607_v62 = vmul.f32 %v4229_v47, %v2575_v10 }
 0x548   : > { %2765 = vst.msk [vmem:[#allocation3 + $0x88] sm:$0xff] %vm2747_vm3, %v2732_v32  ;;  %2764 = vst.msk [vmem:[#allocation3 + $0x80] sm:$0xff] %vm2747_vm3, %v2731_v56  ;;  %v4233_v29 = vpop.eup %4232  ;;  %v2610_v60 = vmul.f32 %v4231_v22, %v2578_v61 }
 0x549   : > { %v2678_v4 = vpop.xlane.xlu1 %2677  ;;  %v2675_v36 = vpop.xlane.xlu0 %2674  ;;  %v2609_v28 = vmul.f32 %v4233_v29, %v2577_v30  ;;  %v4293_v29 = vld [vmem:[%s4645_s5 + $0x108] sm:$0xff] }
 0x54a   : > { %v2734_v24 = vadd.f32 %v2678_v4, %v2606_v39  ;;  %v2733_v7 = vadd.f32 %v2675_v36, %v2605_v51  ;;  %v4235_v1 = vpop.eup %4234  ;;  %v2583_v4 = vld [vmem:[#allocation3 + $0xe0] sm:$0xff]  ;;  %v2586_v36 = vld [vmem:[#allocation3 + $0xf8] sm:$0xff] }
 0x54b   : > { %v4237_v40 = vpop.eup %4236  ;;  %v2612_v38 = vmul.f32 %v4235_v1, %v2580_v12  ;;  %v4296_v1 = vld [vmem:[%s4645_s5 + $0xf0] sm:$0xff] }
 0x54c   : > { %2767 = vst.msk [vmem:[#allocation3 + $0x98] sm:$0xff] %vm2747_vm3, %v2734_v24  ;;  %2766 = vst.msk [vmem:[#allocation3 + $0x90] sm:$0xff] %vm2747_vm3, %v2733_v7  ;;  %v4239_v26 = vpop.eup %4238  ;;  %v2611_v0 = vmul.f32 %v4237_v40, %v2579_v27  ;;  %v4300_v27 = vld [vmem:[%s4645_s5 + $0x110] sm:$0xff] }
 0x54d   : > { %v2684_v35 = vpop.xlane.xlu1 %2683  ;;  %v2681_v53 = vpop.xlane.xlu0 %2680  ;;  %v2614_v41 = vmul.f32 %v4239_v26, %v2582_v63  ;;  %v4301_v26 = vld [vmem:[%s4645_s5 + $0x118] sm:$0xff] }
 0x54e   : > { %v2736_v52 = vadd.f32 %v2684_v35, %v2608_v21  ;;  %v2735_v17 = vadd.f32 %v2681_v53, %v2607_v62  ;;  %v4241_v37 = vpop.eup %4240  ;;  %v4292_v62 = vld [vmem:[%s4645_s5 + $0x100] sm:$0xff] }
 0x54f   : > { %v4243_v56 = vpop.eup %4242  ;;  %v2613_v16 = vmul.f32 %v4241_v37, %v2581_v8 }
 0x550   : > { %2769 = vst.msk [vmem:[#allocation3 + $0xa8] sm:$0xff] %vm2747_vm3, %v2736_v52  ;;  %2768 = vst.msk [vmem:[#allocation3 + $0xa0] sm:$0xff] %vm2747_vm3, %v2735_v17  ;;  %v4245_v50 = vpop.eup %4244  ;;  %v2616_v33 = vmul.f32 %v4243_v56, %v2584_v25  ;;  %v4304_v56 = vld [vmem:[%s4645_s5 + $0x130] sm:$0xff]  ;;  %v4305_v25 = vld [vmem:[%s4645_s5 + $0x138] sm:$0xff] }
 0x551   : > { %v2690_v43 = vpop.xlane.xlu1 %2689  ;;  %v2687_v11 = vpop.xlane.xlu0 %2686  ;;  %v2615_v20 = vmul.f32 %v4245_v50, %v2583_v4 }
 0x552   : > { %v2738_v23 = vadd.f32 %v2690_v43, %v2610_v60  ;;  %v2737_v19 = vadd.f32 %v2687_v11, %v2609_v28  ;;  %v4247_v47 = vpop.eup %4246  ;;  %v4298_v28 = vld [vmem:[%s4645_s5 + $0x140] sm:$0xff] }
 0x553   : > { %v4249_v18 = vpop.eup %4248  ;;  %v2618_v21 = vmul.f32 %v4247_v47, %v2586_v36  ;;  %v4308_v36 = vld [vmem:[%s4645_s5 + $0x150] sm:$0xff] }
 0x554   : > { %2771 = vst.msk [vmem:[#allocation3 + $0xb8] sm:$0xff] %vm2747_vm3, %v2738_v23  ;;  %2770 = vst.msk [vmem:[#allocation3 + $0xb0] sm:$0xff] %vm2747_vm3, %v2737_v19  ;;  %v2617_v15 = vmul.f32 %v4249_v18, %v2585_v44  ;;  %v4299_v23 = vld [vmem:[%s4645_s5 + $0x148] sm:$0xff] }
 0x555   : > { %v2696_v45 = vpop.xlane.xlu1 %2695  ;;  %v2693_v9 = vpop.xlane.xlu0 %2692 }
 0x556   : > { %v2740_v32 = vadd.f32 %v2696_v45, %v2612_v38  ;;  %v2739_v54 = vadd.f32 %v2693_v9, %v2611_v0  ;;  %v4302_v0 = vld [vmem:[%s4645_s5 + $0x160] sm:$0xff]  ;;  %v4303_v9 = vld [vmem:[%s4645_s5 + $0x168] sm:$0xff] }
 0x558   : > { %2773 = vst.msk [vmem:[#allocation3 + $0xc8] sm:$0xff] %vm2747_vm3, %v2740_v32  ;;  %2772 = vst.msk [vmem:[#allocation3 + $0xc0] sm:$0xff] %vm2747_vm3, %v2739_v54 }
 0x559   : > { %v2702_v39 = vpop.xlane.xlu1 %2701  ;;  %v2699_v31 = vpop.xlane.xlu0 %2698 }
 0x55a   : > { %v2742_v46 = vadd.f32 %v2702_v39, %v2614_v41  ;;  %v2741_v51 = vadd.f32 %v2699_v31, %v2613_v16  ;;  %v4306_v31 = vld [vmem:[%s4645_s5 + $0x180] sm:$0xff] }
 0x55c   : > { %2775 = vst.msk [vmem:[#allocation3 + $0xd8] sm:$0xff] %vm2747_vm3, %v2742_v46  ;;  %2774 = vst.msk [vmem:[#allocation3 + $0xd0] sm:$0xff] %vm2747_vm3, %v2741_v51  ;;  %v4307_v51 = vld [vmem:[%s4645_s5 + $0x188] sm:$0xff] }
 0x55d   : > { %v2708_v24 = vpop.xlane.xlu1 %2707  ;;  %v2705_v14 = vpop.xlane.xlu0 %2704 }
 0x55e   : > { %v2744_v10 = vadd.f32 %v2708_v24, %v2616_v33  ;;  %v2743_v7 = vadd.f32 %v2705_v14, %v2615_v20  ;;  %v4309_v20 = vld [vmem:[%s4645_s5 + $0x158] sm:$0xff] }
 0x560   : > { %2777 = vst.msk [vmem:[#allocation3 + $0xe8] sm:$0xff] %vm2747_vm3, %v2744_v10  ;;  %2776 = vst.msk [vmem:[#allocation3 + $0xe0] sm:$0xff] %vm2747_vm3, %v2743_v7  ;;  %v4310_v7 = vld [vmem:[%s4645_s5 + $0x1a0] sm:$0xff] }
 0x561   : > { %v2714_v22 = vpop.xlane.xlu1 %2713  ;;  %v2711_v5 = vpop.xlane.xlu0 %2710 }
 0x562   : > { %v2746_v2 = vadd.f32 %v2714_v22, %v2618_v21  ;;  %v2745_v57 = vadd.f32 %v2711_v5, %v2617_v15  ;;  %v4311_v22 = vld [vmem:[%s4645_s5 + $0x1a8] sm:$0xff] }
 0x564   : > { %2779 = vst.msk [vmem:[#allocation3 + $0xf8] sm:$0xff] %vm2747_vm3, %v2746_v2  ;;  %2778 = vst.msk [vmem:[#allocation3 + $0xf0] sm:$0xff] %vm2747_vm3, %v2745_v57  ;;  %v4312_v57 = vld [vmem:[%s4645_s5 + $0x170] sm:$0xff] }
 0x565   : > { %v2928_v35 = vpop.permute.xlu1 %2927 }
 0x566   : > { %vm3006_vm8 = vcmp.eq.s32.totalorder %v6909_v49, %v2928_v35  ;;  %vm3007_vm9 = vcmp.eq.s32.totalorder %v6921_v6, %v2928_v35 }
 0x567   : > { %v3070_v61 = vsel %vm3006_vm8, %v4292_v62, 0.0  ;;  %v3071_v52 = vsel %vm3007_vm9, %v4293_v29, 0.0  ;;  %v4313_v62 = vld [vmem:[%s4645_s5 + $0x178] sm:$0xff] }
 0x568   : > { %v3150_v53 = vadd.f32 %v3071_v52, %v3070_v61 }
 0x569   : > { %v2934_v30 = vpop.permute.xlu1 %2933  ;;  %v2925_v17 = vpop.permute.xlu0 %2924 }
 0x56a   : > { %vm3010_vm10 = vcmp.eq.s32.totalorder %v6909_v49, %v2934_v30  ;;  %vm3011_vm11 = vcmp.eq.s32.totalorder %v6921_v6, %v2934_v30  ;;  %3151 = vadd.xlane.f32.xlu0 %v3150_v53  ;;  %vm3004_vm12 = vcmp.eq.s32.totalorder %v6909_v49, %v2925_v17  ;;  %vm3005_vm13 = vcmp.eq.s32.totalorder %v6921_v6, %v2925_v17  ;;  %v4314_v53 = vld [vmem:[%s4645_s5 + $0x1c0] sm:$0xff]  ;;  %v4316_v17 = vld [vmem:[%s4645_s5 + $0x190] sm:$0xff] }
 0x56b   : > { %v3074_v42 = vsel %vm3010_vm10, %v4294_v58, 0.0  ;;  %v3075_v34 = vsel %vm3011_vm11, %v4295_v3, 0.0  ;;  %v3068_v55 = vsel %vm3004_vm12, %v4296_v1, 0.0  ;;  %v3069_v13 = vsel %vm3005_vm13, %v4297_v59, 0.0  ;;  %v4315_v58 = vld [vmem:[%s4645_s5 + $0x1c8] sm:$0xff]  ;;  %v4317_v1 = vld [vmem:[%s4645_s5 + $0x198] sm:$0xff] }
 0x56c   : > { %v3156_v60 = vadd.f32 %v3075_v34, %v3074_v42  ;;  %v3147_v43 = vadd.f32 %v3069_v13, %v3068_v55 }
 0x56d   : > { %v2940_v48 = vpop.permute.xlu1 %2939  ;;  %v2931_v40 = vpop.permute.xlu0 %2930 }
 0x56e   : > { %vm3014_vm14 = vcmp.eq.s32.totalorder %v6909_v49, %v2940_v48  ;;  %vm3015_vm15 = vcmp.eq.s32.totalorder %v6921_v6, %v2940_v48  ;;  %3157 = vadd.xlane.f32.xlu0 %v3156_v60  ;;  %vm3008_vm0 = vcmp.eq.s32.totalorder %v6909_v49, %v2931_v40  ;;  %vm3009_vm1 = vcmp.eq.s32.totalorder %v6921_v6, %v2931_v40  ;;  %v4318_v48 = vld [vmem:[%s4645_s5 + $0x1e0] sm:$0xff]  ;;  %v4320_v40 = vld [vmem:[%s4645_s5 + $0x1b0] sm:$0xff] }
 0x56f   : > { %v3078_v12 = vsel %vm3014_vm14, %v4298_v28, 0.0  ;;  %v3079_v11 = vsel %vm3015_vm15, %v4299_v23, 0.0  ;;  %3148 = vadd.xlane.f32.xlu1 %v3147_v43  ;;  %v3072_v38 = vsel %vm3008_vm0, %v4300_v27, 0.0  ;;  %v3073_v45 = vsel %vm3009_vm1, %v4301_v26, 0.0  ;;  %v4319_v28 = vld [vmem:[%s4645_s5 + $0x1e8] sm:$0xff]  ;;  %v4321_v27 = vld [vmem:[%s4645_s5 + $0x1b8] sm:$0xff] }
 0x570   : > { %v3162_v19 = vadd.f32 %v3079_v11, %v3078_v12  ;;  %v3153_v32 = vadd.f32 %v3073_v45, %v3072_v38 }
 0x571   : > { %v2946_v63 = vpop.permute.xlu1 %2945  ;;  %v2937_v54 = vpop.permute.xlu0 %2936 }
 0x572   : > { %vm3018_vm2 = vcmp.eq.s32.totalorder %v6909_v49, %v2946_v63  ;;  %vm3019_vm4 = vcmp.eq.s32.totalorder %v6921_v6, %v2946_v63  ;;  %3163 = vadd.xlane.f32.xlu0 %v3162_v19  ;;  %vm3012_vm5 = vcmp.eq.s32.totalorder %v6909_v49, %v2937_v54  ;;  %vm3013_vm6 = vcmp.eq.s32.totalorder %v6921_v6, %v2937_v54  ;;  %v4322_v63 = vld [vmem:[%s4645_s5 + $0x1d0] sm:$0xff] }
 0x573   : > { %v3082_v37 = vsel %vm3018_vm2, %v4302_v0, 0.0  ;;  %v3083_v8 = vsel %vm3019_vm4, %v4303_v9, 0.0  ;;  %3154 = vadd.xlane.f32.xlu1 %v3153_v32  ;;  %v3076_v39 = vsel %vm3012_vm5, %v4304_v56, 0.0  ;;  %v3077_v46 = vsel %vm3013_vm6, %v4305_v25, 0.0  ;;  %v4323_v0 = vld [vmem:[%s4645_s5 + $0x1d8] sm:$0xff]  ;;  %v4324_v54 = vld [vmem:[%s4645_s5 + $0x1f0] sm:$0xff] }
 0x574   : > { %v3168_v41 = vadd.f32 %v3083_v8, %v3082_v37  ;;  %v3159_v50 = vadd.f32 %v3077_v46, %v3076_v39  ;;  %v4325_v56 = vld [vmem:[%s4645_s5 + $0x1f8] sm:$0xff]  ;;  %v3198_v46 = vld [vmem:[#allocation4] sm:$0xff] }
 0x575   : > { %v2952_v16 = vpop.permute.xlu1 %2951  ;;  %v2943_v47 = vpop.permute.xlu0 %2942 }
 0x576   : > { %vm3022_vm7 = vcmp.eq.s32.totalorder %v6909_v49, %v2952_v16  ;;  %vm3023_vm8 = vcmp.eq.s32.totalorder %v6921_v6, %v2952_v16  ;;  %3169 = vadd.xlane.f32.xlu0 %v3168_v41  ;;  %vm3016_vm9 = vcmp.eq.s32.totalorder %v6909_v49, %v2943_v47  ;;  %vm3017_vm10 = vcmp.eq.s32.totalorder %v6921_v6, %v2943_v47 }
 0x577   : > { %v3086_v4 = vsel %vm3022_vm7, %v4306_v31, 0.0  ;;  %v3087_v33 = vsel %vm3023_vm8, %v4307_v51, 0.0  ;;  %3160 = vadd.xlane.f32.xlu1 %v3159_v50  ;;  %v3080_v10 = vsel %vm3016_vm9, %v4308_v36, 0.0  ;;  %v3081_v18 = vsel %vm3017_vm10, %v4309_v20, 0.0  ;;  %v3201_v31 = vld [vmem:[#allocation4 + $0x18] sm:$0xff]  ;;  %v3199_v51 = vld [vmem:[#allocation4 + $0x8] sm:$0xff] }
 0x578   : > { %v3174_v24 = vadd.f32 %v3087_v33, %v3086_v4  ;;  %v3165_v44 = vadd.f32 %v3081_v18, %v3080_v10  ;;  %v3200_v36 = vld [vmem:[#allocation4 + $0x10] sm:$0xff]  ;;  %v3205_v18 = vld [vmem:[#allocation4 + $0x38] sm:$0xff] }
 0x579   : > { %v2958_v14 = vpop.permute.xlu1 %2957  ;;  %v2949_v15 = vpop.permute.xlu0 %2948 }
 0x57a   : > { %vm3026_vm11 = vcmp.eq.s32.totalorder %v6909_v49, %v2958_v14  ;;  %vm3027_vm12 = vcmp.eq.s32.totalorder %v6921_v6, %v2958_v14  ;;  %3175 = vadd.xlane.f32.xlu0 %v3174_v24  ;;  %vm3020_vm13 = vcmp.eq.s32.totalorder %v6909_v49, %v2949_v15  ;;  %vm3021_vm14 = vcmp.eq.s32.totalorder %v6921_v6, %v2949_v15 }
 0x57b   : > { %v3090_v21 = vsel %vm3026_vm11, %v4310_v7, 0.0  ;;  %v3091_v2 = vsel %vm3027_vm12, %v4311_v22, 0.0  ;;  %3166 = vadd.xlane.f32.xlu1 %v3165_v44  ;;  %v3084_v35 = vsel %vm3020_vm13, %v4312_v57, 0.0  ;;  %v3085_v61 = vsel %vm3021_vm14, %v4313_v62, 0.0  ;;  %v3202_v7 = vld [vmem:[#allocation4 + $0x20] sm:$0xff]  ;;  %v3204_v57 = vld [vmem:[#allocation4 + $0x30] sm:$0xff] }
 0x57c   : > { %v3180_v5 = vadd.f32 %v3091_v2, %v3090_v21  ;;  %v3171_v52 = vadd.f32 %v3085_v61, %v3084_v35  ;;  %v3207_v2 = vld [vmem:[#allocation4 + $0x48] sm:$0xff]  ;;  %v3209_v61 = vld [vmem:[#allocation4 + $0x58] sm:$0xff] }
 0x57d   : > { %v2964_v29 = vpop.permute.xlu1 %2963  ;;  %v2955_v3 = vpop.permute.xlu0 %2954 }
 0x57e   : > { %vm3030_vm15 = vcmp.eq.s32.totalorder %v6909_v49, %v2964_v29  ;;  %vm3031_vm0 = vcmp.eq.s32.totalorder %v6921_v6, %v2964_v29  ;;  %3181 = vadd.xlane.f32.xlu0 %v3180_v5  ;;  %vm3024_vm1 = vcmp.eq.s32.totalorder %v6909_v49, %v2955_v3  ;;  %vm3025_vm2 = vcmp.eq.s32.totalorder %v6921_v6, %v2955_v3 }
 0x57f   : > { %v3094_v30 = vsel %vm3030_vm15, %v4314_v53, 0.0  ;;  %v3095_v42 = vsel %vm3031_vm0, %v4315_v58, 0.0  ;;  %3172 = vadd.xlane.f32.xlu1 %v3171_v52  ;;  %v3088_v60 = vsel %vm3024_vm1, %v4316_v17, 0.0  ;;  %v3089_v55 = vsel %vm3025_vm2, %v4317_v1, 0.0  ;;  %v3206_v53 = vld [vmem:[#allocation4 + $0x40] sm:$0xff]  ;;  %v3208_v17 = vld [vmem:[#allocation4 + $0x50] sm:$0xff] }
 0x580   : > { %v3186_v34 = vadd.f32 %v3095_v42, %v3094_v30  ;;  %v3177_v13 = vadd.f32 %v3089_v55, %v3088_v60  ;;  %v3211_v42 = vld [vmem:[#allocation4 + $0x68] sm:$0xff] }
 0x581   : > { %v2970_v59 = vpop.permute.xlu1 %2969  ;;  %v2961_v23 = vpop.permute.xlu0 %2960 }
 0x582   : > { %vm3034_vm4 = vcmp.eq.s32.totalorder %v6909_v49, %v2970_v59  ;;  %vm3035_vm5 = vcmp.eq.s32.totalorder %v6921_v6, %v2970_v59  ;;  %3187 = vadd.xlane.f32.xlu0 %v3186_v34  ;;  %vm3028_vm6 = vcmp.eq.s32.totalorder %v6909_v49, %v2961_v23  ;;  %vm3029_vm7 = vcmp.eq.s32.totalorder %v6921_v6, %v2961_v23  ;;  %v3210_v59 = vld [vmem:[#allocation4 + $0x60] sm:$0xff] }
 0x583   : > { %v3098_v43 = vsel %vm3034_vm4, %v4318_v48, 0.0  ;;  %v3099_v12 = vsel %vm3035_vm5, %v4319_v28, 0.0  ;;  %3178 = vadd.xlane.f32.xlu1 %v3177_v13  ;;  %v3092_v19 = vsel %vm3028_vm6, %v4320_v40, 0.0  ;;  %v3093_v38 = vsel %vm3029_vm7, %v4321_v27, 0.0  ;;  %v3214_v23 = vld [vmem:[#allocation4 + $0x80] sm:$0xff]  ;;  %v3213_v27 = vld [vmem:[#allocation4 + $0x78] sm:$0xff] }
 0x584   : > { %v3192_v11 = vadd.f32 %v3099_v12, %v3098_v43  ;;  %v3183_v26 = vadd.f32 %v3093_v38, %v3092_v19  ;;  %v3212_v43 = vld [vmem:[#allocation4 + $0x70] sm:$0xff] }
 0x585   : > { %v2967_v45 = vpop.permute.xlu0 %2966  ;;  %v3216_v19 = vld [vmem:[#allocation4 + $0x90] sm:$0xff] }
 0x586   : > { %3193 = vadd.xlane.f32.xlu0 %v3192_v11  ;;  %vm3032_vm8 = vcmp.eq.s32.totalorder %v6909_v49, %v2967_v45  ;;  %vm3033_vm9 = vcmp.eq.s32.totalorder %v6921_v6, %v2967_v45 }
 0x587   : > { %3184 = vadd.xlane.f32.xlu1 %v3183_v26  ;;  %v3096_v32 = vsel %vm3032_vm8, %v4322_v63, 0.0  ;;  %v3097_v37 = vsel %vm3033_vm9, %v4323_v0, 0.0  ;;  %v3218_v63 = vld [vmem:[#allocation4 + $0xa0] sm:$0xff]  ;;  %v3215_v0 = vld [vmem:[#allocation4 + $0x88] sm:$0xff] }
 0x588   : > { %v3189_v9 = vadd.f32 %v3097_v37, %v3096_v32 }
 0x589   : > { %v2973_v8 = vpop.permute.xlu0 %2972 }
 0x58a   : > { %vm3036_vm10 = vcmp.eq.s32.totalorder %v6909_v49, %v2973_v8  ;;  %vm3037_vm11 = vcmp.eq.s32.totalorder %v6921_v6, %v2973_v8  ;;  %v3203_v49 = vld [vmem:[#allocation4 + $0x28] sm:$0xff] }
 0x58b   : > { %3190 = vadd.xlane.f32.xlu1 %v3189_v9  ;;  %v3100_v41 = vsel %vm3036_vm10, %v4324_v54, 0.0  ;;  %v3101_v39 = vsel %vm3037_vm11, %v4325_v56, 0.0  ;;  %v3220_v54 = vld [vmem:[#allocation4 + $0xb0] sm:$0xff]  ;;  %v3217_v56 = vld [vmem:[#allocation4 + $0x98] sm:$0xff] }
 0x58c   : > { %v3195_v25 = vadd.f32 %v3101_v39, %v3100_v41 }
 0x58f   : > { %3196 = vadd.xlane.f32.xlu1 %v3195_v25 }
 0x5b2   : > { %v3104_v16 = vpop.xlane.xlu1 %3103 }
 0x5b3   : > { %v3230_v50 = vadd.f32 %v3198_v46, %v3104_v16  ;;  %v3222_v16 = vld [vmem:[#allocation4 + $0xc0] sm:$0xff] }
 0x5b5   : > { %3262 = vst.msk [vmem:[#allocation4] sm:$0xff] %vm2747_vm3, %v3230_v50 }
 0x5b6   : > { %v3113_v4 = vpop.xlane.xlu1 %3112  ;;  %v3107_v47 = vpop.xlane.xlu0 %3106 }
 0x5b7   : > { %v3233_v33 = vadd.f32 %v3201_v31, %v3113_v4  ;;  %v3231_v6 = vadd.f32 %v3199_v51, %v3107_v47  ;;  %v3219_v31 = vld [vmem:[#allocation4 + $0xa8] sm:$0xff]  ;;  %v3224_v47 = vld [vmem:[#allocation4 + $0xd0] sm:$0xff] }
 0x5b9   : > { %3265 = vst.msk [vmem:[#allocation4 + $0x18] sm:$0xff] %vm2747_vm3, %v3233_v33  ;;  %3263 = vst.msk [vmem:[#allocation4 + $0x8] sm:$0xff] %vm2747_vm3, %v3231_v6  ;;  %v3221_v6 = vld [vmem:[#allocation4 + $0xb8] sm:$0xff] }
 0x5ba   : > { %v3119_v24 = vpop.xlane.xlu1 %3118  ;;  %v3110_v20 = vpop.xlane.xlu0 %3109 }
 0x5bb   : > { %v3235_v10 = vadd.f32 %v3203_v49, %v3119_v24  ;;  %v3232_v14 = vadd.f32 %v3200_v36, %v3110_v20  ;;  %v3226_v20 = vld [vmem:[#allocation4 + $0xe0] sm:$0xff] }
 0x5bd   : > { %3267 = vst.msk [vmem:[#allocation4 + $0x28] sm:$0xff] %vm2747_vm3, %v3235_v10  ;;  %3264 = vst.msk [vmem:[#allocation4 + $0x10] sm:$0xff] %vm2747_vm3, %v3232_v14  ;;  %v3223_v14 = vld [vmem:[#allocation4 + $0xc8] sm:$0xff] }
 0x5be   : > { %v3125_v44 = vpop.xlane.xlu1 %3124  ;;  %v3116_v22 = vpop.xlane.xlu0 %3115 }
 0x5bf   : > { %v3237_v21 = vadd.f32 %v3205_v18, %v3125_v44  ;;  %v3234_v15 = vadd.f32 %v3202_v7, %v3116_v22  ;;  %v3228_v22 = vld [vmem:[#allocation4 + $0xf0] sm:$0xff] }
 0x5c1   : > { %3269 = vst.msk [vmem:[#allocation4 + $0x38] sm:$0xff] %vm2747_vm3, %v3237_v21  ;;  %3266 = vst.msk [vmem:[#allocation4 + $0x20] sm:$0xff] %vm2747_vm3, %v3234_v15  ;;  %v3225_v15 = vld [vmem:[#allocation4 + $0xd8] sm:$0xff] }
 0x5c2   : > { %v3131_v5 = vpop.xlane.xlu1 %3130  ;;  %v3122_v62 = vpop.xlane.xlu0 %3121 }
 0x5c3   : > { %v3239_v35 = vadd.f32 %v3207_v2, %v3131_v5  ;;  %v3236_v29 = vadd.f32 %v3204_v57, %v3122_v62 }
 0x5c5   : > { %3271 = vst.msk [vmem:[#allocation4 + $0x48] sm:$0xff] %vm2747_vm3, %v3239_v35  ;;  %3268 = vst.msk [vmem:[#allocation4 + $0x30] sm:$0xff] %vm2747_vm3, %v3236_v29 }
 0x5c6   : > { %v3137_v52 = vpop.xlane.xlu1 %3136  ;;  %v3128_v58 = vpop.xlane.xlu0 %3127 }
 0x5c7   : > { %v3241_v30 = vadd.f32 %v3209_v61, %v3137_v52  ;;  %v3238_v3 = vadd.f32 %v3206_v53, %v3128_v58  ;;  %v3227_v61 = vld [vmem:[#allocation4 + $0xe8] sm:$0xff]  ;;  %v3229_v53 = vld [vmem:[#allocation4 + $0xf8] sm:$0xff] }
 0x5c9   : > { %3273 = vst.msk [vmem:[#allocation4 + $0x58] sm:$0xff] %vm2747_vm3, %v3241_v30  ;;  %3270 = vst.msk [vmem:[#allocation4 + $0x40] sm:$0xff] %vm2747_vm3, %v3238_v3 }
 0x5ca   : > { %v3143_v34 = vpop.xlane.xlu1 %3142  ;;  %v3134_v1 = vpop.xlane.xlu0 %3133 }
 0x5cb   : > { %v3243_v60 = vadd.f32 %v3211_v42, %v3143_v34  ;;  %v3240_v55 = vadd.f32 %v3208_v17, %v3134_v1 }
 0x5cd   : > { %3275 = vst.msk [vmem:[#allocation4 + $0x68] sm:$0xff] %vm2747_vm3, %v3243_v60  ;;  %3272 = vst.msk [vmem:[#allocation4 + $0x50] sm:$0xff] %vm2747_vm3, %v3240_v55 }
 0x5ce   : > { %v3140_v13 = vpop.xlane.xlu0 %3139 }
 0x5cf   : > { %v3242_v48 = vadd.f32 %v3210_v59, %v3140_v13 }
 0x5d1   : > { %3274 = vst.msk [vmem:[#allocation4 + $0x60] sm:$0xff] %vm2747_vm3, %v3242_v48 }
 0x5d2   : > { %v3146_v28 = vpop.xlane.xlu0 %3145 }
 0x5d3   : > { %v3244_v12 = vadd.f32 %v3212_v43, %v3146_v28 }
 0x5d5   : > { %3276 = vst.msk [vmem:[#allocation4 + $0x70] sm:$0xff] %vm2747_vm3, %v3244_v12 }
 0x5f7   : > { %v3152_v11 = vpop.xlane.xlu0 %3151 }
 0x5f8   : > { %v3246_v40 = vadd.f32 %v3214_v23, %v3152_v11 }
 0x5fa   : > { %3278 = vst.msk [vmem:[#allocation4 + $0x80] sm:$0xff] %vm2747_vm3, %v3246_v40 }
 0x5fb   : > { %v3158_v38 = vpop.xlane.xlu0 %3157 }
 0x5fc   : > { %v3248_v26 = vadd.f32 %v3216_v19, %v3158_v38  ;;  %v3149_v45 = vpop.xlane.xlu1 %3148 }
 0x5fd   : > { %v3245_v32 = vadd.f32 %v3213_v27, %v3149_v45 }
 0x5fe   : > { %3280 = vst.msk [vmem:[#allocation4 + $0x90] sm:$0xff] %vm2747_vm3, %v3248_v26 }
 0x5ff   : > { %v3164_v37 = vpop.xlane.xlu0 %3163  ;;  %3277 = vst.msk [vmem:[#allocation4 + $0x78] sm:$0xff] %vm2747_vm3, %v3245_v32 }
 0x600   : > { %v3250_v9 = vadd.f32 %v3218_v63, %v3164_v37  ;;  %v3155_v8 = vpop.xlane.xlu1 %3154 }
 0x601   : > { %v3247_v41 = vadd.f32 %v3215_v0, %v3155_v8 }
 0x602   : > { %3282 = vst.msk [vmem:[#allocation4 + $0xa0] sm:$0xff] %vm2747_vm3, %v3250_v9 }
 0x603   : > { %v3170_v39 = vpop.xlane.xlu0 %3169  ;;  %3279 = vst.msk [vmem:[#allocation4 + $0x88] sm:$0xff] %vm2747_vm3, %v3247_v41 }
 0x604   : > { %v3252_v25 = vadd.f32 %v3220_v54, %v3170_v39  ;;  %v3161_v46 = vpop.xlane.xlu1 %3160 }
 0x605   : > { %v3249_v50 = vadd.f32 %v3217_v56, %v3161_v46 }
 0x606   : > { %3284 = vst.msk [vmem:[#allocation4 + $0xb0] sm:$0xff] %vm2747_vm3, %v3252_v25 }
 0x607   : > { %v3176_v4 = vpop.xlane.xlu0 %3175  ;;  %3281 = vst.msk [vmem:[#allocation4 + $0x98] sm:$0xff] %vm2747_vm3, %v3249_v50 }
 0x608   : > { %v3254_v51 = vadd.f32 %v3222_v16, %v3176_v4  ;;  %v3167_v33 = vpop.xlane.xlu1 %3166 }
 0x609   : > { %v3251_v49 = vadd.f32 %v3219_v31, %v3167_v33 }
 0x60a   : > { %3286 = vst.msk [vmem:[#allocation4 + $0xc0] sm:$0xff] %vm2747_vm3, %v3254_v51 }
 0x60b   : > { %v3182_v24 = vpop.xlane.xlu0 %3181  ;;  %3283 = vst.msk [vmem:[#allocation4 + $0xa8] sm:$0xff] %vm2747_vm3, %v3251_v49 }
 0x60c   : > { %v3256_v36 = vadd.f32 %v3224_v47, %v3182_v24  ;;  %v3173_v10 = vpop.xlane.xlu1 %3172 }
 0x60d   : > { %v3253_v18 = vadd.f32 %v3221_v6, %v3173_v10 }
 0x60e   : > { %3288 = vst.msk [vmem:[#allocation4 + $0xd0] sm:$0xff] %vm2747_vm3, %v3256_v36 }
 0x60f   : > { %v3188_v44 = vpop.xlane.xlu0 %3187  ;;  %3285 = vst.msk [vmem:[#allocation4 + $0xb8] sm:$0xff] %vm2747_vm3, %v3253_v18 }
 0x610   : > { %v3258_v7 = vadd.f32 %v3226_v20, %v3188_v44  ;;  %v3179_v21 = vpop.xlane.xlu1 %3178 }
 0x611   : > { %v3255_v2 = vadd.f32 %v3223_v14, %v3179_v21 }
 0x612   : > { %3290 = vst.msk [vmem:[#allocation4 + $0xe0] sm:$0xff] %vm2747_vm3, %v3258_v7 }
 0x613   : > { %v3194_v5 = vpop.xlane.xlu0 %3193  ;;  %3287 = vst.msk [vmem:[#allocation4 + $0xc8] sm:$0xff] %vm2747_vm3, %v3255_v2 }
 0x614   : > { %v3260_v57 = vadd.f32 %v3228_v22, %v3194_v5  ;;  %v3185_v35 = vpop.xlane.xlu1 %3184 }
 0x615   : > { %v3257_v62 = vadd.f32 %v3225_v15, %v3185_v35 }
 0x616   : > { %3292 = vst.msk [vmem:[#allocation4 + $0xf0] sm:$0xff] %vm2747_vm3, %v3260_v57 }
 0x617   : > { %3289 = vst.msk [vmem:[#allocation4 + $0xd8] sm:$0xff] %vm2747_vm3, %v3257_v62 }
 0x618   : > { %v3191_v29 = vpop.xlane.xlu1 %3190 }
 0x619   : > { %v3259_v52 = vadd.f32 %v3227_v61, %v3191_v29 }
 0x61b   : > { %3291 = vst.msk [vmem:[#allocation4 + $0xe8] sm:$0xff] %vm2747_vm3, %v3259_v52 }
 0x61c   : > { %v3197_v30 = vpop.xlane.xlu1 %3196 }
 0x61d   : > { %v3261_v58 = vadd.f32 %v3229_v53, %v3197_v30 }
 0x61f   : > { %3293 = vst.msk [vmem:[#allocation4 + $0xf8] sm:$0xff] %vm2747_vm3, %v3261_v58 }
 0x620 PF: > { %3295 = sbr.rel (%p4841_p12) target bundleno = 1627 (0x65b), region = 52  ;;  %v3328_v42 = vld [vmem:[#allocation3] sm:$0xff] (!%p4841_p12)  ;;  %v3329_v3 = vld [vmem:[#allocation3 + $0x8] sm:$0xff] (!%p4841_p12)  ;;  %v3330_v34 = vld [vmem:[#allocation3 + $0x10] sm:$0xff] (!%p4841_p12)  ;;  %vm3584_vm3 = vcmask (!%p4841_p12), 7168  }
 0x621   : > { %4326 = vlog2.f32 (!%p4841_p12), %v3328_v42  ;;  %v3331_v17 = vld [vmem:[#allocation3 + $0x18] sm:$0xff] (!%p4841_p12)  ;;  %v3332_v60 = vld [vmem:[#allocation3 + $0x20] sm:$0xff] (!%p4841_p12)  ;;  %v3333_v1 = vld [vmem:[#allocation3 + $0x28] sm:$0xff] (!%p4841_p12) }
 0x622   : > { %4328 = vlog2.f32 (!%p4841_p12), %v3329_v3  ;;  %v3334_v55 = vld [vmem:[#allocation3 + $0x30] sm:$0xff] (!%p4841_p12)  ;;  %v3335_v59 = vld [vmem:[#allocation3 + $0x38] sm:$0xff] (!%p4841_p12)  ;;  %v3296_v48 = vld [vmem:[#allocation2] sm:$0xff] (!%p4841_p12) }
 0x623   : > { %4330 = vlog2.f32 (!%p4841_p12), %v3330_v34  ;;  %v3336_v43 = vld [vmem:[#allocation3 + $0x40] sm:$0xff] (!%p4841_p12)  ;;  %v3297_v23 = vld [vmem:[#allocation2 + $0x8] sm:$0xff] (!%p4841_p12)  ;;  %v3338_v27 = vld [vmem:[#allocation3 + $0x50] sm:$0xff] (!%p4841_p12) }
 0x624   : > { %4332 = vlog2.f32 (!%p4841_p12), %v3331_v17  ;;  %v3337_v11 = vld [vmem:[#allocation3 + $0x48] sm:$0xff] (!%p4841_p12)  ;;  %v3456_v40 = vld [vmem:[#allocation4] sm:$0xff] (!%p4841_p12)  ;;  %v3298_v32 = vld [vmem:[#allocation2 + $0x10] sm:$0xff] (!%p4841_p12) }
 0x625   : > { %4334 = vlog2.f32 (!%p4841_p12), %v3332_v60  ;;  %v3520_v45 = vld [vmem:[%s4663_s9] sm:$0xff] (!%p4841_p12)  ;;  %v3457_v63 = vld [vmem:[#allocation4 + $0x8] sm:$0xff] (!%p4841_p12)  ;;  %v3299_v54 = vld [vmem:[#allocation2 + $0x18] sm:$0xff] (!%p4841_p12) }
 0x626   : > { %4336 = vlog2.f32 (!%p4841_p12), %v3333_v1  ;;  %v3521_v9 = vld [vmem:[%s4663_s9 + $0x8] sm:$0xff] (!%p4841_p12)  ;;  %v3339_v41 = vld [vmem:[#allocation3 + $0x58] sm:$0xff] (!%p4841_p12)  ;;  %v3458_v25 = vld [vmem:[#allocation4 + $0x10] sm:$0xff] (!%p4841_p12) }
 0x627   : > { %4338 = vlog2.f32 %v3334_v55  ;;  %v3300_v16 = vld [vmem:[#allocation2 + $0x20] sm:$0xff]  ;;  %v3522_v51 = vld [vmem:[%s4663_s9 + $0x10] sm:$0xff]  ;;  %v3459_v33 = vld [vmem:[#allocation4 + $0x18] sm:$0xff] }
 0x628   : > { %4340 = vlog2.f32 %v3335_v59  ;;  %v3340_v50 = vld [vmem:[#allocation3 + $0x60] sm:$0xff]  ;;  %v3341_v49 = vld [vmem:[#allocation3 + $0x68] sm:$0xff]  ;;  %v3523_v10 = vld [vmem:[%s4663_s9 + $0x18] sm:$0xff] }
 0x629   : > { %4342 = vlog2.f32 %v3336_v43  ;;  %v3460_v20 = vld [vmem:[#allocation4 + $0x20] sm:$0xff]  ;;  %v3301_v18 = vld [vmem:[#allocation2 + $0x28] sm:$0xff]  ;;  %v3302_v15 = vld [vmem:[#allocation2 + $0x30] sm:$0xff] }
 0x62a   : > { %4344 = vlog2.f32 %v3337_v11  ;;  %v3524_v22 = vld [vmem:[%s4663_s9 + $0x20] sm:$0xff]  ;;  %v3342_v5 = vld [vmem:[#allocation3 + $0x70] sm:$0xff]  ;;  %v3461_v62 = vld [vmem:[#allocation4 + $0x28] sm:$0xff] }
 0x62b   : > { %v4327_v13 = vpop.eup %4326  ;;  %4346 = vlog2.f32 %v3338_v27  ;;  %v3303_v29 = vld [vmem:[#allocation2 + $0x38] sm:$0xff]  ;;  %v3462_v42 = vld [vmem:[#allocation4 + $0x30] sm:$0xff]  ;;  %v3344_v34 = vld [vmem:[#allocation3 + $0x80] sm:$0xff] }
 0x62c   : > { %v4329_v28 = vpop.eup %4328  ;;  %v3361_v12 = vmul.f32 0.6931472, %v4327_v13  ;;  %4348 = vlog2.f32 %v3339_v41  ;;  %v3343_v52 = vld [vmem:[#allocation3 + $0x78] sm:$0xff]  ;;  %v3525_v1 = vld [vmem:[%s4663_s9 + $0x28] sm:$0xff]  ;;  %v3304_v13 = vld [vmem:[#allocation2 + $0x40] sm:$0xff] }
 0x62d   : > { %v3363_v19 = vmul.f32 0.6931472, %v4329_v28  ;;  %v4331_v38 = vpop.eup %4330  ;;  %4350 = vlog2.f32 %v3340_v50  ;;  %v3463_v59 = vld [vmem:[#allocation4 + $0x38] sm:$0xff]  ;;  %v3346_v41 = vld [vmem:[#allocation3 + $0x90] sm:$0xff] }
 0x62e   : > { %v3424_v26 = vadd.f32 %v3361_v12, %v3296_v48  ;;  %v4333_v0 = vpop.eup %4332  ;;  %v3365_v8 = vmul.f32 0.6931472, %v4331_v38  ;;  %4352 = vlog2.f32 %v3341_v49  ;;  %v3526_v12 = vld [vmem:[%s4663_s9 + $0x30] sm:$0xff]  ;;  %v3307_v50 = vld [vmem:[#allocation2 + $0x58] sm:$0xff] }
 0x62f   : > { %v3425_v37 = vadd.f32 %v3363_v19, %v3297_v23  ;;  %v4335_v56 = vpop.eup %4334  ;;  %v3367_v46 = vmul.f32 0.6931472, %v4333_v0  ;;  %4354 = vlog2.f32 %v3342_v5  ;;  %v3345_v19 = vld [vmem:[#allocation3 + $0x88] sm:$0xff]  ;;  %v3348_v5 = vld [vmem:[#allocation3 + $0xa0] sm:$0xff] }
 0x630   : > { %v3488_v39 = vsub.f32 %v3424_v26, %v3456_v40  ;;  %v3426_v4 = vadd.f32 %v3365_v8, %v3298_v32  ;;  %v3369_v47 = vmul.f32 0.6931472, %v4335_v56  ;;  %v4337_v6 = vpop.eup %4336  ;;  %4356 = vlog2.f32 %v3343_v52  ;;  %v3305_v40 = vld [vmem:[#allocation2 + $0x48] sm:$0xff]  ;;  %v3527_v26 = vld [vmem:[%s4663_s9 + $0x38] sm:$0xff]  ;;  %v3306_v32 = vld [vmem:[#allocation2 + $0x50] sm:$0xff] }
 0x631   : > { %v3489_v31 = vsub.f32 %v3425_v37, %v3457_v63  ;;  %v3427_v36 = vadd.f32 %v3367_v46, %v3299_v54  ;;  %v4339_v14 = vpop.eup %4338  ;;  %v3371_v2 = vmul.f32 0.6931472, %v4337_v6  ;;  %4358 = vlog2.f32 %v3344_v34  ;;  %v3465_v8 = vld [vmem:[#allocation4 + $0x48] sm:$0xff]  ;;  %v3308_v6 = vld [vmem:[#allocation2 + $0x60] sm:$0xff]  ;;  %v3310_v52 = vld [vmem:[#allocation2 + $0x70] sm:$0xff] }
 0x632   : > { %v3552_v24 = vmul.f32 %v3520_v45, %v3488_v39  ;;  %v3490_v7 = vsub.f32 %v3426_v4, %v3458_v25  ;;  %v3428_v21 = vadd.f32 %v3369_v47, %v3300_v16  ;;  %v4341_v57 = vpop.eup %4340  ;;  %v3373_v61 = vmul.f32 0.6931472, %v4339_v14  ;;  %v3464_v45 = vld [vmem:[#allocation4 + $0x40] sm:$0xff]  ;;  %v3466_v16 = vld [vmem:[#allocation4 + $0x50] sm:$0xff]  ;;  %v3349_v34 = vld [vmem:[#allocation3 + $0xa8] sm:$0xff] }
 0x633   : > { %v3553_v44 = vmul.f32 %v3521_v9, %v3489_v31  ;;  %v3491_v35 = vsub.f32 %v3427_v36, %v3459_v33  ;;  %v3429_v58 = vadd.f32 %v3371_v2, %v3301_v18  ;;  %v3375_v3 = vmul.f32 0.6931472, %v4341_v57  ;;  %v4343_v17 = vpop.eup %4342  ;;  %v3528_v25 = vld [vmem:[%s4663_s9 + $0x40] sm:$0xff]  ;;  %v3529_v33 = vld [vmem:[%s4663_s9 + $0x48] sm:$0xff]  ;;  %v3467_v18 = vld [vmem:[#allocation4 + $0x58] sm:$0xff] }
 0x634   : > { %3585 = vst.msk [vmem:[%s4670_s14] sm:$0xff] %vm3584_vm3, %v3552_v24  ;;  %v3554_v53 = vmul.f32 %v3522_v51, %v3490_v7  ;;  %v3492_v30 = vsub.f32 %v3428_v21, %v3460_v20  ;;  %v3430_v55 = vadd.f32 %v3373_v61, %v3302_v15  ;;  %v4345_v48 = vpop.eup %4344  ;;  %v3377_v11 = vmul.f32 0.6931472, %v4343_v17  ;;  %v3347_v24 = vld [vmem:[#allocation3 + $0x98] sm:$0xff]  ;;  %v3530_v20 = vld [vmem:[%s4663_s9 + $0x50] sm:$0xff]  ;;  %v3468_v2 = vld [vmem:[#allocation4 + $0x60] sm:$0xff] }
 0x635   : > { %3586 = vst.msk [vmem:[%s4670_s14 + $0x8] sm:$0xff] %vm3584_vm3, %v3553_v44  ;;  %v3555_v60 = vmul.f32 %v3523_v10, %v3491_v35  ;;  %v3493_v28 = vsub.f32 %v3429_v58, %v3461_v62  ;;  %v3431_v23 = vadd.f32 %v3375_v3, %v3303_v29  ;;  %v4347_v27 = vpop.eup %4346  ;;  %v3379_v63 = vmul.f32 0.6931472, %v4345_v48  ;;  %v3309_v44 = vld [vmem:[#allocation2 + $0x68] sm:$0xff]  ;;  %v3531_v62 = vld [vmem:[%s4663_s9 + $0x58] sm:$0xff]  ;;  %v3532_v58 = vld [vmem:[%s4663_s9 + $0x60] sm:$0xff] }
 0x636   : > { %3587 = vst.msk [vmem:[%s4670_s14 + $0x10] sm:$0xff] %vm3584_vm3, %v3554_v53  ;;  %v3556_v43 = vmul.f32 %v3524_v22, %v3492_v30  ;;  %v3494_v38 = vsub.f32 %v3430_v55, %v3462_v42  ;;  %v3432_v9 = vadd.f32 %v3377_v11, %v3304_v13  ;;  %v3381_v54 = vmul.f32 0.6931472, %v4347_v27  ;;  %v4349_v56 = vpop.eup %4348  ;;  %v3469_v29 = vld [vmem:[#allocation4 + $0x68] sm:$0xff]  ;;  %v3470_v55 = vld [vmem:[#allocation4 + $0x70] sm:$0xff]  ;;  %v3312_v27 = vld [vmem:[#allocation2 + $0x80] sm:$0xff] }
 0x637   : > { %3588 = vst.msk [vmem:[%s4670_s14 + $0x18] sm:$0xff] %vm3584_vm3, %v3555_v60  ;;  %v3557_v0 = vmul.f32 %v3525_v1, %v3493_v28  ;;  %v3495_v37 = vsub.f32 %v3431_v23, %v3463_v59  ;;  %v3433_v46 = vadd.f32 %v3379_v63, %v3305_v40  ;;  %4360 = vlog2.f32 %v3345_v19  ;;  %v4351_v31 = vpop.eup %4350  ;;  %v3533_v1 = vld [vmem:[%s4663_s9 + $0x68] sm:$0xff]  ;;  %v3311_v59 = vld [vmem:[#allocation2 + $0x78] sm:$0xff]  ;;  %v3534_v40 = vld [vmem:[%s4663_s9 + $0x70] sm:$0xff] }
 0x638   : > { %3589 = vst.msk [vmem:[%s4670_s14 + $0x20] sm:$0xff] %vm3584_vm3, %v3556_v43  ;;  %v3558_v39 = vmul.f32 %v3526_v12, %v3494_v38  ;;  %v3496_v51 = vsub.f32 %v3432_v9, %v3464_v45  ;;  %v3434_v47 = vadd.f32 %v3381_v54, %v3306_v32  ;;  %v3383_v49 = vmul.f32 0.6931472, %v4349_v56  ;;  %v4353_v36 = vpop.eup %4352  ;;  %v3350_v12 = vld [vmem:[#allocation3 + $0xb0] sm:$0xff]  ;;  %v3471_v19 = vld [vmem:[#allocation4 + $0x78] sm:$0xff]  ;;  %v3472_v9 = vld [vmem:[#allocation4 + $0x80] sm:$0xff] }
 0x639   : > { %3590 = vst.msk [vmem:[%s4670_s14 + $0x28] sm:$0xff] %vm3584_vm3, %v3557_v0  ;;  %v3559_v4 = vmul.f32 %v3527_v26, %v3495_v37  ;;  %v3497_v10 = vsub.f32 %v3433_v46, %v3465_v8  ;;  %v3385_v14 = vmul.f32 0.6931472, %v4351_v31  ;;  %4362 = vlog2.f32 %v3346_v41  ;;  %v4355_v57 = vpop.eup %4354  ;;  %v3351_v32 = vld [vmem:[#allocation3 + $0xb8] sm:$0xff]  ;;  %v3313_v8 = vld [vmem:[#allocation2 + $0x88] sm:$0xff]  ;;  %v3314_v31 = vld [vmem:[#allocation2 + $0x90] sm:$0xff] }
 0x63a   : > { %3591 = vst.msk [vmem:[%s4670_s14 + $0x30] sm:$0xff] %vm3584_vm3, %v3558_v39  ;;  %v3560_v7 = vmul.f32 %v3528_v25, %v3496_v51  ;;  %v3498_v21 = vsub.f32 %v3434_v47, %v3466_v16  ;;  %v3435_v22 = vadd.f32 %v3383_v49, %v3307_v50  ;;  %v3387_v15 = vmul.f32 0.6931472, %v4353_v36  ;;  %v4357_v17 = vpop.eup %4356  ;;  %v3535_v37 = vld [vmem:[%s4663_s9 + $0x78] sm:$0xff]  ;;  %v3352_v25 = vld [vmem:[#allocation3 + $0xc0] sm:$0xff]  ;;  %v3473_v50 = vld [vmem:[#allocation4 + $0x88] sm:$0xff] }
 0x63b   : > { %3592 = vst.msk [vmem:[%s4670_s14 + $0x38] sm:$0xff] %vm3584_vm3, %v3559_v4  ;;  %v3561_v35 = vmul.f32 %v3529_v33, %v3497_v10  ;;  %v3436_v61 = vadd.f32 %v3385_v14, %v3308_v6  ;;  %4364 = vlog2.f32 %v3347_v24  ;;  %v3389_v3 = vmul.f32 0.6931472, %v4355_v57  ;;  %v4359_v23 = vpop.eup %4358  ;;  %v3536_v16 = vld [vmem:[%s4663_s9 + $0x80] sm:$0xff]  ;;  %v3353_v49 = vld [vmem:[#allocation3 + $0xc8] sm:$0xff]  ;;  %v3474_v36 = vld [vmem:[#allocation4 + $0x90] sm:$0xff] }
 0x63c   : > { %3593 = vst.msk [vmem:[%s4670_s14 + $0x40] sm:$0xff] %vm3584_vm3, %v3560_v7  ;;  %v3562_v53 = vmul.f32 %v3530_v20, %v3498_v21  ;;  %v3499_v30 = vsub.f32 %v3435_v22, %v3467_v18  ;;  %v3437_v42 = vadd.f32 %v3387_v15, %v3309_v44  ;;  %4366 = vlog2.f32 %v3348_v5  ;;  %v3537_v24 = vld [vmem:[%s4663_s9 + $0x88] sm:$0xff]  ;;  %v3315_v10 = vld [vmem:[#allocation2 + $0x98] sm:$0xff]  ;;  %v3354_v7 = vld [vmem:[#allocation3 + $0xd0] sm:$0xff] }
 0x63d   : > { %3594 = vst.msk [vmem:[%s4670_s14 + $0x48] sm:$0xff] %vm3584_vm3, %v3561_v35  ;;  %v3500_v60 = vsub.f32 %v3436_v61, %v3468_v2  ;;  %v3438_v43 = vadd.f32 %v3389_v3, %v3310_v52  ;;  %v3391_v28 = vmul.f32 0.6931472, %v4357_v17  ;;  %4368 = vlog2.f32 %v3349_v34  ;;  %v3538_v22 = vld [vmem:[%s4663_s9 + $0x90] sm:$0xff]  ;;  %v3475_v2 = vld [vmem:[#allocation4 + $0x98] sm:$0xff]  ;;  %v3316_v15 = vld [vmem:[#allocation2 + $0xa0] sm:$0xff] }
 0x63e   : > { %3595 = vst.msk [vmem:[%s4670_s14 + $0x50] sm:$0xff] %vm3584_vm3, %v3562_v53  ;;  %v3563_v13 = vmul.f32 %v3531_v62, %v3499_v30  ;;  %v3501_v48 = vsub.f32 %v3437_v42, %v3469_v29  ;;  %v3393_v63 = vmul.f32 0.6931472, %v4359_v23  ;;  %4370 = vlog2.f32 %v3350_v12  ;;  %v3355_v61 = vld [vmem:[#allocation3 + $0xd8] sm:$0xff]  ;;  %v3476_v53 = vld [vmem:[#allocation4 + $0xa0] sm:$0xff]  ;;  %v3317_v30 = vld [vmem:[#allocation2 + $0xa8] sm:$0xff] }
 0x63f   : > { %v3564_v11 = vmul.f32 %v3532_v58, %v3500_v60  ;;  %v3502_v26 = vsub.f32 %v3438_v43, %v3470_v55  ;;  %v3439_v45 = vadd.f32 %v3391_v28, %v3311_v59  ;;  %4372 = vlog2.f32 %v3351_v32  ;;  %v3539_v52 = vld [vmem:[%s4663_s9 + $0x98] sm:$0xff]  ;;  %v3356_v17 = vld [vmem:[#allocation3 + $0xe0] sm:$0xff]  ;;  %v3477_v55 = vld [vmem:[#allocation4 + $0xa8] sm:$0xff] }
 0x640   : > { %3596 = vst.msk [vmem:[%s4670_s14 + $0x58] sm:$0xff] %vm3584_vm3, %v3563_v13  ;;  %v3565_v38 = vmul.f32 %v3533_v1, %v3501_v48  ;;  %v3440_v56 = vadd.f32 %v3393_v63, %v3312_v27  ;;  %4374 = vlog2.f32 %v3352_v25  ;;  %v3540_v1 = vld [vmem:[%s4663_s9 + $0xa0] sm:$0xff]  ;;  %v3318_v59 = vld [vmem:[#allocation2 + $0xb0] sm:$0xff]  ;;  %v3357_v12 = vld [vmem:[#allocation3 + $0xe8] sm:$0xff] }
 0x641   : > { %v4361_v0 = vpop.eup %4360  ;;  %3597 = vst.msk [vmem:[%s4670_s14 + $0x60] sm:$0xff] %vm3584_vm3, %v3564_v11  ;;  %v3566_v54 = vmul.f32 %v3534_v40, %v3502_v26  ;;  %v3503_v41 = vsub.f32 %v3439_v45, %v3471_v19  ;;  %4376 = vlog2.f32 %v3353_v49  ;;  %v3541_v11 = vld [vmem:[%s4663_s9 + $0xa8] sm:$0xff]  ;;  %v3478_v40 = vld [vmem:[#allocation4 + $0xb0] sm:$0xff]  ;;  %v3319_v19 = vld [vmem:[#allocation2 + $0xb8] sm:$0xff] }
 0x642   : > { %3598 = vst.msk [vmem:[%s4670_s14 + $0x68] sm:$0xff] %vm3584_vm3, %v3565_v38  ;;  %v3395_v39 = vmul.f32 0.6931472, %v4361_v0  ;;  %v3504_v51 = vsub.f32 %v3440_v56, %v3472_v9  ;;  %4378 = vlog2.f32 %v3354_v7  ;;  %v3358_v63 = vld [vmem:[#allocation3 + $0xf0] sm:$0xff]  ;;  %v3320_v9 = vld [vmem:[#allocation2 + $0xc0] sm:$0xff] }
 0x643   : > { %v4363_v46 = vpop.eup %4362  ;;  %3599 = vst.msk [vmem:[%s4670_s14 + $0x70] sm:$0xff] %vm3584_vm3, %v3566_v54  ;;  %v3567_v4 = vmul.f32 %v3535_v37, %v3503_v41  ;;  %4380 = vlog2.f32 %v3355_v61  ;;  %v3542_v0 = vld [vmem:[%s4663_s9 + $0xb0] sm:$0xff]  ;;  %v3479_v37 = vld [vmem:[#allocation4 + $0xb8] sm:$0xff]  ;;  %v3544_v49 = vld [vmem:[%s4663_s9 + $0xc0] sm:$0xff] }
 0x644   : > { %v3441_v33 = vadd.f32 %v3395_v39, %v3313_v8  ;;  %v3397_v47 = vmul.f32 0.6931472, %v4363_v46  ;;  %v3568_v20 = vmul.f32 %v3536_v16, %v3504_v51  ;;  %4382 = vlog2.f32 %v3356_v17  ;;  %v3359_v39 = vld [vmem:[#allocation3 + $0xf8] sm:$0xff]  ;;  %v3480_v16 = vld [vmem:[#allocation4 + $0xc0] sm:$0xff]  ;;  %v3482_v7 = vld [vmem:[#allocation4 + $0xd0] sm:$0xff] }
 0x645   : > { %v4365_v6 = vpop.eup %4364  ;;  %3600 = vst.msk [vmem:[%s4670_s14 + $0x78] sm:$0xff] %vm3584_vm3, %v3567_v4  ;;  %4384 = vlog2.f32 %v3357_v12  ;;  %v3543_v46 = vld [vmem:[%s4663_s9 + $0xb8] sm:$0xff]  ;;  %v3324_v61 = vld [vmem:[#allocation2 + $0xe0] sm:$0xff] }
 0x646   : > { %v3505_v18 = vsub.f32 %v3441_v33, %v3473_v50  ;;  %v3442_v14 = vadd.f32 %v3397_v47, %v3314_v31  ;;  %v3399_v44 = vmul.f32 0.6931472, %v4365_v6  ;;  %v4367_v21 = vpop.eup %4366  ;;  %3601 = vst.msk [vmem:[%s4670_s14 + $0x80] sm:$0xff] %vm3584_vm3, %v3568_v20  ;;  %v3321_v50 = vld [vmem:[#allocation2 + $0xc8] sm:$0xff]  ;;  %4386 = vlog2.f32 %v3358_v63 }
 0x647   : > { %v3401_v62 = vmul.f32 0.6931472, %v4367_v21  ;;  %v4369_v29 = vpop.eup %4368  ;;  %v3481_v6 = vld [vmem:[#allocation4 + $0xc8] sm:$0xff]  ;;  %4388 = vlog2.f32 %v3359_v39  ;;  %v3323_v21 = vld [vmem:[#allocation2 + $0xd8] sm:$0xff] }
 0x648   : > { %v3569_v5 = vmul.f32 %v3537_v24, %v3505_v18  ;;  %v3506_v57 = vsub.f32 %v3442_v14, %v3474_v36  ;;  %v3443_v35 = vadd.f32 %v3399_v44, %v3315_v10  ;;  %v3403_v34 = vmul.f32 0.6931472, %v4369_v29  ;;  %v4371_v60 = vpop.eup %4370  ;;  %v3322_v24 = vld [vmem:[#allocation2 + $0xd0] sm:$0xff]  ;;  %v3545_v44 = vld [vmem:[%s4663_s9 + $0xc8] sm:$0xff] }
 0x649   : > { %v3444_v3 = vadd.f32 %v3401_v62, %v3316_v15  ;;  %v3405_v28 = vmul.f32 0.6931472, %v4371_v60  ;;  %v4373_v23 = vpop.eup %4372  ;;  %v3483_v62 = vld [vmem:[#allocation4 + $0xd8] sm:$0xff] }
 0x64a   : > { %3602 = vst.msk [vmem:[%s4670_s14 + $0x88] sm:$0xff] %vm3584_vm3, %v3569_v5  ;;  %v3570_v58 = vmul.f32 %v3538_v22, %v3506_v57  ;;  %v3507_v42 = vsub.f32 %v3443_v35, %v3475_v2  ;;  %v3445_v43 = vadd.f32 %v3403_v34, %v3317_v30  ;;  %v3407_v45 = vmul.f32 0.6931472, %v4373_v23  ;;  %v4375_v32 = vpop.eup %4374  ;;  %v3546_v35 = vld [vmem:[%s4663_s9 + $0xd0] sm:$0xff]  ;;  %v3325_v34 = vld [vmem:[#allocation2 + $0xe8] sm:$0xff] }
 0x64b   : > { %v3508_v48 = vsub.f32 %v3444_v3, %v3476_v53  ;;  %v3446_v26 = vadd.f32 %v3405_v28, %v3318_v59  ;;  %v3409_v56 = vmul.f32 0.6931472, %v4375_v32  ;;  %v4377_v25 = vpop.eup %4376  ;;  %v3484_v3 = vld [vmem:[#allocation4 + $0xe0] sm:$0xff] }
 0x64c   : > { %3603 = vst.msk [vmem:[%s4670_s14 + $0x90] sm:$0xff] %vm3584_vm3, %v3570_v58  ;;  %v3571_v13 = vmul.f32 %v3539_v52, %v3507_v42  ;;  %v3509_v38 = vsub.f32 %v3445_v43, %v3477_v55  ;;  %v3447_v41 = vadd.f32 %v3407_v45, %v3319_v19  ;;  %v3411_v33 = vmul.f32 0.6931472, %v4377_v25  ;;  %v4379_v47 = vpop.eup %4378  ;;  %v3547_v42 = vld [vmem:[%s4663_s9 + $0xd8] sm:$0xff]  ;;  %v3326_v43 = vld [vmem:[#allocation2 + $0xf0] sm:$0xff]  ;;  %v3549_v19 = vld [vmem:[%s4663_s9 + $0xe8] sm:$0xff] }
 0x64d   : > { %v3572_v27 = vmul.f32 %v3540_v1, %v3508_v48  ;;  %v3510_v54 = vsub.f32 %v3446_v26, %v3478_v40  ;;  %v3448_v51 = vadd.f32 %v3409_v56, %v3320_v9  ;;  %v3413_v18 = vmul.f32 0.6931472, %v4379_v47  ;;  %v4381_v14 = vpop.eup %4380  ;;  %v3485_v48 = vld [vmem:[#allocation4 + $0xe8] sm:$0xff] }
 0x64e   : > { %3604 = vst.msk [vmem:[%s4670_s14 + $0x98] sm:$0xff] %vm3584_vm3, %v3571_v13  ;;  %v3573_v8 = vmul.f32 %v3541_v11, %v3509_v38  ;;  %v3511_v4 = vsub.f32 %v3447_v41, %v3479_v37  ;;  %v3449_v20 = vadd.f32 %v3411_v33, %v3321_v50  ;;  %v3415_v5 = vmul.f32 0.6931472, %v4381_v14  ;;  %v4383_v57 = vpop.eup %4382  ;;  %v3548_v13 = vld [vmem:[%s4663_s9 + $0xe0] sm:$0xff]  ;;  %v3327_v38 = vld [vmem:[#allocation2 + $0xf8] sm:$0xff] }
 0x64f   : > { %3605 = vst.msk [vmem:[%s4670_s14 + $0xa0] sm:$0xff] %vm3584_vm3, %v3572_v27  ;;  %v3574_v31 = vmul.f32 %v3542_v0, %v3510_v54  ;;  %v3512_v10 = vsub.f32 %v3448_v51, %v3480_v16  ;;  %v3450_v15 = vadd.f32 %v3413_v18, %v3322_v24  ;;  %v3417_v30 = vmul.f32 0.6931472, %v4383_v57  ;;  %v4385_v58 = vpop.eup %4384  ;;  %v3486_v27 = vld [vmem:[#allocation4 + $0xf0] sm:$0xff]  ;;  %v3487_v37 = vld [vmem:[#allocation4 + $0xf8] sm:$0xff] }
 0x650   : > { %3606 = vst.msk [vmem:[%s4670_s14 + $0xa8] sm:$0xff] %vm3584_vm3, %v3573_v8  ;;  %v3575_v36 = vmul.f32 %v3543_v46, %v3511_v4  ;;  %v3513_v2 = vsub.f32 %v3449_v20, %v3481_v6  ;;  %v3451_v53 = vadd.f32 %v3415_v5, %v3323_v21  ;;  %v3419_v55 = vmul.f32 0.6931472, %v4385_v58  ;;  %v4387_v59 = vpop.eup %4386  ;;  %v3550_v0 = vld [vmem:[%s4663_s9 + $0xf0] sm:$0xff]  ;;  %v3551_v41 = vld [vmem:[%s4663_s9 + $0xf8] sm:$0xff] }
 0x651   : > { %3607 = vst.msk [vmem:[%s4670_s14 + $0xb0] sm:$0xff] %vm3584_vm3, %v3574_v31  ;;  %v3576_v22 = vmul.f32 %v3544_v49, %v3512_v10  ;;  %v3514_v52 = vsub.f32 %v3450_v15, %v3482_v7  ;;  %v3452_v1 = vadd.f32 %v3417_v30, %v3324_v61  ;;  %v3421_v11 = vmul.f32 0.6931472, %v4387_v59  ;;  %v4389_v40 = vpop.eup %4388 }
 0x652   : > { %3608 = vst.msk [vmem:[%s4670_s14 + $0xb8] sm:$0xff] %vm3584_vm3, %v3575_v36  ;;  %v3577_v29 = vmul.f32 %v3545_v44, %v3513_v2  ;;  %v3515_v60 = vsub.f32 %v3451_v53, %v3483_v62  ;;  %v3453_v23 = vadd.f32 %v3419_v55, %v3325_v34  ;;  %v3423_v32 = vmul.f32 0.6931472, %v4389_v40 }
 0x653   : > { %3609 = vst.msk [vmem:[%s4670_s14 + $0xc0] sm:$0xff] %vm3584_vm3, %v3576_v22  ;;  %v3578_v17 = vmul.f32 %v3546_v35, %v3514_v52  ;;  %v3516_v12 = vsub.f32 %v3452_v1, %v3484_v3  ;;  %v3454_v63 = vadd.f32 %v3421_v11, %v3326_v43 }
 0x654   : > { %3610 = vst.msk [vmem:[%s4670_s14 + $0xc8] sm:$0xff] %vm3584_vm3, %v3577_v29  ;;  %v3579_v28 = vmul.f32 %v3547_v42, %v3515_v60  ;;  %v3517_v45 = vsub.f32 %v3453_v23, %v3485_v48  ;;  %v3455_v54 = vadd.f32 %v3423_v32, %v3327_v38 }
 0x655   : > { %3611 = vst.msk [vmem:[%s4670_s14 + $0xd0] sm:$0xff] %vm3584_vm3, %v3578_v17  ;;  %v3580_v26 = vmul.f32 %v3548_v13, %v3516_v12  ;;  %v3518_v8 = vsub.f32 %v3454_v63, %v3486_v27 }
 0x656   : > { %3612 = vst.msk [vmem:[%s4670_s14 + $0xd8] sm:$0xff] %vm3584_vm3, %v3579_v28  ;;  %v3581_v9 = vmul.f32 %v3549_v19, %v3517_v45  ;;  %v3519_v39 = vsub.f32 %v3455_v54, %v3487_v37 }
 0x657   : > { %3613 = vst.msk [vmem:[%s4670_s14 + $0xe0] sm:$0xff] %vm3584_vm3, %v3580_v26  ;;  %v3582_v56 = vmul.f32 %v3550_v0, %v3518_v8 }
 0x658   : > { %3614 = vst.msk [vmem:[%s4670_s14 + $0xe8] sm:$0xff] %vm3584_vm3, %v3581_v9  ;;  %v3583_v25 = vmul.f32 %v3551_v41, %v3519_v39 }
 0x659   : > { %3615 = vst.msk [vmem:[%s4670_s14 + $0xf0] sm:$0xff] %vm3584_vm3, %v3582_v56 }
 0x65a   : > { %3616 = vst.msk [vmem:[%s4670_s14 + $0xf8] sm:$0xff] %vm3584_vm3, %v3583_v25 }
 0x65b PF: > { %p3617_p2 = scmp.gt.s32.totalorder %s4472_s21, %s4652_s26 }
 0x65d   : > { %p3618_p4 = pnand %p3617_p2, %p388_p11 }
 0x65e   : > { %vm3622_vm12 = vcmask (!%p3618_p4), 7168   ;;  %v4493_v46 = vmov (!%p3618_p4), 0.0  }
 0x65f   : > { %3621 = sbr.rel (%p3618_p4) target bundleno = 1647 (0x66f), region = 56  ;;  %3623 = vst.msk [vmem:[%s4670_s14] sm:$0xff] (!%p3618_p4), %vm3622_vm12, %v4493_v46  ;;  %3624 = vst.msk [vmem:[%s4670_s14 + $0x8] sm:$0xff] (!%p3618_p4), %vm3622_vm12, %v4493_v46 }
 0x660   : > { %3625 = vst.msk [vmem:[%s4670_s14 + $0x10] sm:$0xff] (!%p3618_p4), %vm3622_vm12, %v4493_v46  ;;  %3626 = vst.msk [vmem:[%s4670_s14 + $0x18] sm:$0xff] (!%p3618_p4), %vm3622_vm12, %v4493_v46 }
 0x661   : > { %3627 = vst.msk [vmem:[%s4670_s14 + $0x20] sm:$0xff] (!%p3618_p4), %vm3622_vm12, %v4493_v46  ;;  %3628 = vst.msk [vmem:[%s4670_s14 + $0x28] sm:$0xff] (!%p3618_p4), %vm3622_vm12, %v4493_v46 }
 0x662   : > { %3629 = vst.msk [vmem:[%s4670_s14 + $0x30] sm:$0xff] (!%p3618_p4), %vm3622_vm12, %v4493_v46  ;;  %3630 = vst.msk [vmem:[%s4670_s14 + $0x38] sm:$0xff] (!%p3618_p4), %vm3622_vm12, %v4493_v46 }
 0x663   : > { %3631 = vst.msk [vmem:[%s4670_s14 + $0x40] sm:$0xff] (!%p3618_p4), %vm3622_vm12, %v4493_v46  ;;  %3632 = vst.msk [vmem:[%s4670_s14 + $0x48] sm:$0xff] (!%p3618_p4), %vm3622_vm12, %v4493_v46 }
 0x664   : > { %3633 = vst.msk [vmem:[%s4670_s14 + $0x50] sm:$0xff] (!%p3618_p4), %vm3622_vm12, %v4493_v46  ;;  %3634 = vst.msk [vmem:[%s4670_s14 + $0x58] sm:$0xff] (!%p3618_p4), %vm3622_vm12, %v4493_v46 }
 0x665   : > { %3635 = vst.msk [vmem:[%s4670_s14 + $0x60] sm:$0xff] (!%p3618_p4), %vm3622_vm12, %v4493_v46  ;;  %3636 = vst.msk [vmem:[%s4670_s14 + $0x68] sm:$0xff] (!%p3618_p4), %vm3622_vm12, %v4493_v46 }
 0x666   : > { %3637 = vst.msk [vmem:[%s4670_s14 + $0x70] sm:$0xff] %vm3622_vm12, %v4493_v46  ;;  %3638 = vst.msk [vmem:[%s4670_s14 + $0x78] sm:$0xff] %vm3622_vm12, %v4493_v46 }
 0x667   : > { %3639 = vst.msk [vmem:[%s4670_s14 + $0x80] sm:$0xff] %vm3622_vm12, %v4493_v46  ;;  %3640 = vst.msk [vmem:[%s4670_s14 + $0x88] sm:$0xff] %vm3622_vm12, %v4493_v46 }
 0x668   : > { %3641 = vst.msk [vmem:[%s4670_s14 + $0x90] sm:$0xff] %vm3622_vm12, %v4493_v46  ;;  %3642 = vst.msk [vmem:[%s4670_s14 + $0x98] sm:$0xff] %vm3622_vm12, %v4493_v46 }
 0x669   : > { %3643 = vst.msk [vmem:[%s4670_s14 + $0xa0] sm:$0xff] %vm3622_vm12, %v4493_v46  ;;  %3644 = vst.msk [vmem:[%s4670_s14 + $0xa8] sm:$0xff] %vm3622_vm12, %v4493_v46 }
 0x66a   : > { %3645 = vst.msk [vmem:[%s4670_s14 + $0xb0] sm:$0xff] %vm3622_vm12, %v4493_v46  ;;  %3646 = vst.msk [vmem:[%s4670_s14 + $0xb8] sm:$0xff] %vm3622_vm12, %v4493_v46 }
 0x66b   : > { %3647 = vst.msk [vmem:[%s4670_s14 + $0xc0] sm:$0xff] %vm3622_vm12, %v4493_v46  ;;  %3648 = vst.msk [vmem:[%s4670_s14 + $0xc8] sm:$0xff] %vm3622_vm12, %v4493_v46 }
 0x66c   : > { %3649 = vst.msk [vmem:[%s4670_s14 + $0xd0] sm:$0xff] %vm3622_vm12, %v4493_v46  ;;  %3650 = vst.msk [vmem:[%s4670_s14 + $0xd8] sm:$0xff] %vm3622_vm12, %v4493_v46 }
 0x66d   : > { %3651 = vst.msk [vmem:[%s4670_s14 + $0xe0] sm:$0xff] %vm3622_vm12, %v4493_v46  ;;  %3652 = vst.msk [vmem:[%s4670_s14 + $0xe8] sm:$0xff] %vm3622_vm12, %v4493_v46 }
 0x66e   : > { %3653 = vst.msk [vmem:[%s4670_s14 + $0xf0] sm:$0xff] %vm3622_vm12, %v4493_v46  ;;  %3654 = vst.msk [vmem:[%s4670_s14 + $0xf8] sm:$0xff] %vm3622_vm12, %v4493_v46 }
 0x66f PF: > { %s18_s24 = sadd.s32 1, %s4484_s24   ;;  %s8113_s17 = smov %s4460_s18 }
 0x670   : > { %p15_p5 = scmp.ge.s32.totalorder %s18_s24, 10   ;;  %s8114_s18 = smov %s4464_s19 }
 0x671   : > { %s8115_s19 = smov %s4588_s11  ;;  %s8116_s20 = smov %s4476_s22 }
 0x672   : > { %s8117_s21 = smov %s4480_s23  ;;  %s8118_s22 = smov %s8121_s0 }
 0x673   : > { %s8119_s23 = smov %s8125_s25  ;;  %17 = sbr.rel (!%p15_p5) target bundleno = 7 (0x7), region = 98 }
 0x67a   :  { %3677 = vsyncpa [#allocation8], 1 }
 0x67b   :  { %3679 = vsyncpa [#allocation8 + $0x1], 1 }

</bundles_post_ra>
